<compile_context>
chip_gen: v7x
topology: tpu7x:2x2x1
jax: 0.10.0
libtpu: 0.0.40
codegen_flags: <defaults>
</compile_context>

<pallas_src>
import functools

import jax
import jax.numpy as jnp
from jax.experimental import pallas as pl
from jax.experimental.pallas import tpu as pltpu

_LANE = 128   # hidden/output channel dims are zero-padded to this lane width


def _round_up(v, m):
    return (v + m - 1) // m * m


def _cdiv(a, b):
    return -(-a // b)


def _choose_batch_tile(batch, num_nodes):
    """Graphs per grid step: aim for M = Bt*N of ~256 rows (fills v6e/v7x MXU,
    two passes on v5e's 128-row MXU) while keeping >= 2 grid steps so v7x's two
    TensorCores can both be used."""
    bt = max(1, 256 // max(num_nodes, 1))
    bt = min(bt, batch)
    while bt > 1 and _cdiv(batch, bt) < 2:
        bt //= 2
    return max(bt, 1)


def _gnn_kernel(x_ref, adj_ref,
                w1_ref, b1_ref, w2_ref, b2_ref, w3_ref, b3_ref,
                wl_ref, bl_ref, o_ref):
    # x_ref:   (Bt, N, C_in)     bf16 (unpadded channels)
    # adj_ref: (1, Bt*N, Bt*N)   bf16 block-diagonal 0/1 adjacency (exact)
    # wK_ref:  (2*Kin, Cout_p)   bf16 = [W_rel ; W_root] stacked along K
    # wl_ref:  (2*Hp + Op, Op)   bf16 = [Wl1 ; Wl2 ; Wl3] stacked along K
    # bK_ref:  (1, Cout_p)       f32
    # o_ref:   (Bt, N, Op)       bf16 (lane-dense padded output)
    Bt, N, Cin = x_ref.shape
    M = Bt * N

    adj = adj_ref[0]                                             # (M, M) bf16
    deg = jnp.sum(adj.astype(jnp.float32), axis=-1, keepdims=True)
    inv_deg = 1.0 / jnp.maximum(deg, 1.0)                        # exact, f32

    def sage_relu(h, w_ref, b_ref):
        # h: (M, C) bf16 -> (M, Cout_p) bf16
        agg = jnp.dot(adj, h, preferred_element_type=jnp.float32) * inv_deg
        cat = jnp.concatenate([agg.astype(jnp.bfloat16), h], axis=-1)
        out = jnp.dot(cat, w_ref[...], preferred_element_type=jnp.float32)
        # bias add + ReLU in f32, then a single downcast (v5e-friendly).
        return jnp.maximum(out + b_ref[...], 0.0).astype(jnp.bfloat16)

    x0 = x_ref[...].reshape(M, Cin)                              # (M, C_in)
    x1 = sage_relu(x0, w1_ref, b1_ref)                           # (M, Hp)
    x2 = sage_relu(x1, w2_ref, b2_ref)                           # (M, Hp)
    x3 = sage_relu(x2, w3_ref, b3_ref)                           # (M, Op)

    # Final Linear over cat([x1, x2, x3], -1) as one K = 2*Hp + Op matmul.
    cat = jnp.concatenate([x1, x2, x3], axis=-1)
    y = jnp.dot(cat, wl_ref[...], preferred_element_type=jnp.float32)
    y = jnp.maximum(y + bl_ref[...], 0.0)
    o_ref[...] = y.reshape(Bt, N, -1).astype(o_ref.dtype)


def pack_params(params):
    """One-time weight packing (hoisted out of the per-call jitted path):
    zero-pad output channels to 128 lanes, stack [W_rel; W_root] along K,
    stack the three Linear pieces along K, cast to bf16."""
    C_in, H = params["w1_rel"].shape
    O = params["w3_rel"].shape[1]
    Hp = _round_up(H, _LANE)
    Op = _round_up(O, _LANE)

    def pack_conv(wr, ws, kin_p, cout_p):
        cin, cout = wr.shape
        w = jnp.zeros((2 * kin_p, cout_p), jnp.bfloat16)
        w = w.at[:cin, :cout].set(wr.astype(jnp.bfloat16))
        w = w.at[kin_p:kin_p + cin, :cout].set(ws.astype(jnp.bfloat16))
        return w

    def pad_bias(b, cout_p):
        out = jnp.zeros((1, cout_p), jnp.float32)
        return out.at[:, :b.shape[-1]].set(b.astype(jnp.float32).reshape(1, -1))

    wl = jnp.zeros((2 * Hp + Op, Op), jnp.bfloat16)
    wl = wl.at[:H, :O].set(params["wl1"].astype(jnp.bfloat16))
    wl = wl.at[Hp:Hp + H, :O].set(params["wl2"].astype(jnp.bfloat16))
    wl = wl.at[2 * Hp:2 * Hp + O, :O].set(params["wl3"].astype(jnp.bfloat16))

    return {
        # Layer 1 keeps only the 2*C_in useful K rows (x ships unpadded).
        "w1": pack_conv(params["w1_rel"], params["w1_root"], C_in, Hp),
        "b1": pad_bias(params["b1"], Hp),
        "w2": pack_conv(params["w2_rel"], params["w2_root"], Hp, Hp),
        "b2": pad_bias(params["b2"], Hp),
        "w3": pack_conv(params["w3_rel"], params["w3_root"], Hp, Op),
        "b3": pad_bias(params["b3"], Op),
        "wl": wl,
        "bl": pad_bias(params["bl"], Op),
    }


@functools.partial(jax.jit, static_argnames=("out_channels",))
def gnn_forward(x, adj, packed, out_channels):
    """x: (B, N, C_in) f32, adj: (B, N, N) f32 (0/1). Returns (B, N, O) f32."""
    B, N, C_in = x.shape
    Op = packed["w3"].shape[1]

    Bt = _choose_batch_tile(B, N)
    Bp = _round_up(B, Bt)
    num_tiles = Bp // Bt
    M = Bt * N

    x_b = x.astype(jnp.bfloat16)
    adj_b = adj.astype(jnp.bfloat16)          # 0/1 values -> lossless cast
    if Bp != B:
        x_b = jnp.concatenate(
            [x_b, jnp.zeros((Bp - B, N, C_in), jnp.bfloat16)], axis=0)
        adj_b = jnp.concatenate(
            [adj_b, jnp.zeros((Bp - B, N, N), jnp.bfloat16)], axis=0)

    # Per-tile block-diagonal adjacency: one (M, M) @ (M, C) MXU matmul per
    # layer instead of Bt tiny (N, N) ones.
    eye = jnp.eye(Bt, dtype=jnp.bfloat16)
    adj_bd = jnp.einsum("tbij,bc->tbicj",
                        adj_b.reshape(num_tiles, Bt, N, N), eye)
    adj_bd = adj_bd.reshape(num_tiles, M, M)

    weights = (packed["w1"], packed["b1"], packed["w2"], packed["b2"],
               packed["w3"], packed["b3"], packed["wl"], packed["bl"])

    def wspec(a):
        # Grid-invariant full-array block: constant index map -> the pipeline
        # keeps the block resident instead of re-fetching it each step.
        return pl.BlockSpec(a.shape, lambda b: (0, 0))

    in_specs = [
        pl.BlockSpec((Bt, N, C_in), lambda b: (b, 0, 0)),  # x, unpadded lanes
        pl.BlockSpec((1, M, M), lambda b: (b, 0, 0)),      # block-diag adj
    ] + [wspec(a) for a in weights]

    out_specs = pl.BlockSpec((Bt, N, Op), lambda b: (b, 0, 0))

    out = pl.pallas_call(
        _gnn_kernel,
        out_shape=jax.ShapeDtypeStruct((Bp, N, Op), jnp.bfloat16),
        grid_spec=pltpu.PrefetchScalarGridSpec(
            num_scalar_prefetch=0,
            grid=(num_tiles,),
            in_specs=in_specs,
            out_specs=out_specs,
        ),
        compiler_params=pltpu.CompilerParams(
            dimension_semantics=("parallel",),
            vmem_limit_bytes=32 * 1024 * 1024),
    )(x_b, adj_bd, *weights)

    # Strip batch/lane padding and hand back f32. When chaining GNN blocks one
    # would instead keep the padded bf16 (N, Op) layout and skip this slice.
    return out[:B, :, :out_channels].astype(jnp.float32)


def init_params(key, in_channels, hidden_channels, out_channels):
    """Deterministic synthetic parameters. Weights stored as (C_in, C_out),
    i.e. already transposed relative to torch.nn.Linear's (out, in)."""
    ks = jax.random.split(key, 8)

    def w(k, cin, cout):
        return (jax.random.normal(k, (cin, cout), jnp.float32)
                * (1.0 / jnp.sqrt(cin)))

    return {
        # conv1: in -> hidden
        "w1_rel":  w(ks[0], in_channels, hidden_channels),
        "w1_root": w(ks[1], in_channels, hidden_channels),
        "b1": jnp.zeros((1, hidden_channels), jnp.float32) + 0.01,
        # conv2: hidden -> hidden
        "w2_rel":  w(ks[2], hidden_channels, hidden_channels),
        "w2_root": w(ks[3], hidden_channels, hidden_channels),
        "b2": jnp.zeros((1, hidden_channels), jnp.float32) + 0.01,
        # conv3: hidden -> out
        "w3_rel":  w(ks[4], hidden_channels, out_channels),
        "w3_root": w(ks[5], hidden_channels, out_channels),
        "b3": jnp.zeros((1, out_channels), jnp.float32) + 0.01,
        # final Linear(2H + O -> O), split along its input into 3 pieces
        "wl1": w(ks[6], hidden_channels, out_channels),
        "wl2": w(ks[7], hidden_channels, out_channels),
        "wl3": w(jax.random.fold_in(key, 99), out_channels, out_channels),
        "bl": jnp.zeros((1, out_channels), jnp.float32) + 0.01,
    }


def gnn_reference(x, adj, params):
    """Pure-JAX f32 reference mirroring the PyTorch forward pass."""
    deg = jnp.maximum(jnp.sum(adj, axis=-1, keepdims=True), 1.0)

    def sage(h, wr, ws, b):
        agg = jnp.einsum("bij,bjc->bic", adj, h) / deg
        return jax.nn.relu(agg @ wr + h @ ws + b)

    x1 = sage(x,  params["w1_rel"], params["w1_root"], params["b1"])
    x2 = sage(x1, params["w2_rel"], params["w2_root"], params["b2"])
    x3 = sage(x2, params["w3_rel"], params["w3_root"], params["b3"])
    y = x1 @ params["wl1"] + x2 @ params["wl2"] + x3 @ params["wl3"] + params["bl"]
    return jax.nn.relu(y)


if __name__ == "__main__":
    B, N = 32, 16
    in_channels, hidden_channels, out_channels = 8, 32, 16

    key = jax.random.PRNGKey(0)
    kx, kadj, kp = jax.random.split(key, 3)

    x = jax.random.normal(kx, (B, N, in_channels), jnp.float32)
    # Symmetric random 0/1 adjacency (no self-loops; add_loop=False).
    a = (jax.random.uniform(kadj, (B, N, N)) > 0.6).astype(jnp.float32)
    adj = jnp.clip(a + jnp.swapaxes(a, 1, 2), 0.0, 1.0)
    adj = adj * (1.0 - jnp.eye(N, dtype=jnp.float32)[None])

    params = init_params(kp, in_channels, hidden_channels, out_channels)
    packed = pack_params(params)          # one-time, outside the jitted path

    out = jax.block_until_ready(gnn_forward(x, adj, packed, out_channels))
    ref = gnn_reference(x, adj, params)

    assert out.shape == (B, N, out_channels)
    # Kernel runs matmuls with bf16 operands (f32 accumulation) and stores a
    # bf16 output, so compare with a tolerance consistent with bf16 rounding.
    err = float(jnp.max(jnp.abs(out - ref)) / (jnp.max(jnp.abs(ref)) + 1e-6))
    assert err < 3e-2, f"mismatch vs reference: normalized max err = {err:.4g}"

    print("KERNEL_OK")
</pallas_src>

<mosaic_0001>
module attributes {stable_mosaic.version = 11 : i64} {
  func.func @_gnn_kernel(%arg0: i32, %arg1: memref<16x16x8xbf16, #tpu.memory_space<vmem>>, %arg2: memref<1x256x256xbf16, #tpu.memory_space<vmem>>, %arg3: memref<16x128xbf16, #tpu.memory_space<vmem>>, %arg4: memref<1x128xf32, #tpu.memory_space<vmem>>, %arg5: memref<256x128xbf16, #tpu.memory_space<vmem>>, %arg6: memref<1x128xf32, #tpu.memory_space<vmem>>, %arg7: memref<256x128xbf16, #tpu.memory_space<vmem>>, %arg8: memref<1x128xf32, #tpu.memory_space<vmem>>, %arg9: memref<384x128xbf16, #tpu.memory_space<vmem>>, %arg10: memref<1x128xf32, #tpu.memory_space<vmem>>, %arg11: memref<16x16x128xbf16, #tpu.memory_space<vmem>>) attributes {dimension_semantics = [#tpu.dimension_semantics<parallel>], iteration_bounds = array<i64: 2>, scalar_prefetch = 0 : i64, scratch_operands = 0 : i64, tpu.core_type = #tpu.core_type<tc>, window_params = [{transform_indices = @transform_0, window_bounds = array<i64: 16, 16, 8>}, {transform_indices = @transform_1, window_bounds = array<i64: 1, 256, 256>}, {pipeline_mode = #tpu.pipeline_mode<synchronous>, transform_indices = @transform_2, window_bounds = array<i64: 16, 128>}, {pipeline_mode = #tpu.pipeline_mode<synchronous>, transform_indices = @transform_3, window_bounds = array<i64: 1, 128>}, {pipeline_mode = #tpu.pipeline_mode<synchronous>, transform_indices = @transform_4, window_bounds = array<i64: 256, 128>}, {pipeline_mode = #tpu.pipeline_mode<synchronous>, transform_indices = @transform_5, window_bounds = array<i64: 1, 128>}, {pipeline_mode = #tpu.pipeline_mode<synchronous>, transform_indices = @transform_6, window_bounds = array<i64: 256, 128>}, {pipeline_mode = #tpu.pipeline_mode<synchronous>, transform_indices = @transform_7, window_bounds = array<i64: 1, 128>}, {pipeline_mode = #tpu.pipeline_mode<synchronous>, transform_indices = @transform_8, window_bounds = array<i64: 384, 128>}, {pipeline_mode = #tpu.pipeline_mode<synchronous>, transform_indices = @transform_9, window_bounds = array<i64: 1, 128>}, {transform_indices = @transform_10, window_bounds = array<i64: 16, 16, 128>}]} {
    %c0 = arith.constant 0 : index
    %c0_0 = arith.constant 0 : index
    %c0_1 = arith.constant 0 : index
    %0 = vector.load %arg2[%c0, %c0_0, %c0_1] : memref<1x256x256xbf16, #tpu.memory_space<vmem>>, vector<1x256x256xbf16>
    %1 = vector.shape_cast %0 : vector<1x256x256xbf16> to vector<256x256xbf16>
    %2 = arith.extf %1 : vector<256x256xbf16> to vector<256x256xf32>
    %cst = arith.constant dense<0.000000e+00> : vector<256xf32>
    %3 = vector.multi_reduction <add>, %2, %cst [1] : vector<256x256xf32> to vector<256xf32>
    %4 = vector.shape_cast %3 : vector<256xf32> to vector<256x1xf32>
    %cst_2 = arith.constant 1.000000e+00 : f32
    %5 = vector.broadcast %cst_2 : f32 to vector<256x1xf32>
    %6 = arith.maximumf %4, %5 : vector<256x1xf32>
    %cst_3 = arith.constant 1.000000e+00 : f32
    %7 = vector.broadcast %cst_3 : f32 to vector<256x1xf32>
    %8 = arith.divf %7, %6 : vector<256x1xf32>
    %c0_4 = arith.constant 0 : index
    %c0_5 = arith.constant 0 : index
    %c0_6 = arith.constant 0 : index
    %9 = vector.load %arg1[%c0_4, %c0_5, %c0_6] : memref<16x16x8xbf16, #tpu.memory_space<vmem>>, vector<16x16x8xbf16>
    %10 = vector.shape_cast %9 : vector<16x16x8xbf16> to vector<256x8xbf16>
    %cst_7 = arith.constant dense<0.000000e+00> : vector<256x8xf32>
    %11 = tpu.matmul %1, %10, %cst_7 {dimension_numbers = #tpu.dot_dimension_numbers<[1], [0], [0], [1], [0, 0, 1, 1], [], []>} : vector<256x256xbf16>, vector<256x8xbf16>, vector<256x8xf32> -> vector<256x8xf32>
    %12 = vector.broadcast %8 : vector<256x1xf32> to vector<256x8xf32>
    %13 = arith.mulf %11, %12 : vector<256x8xf32>
    %14 = arith.truncf %13 : vector<256x8xf32> to vector<256x8xbf16>
    %15 = tpu.concatenate %14, %10 in 1 : vector<256x8xbf16>, vector<256x8xbf16> -> vector<256x16xbf16>
    %c0_8 = arith.constant 0 : index
    %c0_9 = arith.constant 0 : index
    %16 = vector.load %arg3[%c0_8, %c0_9] : memref<16x128xbf16, #tpu.memory_space<vmem>>, vector<16x128xbf16>
    %cst_10 = arith.constant dense<0.000000e+00> : vector<256x128xf32>
    %17 = tpu.matmul %15, %16, %cst_10 {dimension_numbers = #tpu.dot_dimension_numbers<[1], [0], [0], [1], [0, 0, 1, 1], [], []>} : vector<256x16xbf16>, vector<16x128xbf16>, vector<256x128xf32> -> vector<256x128xf32>
    %c0_11 = arith.constant 0 : index
    %c0_12 = arith.constant 0 : index
    %18 = vector.load %arg4[%c0_11, %c0_12] : memref<1x128xf32, #tpu.memory_space<vmem>>, vector<1x128xf32>
    %19 = vector.broadcast %18 : vector<1x128xf32> to vector<256x128xf32>
    %20 = arith.addf %17, %19 : vector<256x128xf32>
    %cst_13 = arith.constant 0.000000e+00 : f32
    %21 = vector.broadcast %cst_13 : f32 to vector<256x128xf32>
    %22 = arith.maximumf %20, %21 : vector<256x128xf32>
    %23 = arith.truncf %22 : vector<256x128xf32> to vector<256x128xbf16>
    %cst_14 = arith.constant dense<0.000000e+00> : vector<256x128xf32>
    %24 = tpu.matmul %1, %23, %cst_14 {dimension_numbers = #tpu.dot_dimension_numbers<[1], [0], [0], [1], [0, 0, 1, 1], [], []>} : vector<256x256xbf16>, vector<256x128xbf16>, vector<256x128xf32> -> vector<256x128xf32>
    %25 = vector.broadcast %8 : vector<256x1xf32> to vector<256x128xf32>
    %26 = arith.mulf %24, %25 : vector<256x128xf32>
    %27 = arith.truncf %26 : vector<256x128xf32> to vector<256x128xbf16>
    %28 = tpu.concatenate %27, %23 in 1 : vector<256x128xbf16>, vector<256x128xbf16> -> vector<256x256xbf16>
    %c0_15 = arith.constant 0 : index
    %c0_16 = arith.constant 0 : index
    %29 = vector.load %arg5[%c0_15, %c0_16] : memref<256x128xbf16, #tpu.memory_space<vmem>>, vector<256x128xbf16>
    %cst_17 = arith.constant dense<0.000000e+00> : vector<256x128xf32>
    %30 = tpu.matmul %28, %29, %cst_17 {dimension_numbers = #tpu.dot_dimension_numbers<[1], [0], [0], [1], [0, 0, 1, 1], [], []>} : vector<256x256xbf16>, vector<256x128xbf16>, vector<256x128xf32> -> vector<256x128xf32>
    %c0_18 = arith.constant 0 : index
    %c0_19 = arith.constant 0 : index
    %31 = vector.load %arg6[%c0_18, %c0_19] : memref<1x128xf32, #tpu.memory_space<vmem>>, vector<1x128xf32>
    %32 = vector.broadcast %31 : vector<1x128xf32> to vector<256x128xf32>
    %33 = arith.addf %30, %32 : vector<256x128xf32>
    %cst_20 = arith.constant 0.000000e+00 : f32
    %34 = vector.broadcast %cst_20 : f32 to vector<256x128xf32>
    %35 = arith.maximumf %33, %34 : vector<256x128xf32>
    %36 = arith.truncf %35 : vector<256x128xf32> to vector<256x128xbf16>
    %cst_21 = arith.constant dense<0.000000e+00> : vector<256x128xf32>
    %37 = tpu.matmul %1, %36, %cst_21 {dimension_numbers = #tpu.dot_dimension_numbers<[1], [0], [0], [1], [0, 0, 1, 1], [], []>} : vector<256x256xbf16>, vector<256x128xbf16>, vector<256x128xf32> -> vector<256x128xf32>
    %38 = vector.broadcast %8 : vector<256x1xf32> to vector<256x128xf32>
    %39 = arith.mulf %37, %38 : vector<256x128xf32>
    %40 = arith.truncf %39 : vector<256x128xf32> to vector<256x128xbf16>
    %41 = tpu.concatenate %40, %36 in 1 : vector<256x128xbf16>, vector<256x128xbf16> -> vector<256x256xbf16>
    %c0_22 = arith.constant 0 : index
    %c0_23 = arith.constant 0 : index
    %42 = vector.load %arg7[%c0_22, %c0_23] : memref<256x128xbf16, #tpu.memory_space<vmem>>, vector<256x128xbf16>
    %cst_24 = arith.constant dense<0.000000e+00> : vector<256x128xf32>
    %43 = tpu.matmul %41, %42, %cst_24 {dimension_numbers = #tpu.dot_dimension_numbers<[1], [0], [0], [1], [0, 0, 1, 1], [], []>} : vector<256x256xbf16>, vector<256x128xbf16>, vector<256x128xf32> -> vector<256x128xf32>
    %c0_25 = arith.constant 0 : index
    %c0_26 = arith.constant 0 : index
    %44 = vector.load %arg8[%c0_25, %c0_26] : memref<1x128xf32, #tpu.memory_space<vmem>>, vector<1x128xf32>
    %45 = vector.broadcast %44 : vector<1x128xf32> to vector<256x128xf32>
    %46 = arith.addf %43, %45 : vector<256x128xf32>
    %cst_27 = arith.constant 0.000000e+00 : f32
    %47 = vector.broadcast %cst_27 : f32 to vector<256x128xf32>
    %48 = arith.maximumf %46, %47 : vector<256x128xf32>
    %49 = arith.truncf %48 : vector<256x128xf32> to vector<256x128xbf16>
    %50 = tpu.concatenate %23, %36, %49 in 1 : vector<256x128xbf16>, vector<256x128xbf16>, vector<256x128xbf16> -> vector<256x384xbf16>
    %c0_28 = arith.constant 0 : index
    %c0_29 = arith.constant 0 : index
    %51 = vector.load %arg9[%c0_28, %c0_29] : memref<384x128xbf16, #tpu.memory_space<vmem>>, vector<384x128xbf16>
    %cst_30 = arith.constant dense<0.000000e+00> : vector<256x128xf32>
    %52 = tpu.matmul %50, %51, %cst_30 {dimension_numbers = #tpu.dot_dimension_numbers<[1], [0], [0], [1], [0, 0, 1, 1], [], []>} : vector<256x384xbf16>, vector<384x128xbf16>, vector<256x128xf32> -> vector<256x128xf32>
    %c0_31 = arith.constant 0 : index
    %c0_32 = arith.constant 0 : index
    %53 = vector.load %arg10[%c0_31, %c0_32] : memref<1x128xf32, #tpu.memory_space<vmem>>, vector<1x128xf32>
    %54 = vector.broadcast %53 : vector<1x128xf32> to vector<256x128xf32>
    %55 = arith.addf %52, %54 : vector<256x128xf32>
    %cst_33 = arith.constant 0.000000e+00 : f32
    %56 = vector.broadcast %cst_33 : f32 to vector<256x128xf32>
    %57 = arith.maximumf %55, %56 : vector<256x128xf32>
    %58 = vector.shape_cast %57 : vector<256x128xf32> to vector<16x16x128xf32>
    %59 = arith.truncf %58 : vector<16x16x128xf32> to vector<16x16x128xbf16>
    %c0_34 = arith.constant 0 : index
    %c0_35 = arith.constant 0 : index
    %c0_36 = arith.constant 0 : index
    %60 = vector.load %arg11[%c0_34, %c0_35, %c0_36] : memref<16x16x128xbf16, #tpu.memory_space<vmem>>, vector<16x16x128xbf16>
    tpu.vector_store %arg11[%c0_34, %c0_35, %c0_36], %59 {strides = array<i32>} : memref<16x16x128xbf16, #tpu.memory_space<vmem>>, vector<16x16x128xbf16>,
    return
  }
  func.func @transform_0(%arg0: i32) -> (i32, i32, i32) {
    %c0_i32 = arith.constant 0 : i32
    %c0_i32_0 = arith.constant 0 : i32
    %c0_i32_1 = arith.constant 0 : i32
    return %arg0, %c0_i32, %c0_i32_0 : i32, i32, i32
  }
  func.func @transform_1(%arg0: i32) -> (i32, i32, i32) {
    %c0_i32 = arith.constant 0 : i32
    %c0_i32_0 = arith.constant 0 : i32
    %c0_i32_1 = arith.constant 0 : i32
    return %arg0, %c0_i32, %c0_i32_0 : i32, i32, i32
  }
  func.func @transform_2(%arg0: i32) -> (i32, i32) {
    %c0_i32 = arith.constant 0 : i32
    %c0_i32_0 = arith.constant 0 : i32
    %c0_i32_1 = arith.constant 0 : i32
    return %c0_i32, %c0_i32_0 : i32, i32
  }
  func.func @transform_3(%arg0: i32) -> (i32, i32) {
    %c0_i32 = arith.constant 0 : i32
    %c0_i32_0 = arith.constant 0 : i32
    %c0_i32_1 = arith.constant 0 : i32
    return %c0_i32, %c0_i32_0 : i32, i32
  }
  func.func @transform_4(%arg0: i32) -> (i32, i32) {
    %c0_i32 = arith.constant 0 : i32
    %c0_i32_0 = arith.constant 0 : i32
    %c0_i32_1 = arith.constant 0 : i32
    return %c0_i32, %c0_i32_0 : i32, i32
  }
  func.func @transform_5(%arg0: i32) -> (i32, i32) {
    %c0_i32 = arith.constant 0 : i32
    %c0_i32_0 = arith.constant 0 : i32
    %c0_i32_1 = arith.constant 0 : i32
    return %c0_i32, %c0_i32_0 : i32, i32
  }
  func.func @transform_6(%arg0: i32) -> (i32, i32) {
    %c0_i32 = arith.constant 0 : i32
    %c0_i32_0 = arith.constant 0 : i32
    %c0_i32_1 = arith.constant 0 : i32
    return %c0_i32, %c0_i32_0 : i32, i32
  }
  func.func @transform_7(%arg0: i32) -> (i32, i32) {
    %c0_i32 = arith.constant 0 : i32
    %c0_i32_0 = arith.constant 0 : i32
    %c0_i32_1 = arith.constant 0 : i32
    return %c0_i32, %c0_i32_0 : i32, i32
  }
  func.func @transform_8(%arg0: i32) -> (i32, i32) {
    %c0_i32 = arith.constant 0 : i32
    %c0_i32_0 = arith.constant 0 : i32
    %c0_i32_1 = arith.constant 0 : i32
    return %c0_i32, %c0_i32_0 : i32, i32
  }
  func.func @transform_9(%arg0: i32) -> (i32, i32) {
    %c0_i32 = arith.constant 0 : i32
    %c0_i32_0 = arith.constant 0 : i32
    %c0_i32_1 = arith.constant 0 : i32
    return %c0_i32, %c0_i32_0 : i32, i32
  }
  func.func @transform_10(%arg0: i32) -> (i32, i32, i32) {
    %c0_i32 = arith.constant 0 : i32
    %c0_i32_0 = arith.constant 0 : i32
    %c0_i32_1 = arith.constant 0 : i32
    return %arg0, %c0_i32, %c0_i32_0 : i32, i32, i32
  }
}

</mosaic_0001>

<bundles_post_ra>
// kernel: gnn_forward.1
= control target key start
LH: loop header
LB: loop body
LE: loop exit
PB: predicated region body
PF: predicated region fallthrough
CT: control target
= control target key end

     0   :  { %s4756_s13 = smov 0   ;;  %s6079_s0 = inlined_call_operand.vmem [shape: bf16[32,16,8], index: 0, kind: input, shape index: {}]   ;;  %s6080_s1 = inlined_call_operand.vmem [shape: bf16[2,256,256], index: 1, kind: input, shape index: {}]   ;;  %s6081_s2 = inlined_call_operand.vmem [shape: bf16[16,128], index: 2, kind: input, shape index: {}]   ;;  %s6082_s3 = inlined_call_operand.vmem [shape: f32[1,128], index: 3, kind: input, shape index: {}]   ;;  %s6083_s4 = inlined_call_operand.vmem [shape: bf16[256,128], index: 4, kind: input, shape index: {}]   ;;  %s6084_s5 = inlined_call_operand.vmem [shape: f32[1,128], index: 5, kind: input, shape index: {}]   ;;  %s6085_s6 = inlined_call_operand.vmem [shape: bf16[256,128], index: 6, kind: input, shape index: {}]   ;;  %s6086_s7 = inlined_call_operand.vmem [shape: f32[1,128], index: 7, kind: input, shape index: {}]   ;;  %s6087_s8 = inlined_call_operand.vmem [shape: bf16[384,128], index: 8, kind: input, shape index: {}]   ;;  %s6088_s9 = inlined_call_operand.vmem [shape: f32[1,128], index: 9, kind: input, shape index: {}]   ;;  %s6089_s10 = inlined_call_operand.vmem [shape: bf16[32,16,128], index: 10, kind: output, shape index: {}]  }
   0x1 LB: > { %s3401_s14 = sadd.s32 4294967295, %s4698_s13   ;;  %p3405_p0 = scmp.ge.s32.totalorder %s4698_s13, 1  ;;  %s4698_s13 = sphi %s4756_s13, %s20_s13  }
   0x2   : > { %p324_p1 = scmp.lt.s32.totalorder %s4698_s13, 3 }
   0x4   : > { %p325_p2 = pnand %p3405_p0, %p324_p1 }
   0x6   : > { %328 = sbr.rel (%p325_p2) target bundleno = 2014 (0x7de), region = 60 }
   0xd   : > { %s3406_s15 = sshll.u32 %s3401_s14, 4  ;;  %p376_p3 = scmp.lt.s32.totalorder %s3401_s14, 1  ;;  %vm1206_vm0 = vcmask 64512   ;;  %vm1270_vm1 = vcmask 130048  }
   0xe   : > { %p370_p4 = scmp.lt.s32.totalorder %s3406_s15, 31  ;;  %s4700_s24 = smov 8  }
   0xf   : > { %s6291_s14 = smov (!%p376_p3, %s3401_s14), 1 }
  0x10   : > { %s6293_s15 = smov (!%p370_p4, %s3406_s15), 31  ;;  %s3574_s16 = sshll.u32 %s6291_s14, 8 }
  0x11   : > { %s3573_s17 = sshll.u32 %s6293_s15, 3  ;;  %s4770_s20 = scalar_lea.vmem %s6080_s1, %s3574_s16 }
  0x12   : > { %s4777_s23 = scalar_lea.vmem %s6079_s0, %s3573_s17  ;;  %v4780_v0 = vld [vmem:[%s4770_s20 + $0x10] sm:$0xff]  ;;  %v4783_v1 = vld [vmem:[%s4770_s20] sm:$0xff]  ;;  %v4786_v2 = vld [vmem:[%s4770_s20 + $0x18] sm:$0xff]  ;;  %s6002_s30 = scalar_lea.vmem %s6089_s10, %s3573_s17 }
  0x13   : > { %v4789_v3 = vld [vmem:[%s4777_s23 + $0x40] sm:$0xff]   ;;  %v425_v4 = vunpack.c.l.bf16 %v4780_v0  ;;  %v426_v5 = vunpack.c.h.bf16 %v4780_v0  ;;  %v421_v6 = vunpack.c.l.bf16 %v4783_v1  ;;  %v422_v7 = vunpack.c.h.bf16 %v4783_v1  ;;  %v4802_v13 = vld [vmem:[%s4777_s23 + $0x48] sm:$0xff]   ;;  %v4819_v20 = vld [vmem:[%s4777_s23 + $0x50] sm:$0xff]  }
  0x14   : > { %v4796_v8 = vld [vmem:[%s4777_s23] sm:$0xff]   ;;  %v427_v9 = vunpack.c.l.bf16 %v4786_v2  ;;  %v428_v10 = vunpack.c.h.bf16 %v4786_v2  ;;  %3703 = vmatprep.subr.bf16.mxu0 %v4789_v3  ;;  %v4806_v14 = vld [vmem:[%s4770_s20 + $0x8] sm:$0xff]  ;;  %v4834_v28 = vld [vmem:[%s4777_s23 + $0x10] sm:$0xff]  }
  0x15   : > { %v491_v11 = vadd.f32 %v426_v5, %v425_v4  ;;  %v485_v12 = vadd.f32 %v422_v7, %v421_v6  ;;  %3704 = vmatpush3.bf16.msra.mxu0 %v4796_v8  ;;  %v423_v16 = vunpack.c.l.bf16 %v4806_v14  ;;  %v424_v17 = vunpack.c.h.bf16 %v4806_v14  ;;  %v4811_v18 = vld [vmem:[%s4777_s23 + $0x8] sm:$0xff]   ;;  %v4825_v22 = vld [vmem:[%s4770_s20 + $0x20] sm:$0xff]  ;;  %v4837_v30 = vld [vmem:[%s4770_s20 + $0x38] sm:$0xff] }
  0x16   : > { %v494_v15 = vadd.f32 %v428_v10, %v427_v9  ;;  %v4815_v19 = vcombine.high %v4783_v1, %v4806_v14  ;;  %3705 = vmatprep.subr.bf16.mxu0 %v4802_v13  ;;  %v4822_v21 = vld [vmem:[%s4770_s20 + $0x28] sm:$0xff]  ;;  %v429_v26 = vunpack.c.l.bf16 %v4825_v22  ;;  %v430_v27 = vunpack.c.h.bf16 %v4825_v22  ;;  %v4840_v31 = vld [vmem:[%s4770_s20 + $0x30] sm:$0xff]  ;;  %v4844_v33 = vld [vmem:[%s4777_s23 + $0x58] sm:$0xff]  }
  0x17   : > { %492 = vadd.xlane.f32.xlu1 %v491_v11  ;;  %486 = vadd.xlane.f32.xlu0 %v485_v12  ;;  %v488_v23 = vadd.f32 %v424_v17, %v423_v16  ;;  %v431_v24 = vunpack.c.l.bf16 %v4822_v21  ;;  %v432_v25 = vunpack.c.h.bf16 %v4822_v21  ;;  %v435_v34 = vunpack.c.l.bf16 %v4837_v30  ;;  %v4851_v38 = vld [vmem:[%s4777_s23 + $0x18] sm:$0xff]   ;;  %v4854_v39 = vld [vmem:[%s4770_s20 + $0x48] sm:$0xff]  ;;  %v4860_v42 = vld [vmem:[%s4770_s20 + $0x40] sm:$0xff] }
  0x18   : > { %997 = vmatprep.mubr.bf16.mxu0 %v4815_v19  ;;  %v497_v32 = vadd.f32 %v430_v27, %v429_v26  ;;  %v436_v35 = vunpack.c.h.bf16 %v4837_v30  ;;  %v433_v36 = vunpack.c.l.bf16 %v4840_v31  ;;  %v434_v37 = vunpack.c.h.bf16 %v4840_v31  ;;  %v4866_v47 = vld [vmem:[%s4777_s23 + $0x60] sm:$0xff]   ;;  %v4869_v48 = vld [vmem:[%s4770_s20 + $0x58] sm:$0xff]  ;;  %v4872_v49 = vld [vmem:[%s4770_s20 + $0x50] sm:$0xff] }
  0x19   : > { %3706 = vmatpush3.bf16.msra.mxu0 %v4811_v18  ;;  %v500_v29 = vadd.f32 %v432_v25, %v431_v24  ;;  %v439_v40 = vunpack.c.l.bf16 %v4854_v39  ;;  %v440_v41 = vunpack.c.h.bf16 %v4854_v39  ;;  %v437_v45 = vunpack.c.l.bf16 %v4860_v42  ;;  %v4876_v52 = vld [vmem:[%s4777_s23 + $0x20] sm:$0xff]   ;;  %v4879_v53 = vld [vmem:[%s4777_s23 + $0x68] sm:$0xff]   ;;  %v4901_v7 = vld [vmem:[%s4770_s20 + $0x78] sm:$0xff] }
  0x1a   : > { %3707 = vmatprep.subr.bf16.mxu0 %v4819_v20  ;;  %v506_v43 = vadd.f32 %v436_v35, %v435_v34  ;;  %v503_v44 = vadd.f32 %v434_v37, %v433_v36  ;;  %v438_v46 = vunpack.c.h.bf16 %v4860_v42  ;;  %v443_v54 = vunpack.c.l.bf16 %v4869_v48  ;;  %v4886_v58 = vld [vmem:[%s4770_s20 + $0x68] sm:$0xff]  ;;  %v4890_v59 = vld [vmem:[%s4770_s20 + $0x60] sm:$0xff]  ;;  %v4905_v9 = vld [vmem:[%s4777_s23 + $0x70] sm:$0xff]  }
  0x1b   : > { %495 = vadd.xlane.f32.xlu1 %v494_v15  ;;  %489 = vadd.xlane.f32.xlu0 %v488_v23  ;;  %v512_v50 = vadd.f32 %v440_v41, %v439_v40  ;;  %v444_v55 = vunpack.c.h.bf16 %v4869_v48  ;;  %v441_v56 = vunpack.c.l.bf16 %v4872_v49  ;;  %v442_v57 = vunpack.c.h.bf16 %v4872_v49  ;;  %v4894_v60 = vld [vmem:[%s4777_s23 + $0x28] sm:$0xff]   ;;  %v4908_v10 = vld [vmem:[%s4770_s20 + $0x70] sm:$0xff]  ;;  %v4916_v17 = vld [vmem:[%s4777_s23 + $0x78] sm:$0xff]  }
  0x1c   : > { %v509_v51 = vadd.f32 %v438_v46, %v437_v45  ;;  %v447_v61 = vunpack.c.l.bf16 %v4886_v58  ;;  %v448_v62 = vunpack.c.h.bf16 %v4886_v58  ;;  %v445_v5 = vunpack.c.l.bf16 %v4890_v59  ;;  %v4912_v12 = vld [vmem:[%s4777_s23 + $0x30] sm:$0xff]   ;;  %v4922_v26 = vld [vmem:[%s4770_s20 + $0x80] sm:$0xff]  ;;  %v4926_v27 = vld [vmem:[%s4777_s23 + $0x38] sm:$0xff]  }
  0x1d   : > { %3708 = vmatpush3.bf16.msra.mxu0 %v4834_v28  ;;  %v518_v63 = vadd.f32 %v444_v55, %v443_v54  ;;  %v515_v4 = vadd.f32 %v442_v57, %v441_v56  ;;  %v446_v6 = vunpack.c.h.bf16 %v4890_v59  ;;  %v451_v15 = vunpack.c.l.bf16 %v4901_v7  ;;  %v409_v57 = vld [vmem:[%s4770_s20 + $0xa0] sm:$0xff] }
  0x1e   : > { %3709 = vmatprep.subr.bf16.mxu0 %v4844_v33  ;;  %v524_v11 = vadd.f32 %v448_v62, %v447_v61  ;;  %v452_v23 = vunpack.c.h.bf16 %v4901_v7  ;;  %v449_v24 = vunpack.c.l.bf16 %v4908_v10  ;;  %v450_v25 = vunpack.c.h.bf16 %v4908_v10 }
  0x1f   : > { %501 = vadd.xlane.f32.xlu1 %v500_v29  ;;  %498 = vadd.xlane.f32.xlu0 %v497_v32  ;;  %v521_v16 = vadd.f32 %v446_v6, %v445_v5  ;;  %v4930_v29 = vld [vmem:[%s4770_s20 + $0x88] sm:$0xff]  ;;  %v453_v35 = vunpack.c.l.bf16 %v4922_v26  ;;  %v454_v36 = vunpack.c.h.bf16 %v4922_v26  ;;  %v4937_v37 = vcombine.low %v4783_v1, %v4806_v14 }
  0x20   : > { %v530_v32 = vadd.f32 %v452_v23, %v451_v15  ;;  %v527_v34 = vadd.f32 %v450_v25, %v449_v24  ;;  %v4942_v40 = vcombine.high %v4780_v0, %v4786_v2  ;;  %v4950_v14 = vcombine.low %v4780_v0, %v4786_v2  ;;  %v411_v23 = vld [vmem:[%s4770_s20 + $0xb0] sm:$0xff]  ;;  %v412_v24 = vld [vmem:[%s4770_s20 + $0xb8] sm:$0xff] }
  0x21   : > { %3710 = vmatpush3.bf16.msra.mxu0 %v4851_v38  ;;  %v533_v41 = vadd.f32 %v454_v36, %v453_v35  ;;  %v4954_v45 = vcombine.high %v4825_v22, %v4822_v21  ;;  %v4960_v46 = vcombine.low %v4825_v22, %v4822_v21  ;;  %v4972_v0 = vcombine.low %v4840_v31, %v4837_v30  ;;  %v415_v35 = vld [vmem:[%s4770_s20 + $0xd0] sm:$0xff]  ;;  %v416_v36 = vld [vmem:[%s4770_s20 + $0xd8] sm:$0xff] }
  0x22   : > { %3711 = vmatprep.subr.bf16.mxu0 %v4866_v47  ;;  %v4976_v2 = vcombine.high %v4860_v42, %v4854_v39  ;;  %v4984_v21 = vcombine.low %v4860_v42, %v4854_v39  ;;  %v4998_v22 = vcombine.high %v4890_v59, %v4886_v58  ;;  %v5005_v42 = vcombine.low %v4890_v59, %v4886_v58 }
  0x23   : > { %507 = vadd.xlane.f32.xlu1 %v506_v43  ;;  %504 = vadd.xlane.f32.xlu0 %v503_v44  ;;  %v455_v43 = vunpack.c.l.bf16 %v4930_v29  ;;  %v456_v44 = vunpack.c.h.bf16 %v4930_v29  ;;  %v5016_v56 = vcombine.low %v4908_v10, %v4901_v7  ;;  %v5021_v58 = vcombine.high %v4922_v26, %v4930_v29 }
  0x24   : > { %v461_v61 = vunpack.c.l.bf16 %v409_v57  ;;  %v462_v62 = vunpack.c.h.bf16 %v409_v57 }
  0x25   : > { %3712 = vmatpush3.bf16.msra.mxu0 %v4876_v52  ;;  %v536_v1 = vadd.f32 %v456_v44, %v455_v43  ;;  %v5064_v43 = vcombine.high %v415_v35, %v416_v36  ;;  %v465_v44 = vunpack.c.l.bf16 %v411_v23 }
  0x26   : > { %3713 = vmatprep.subr.bf16.mxu0 %v4879_v53 }
  0x27   : > { %513 = vadd.xlane.f32.xlu1 %v512_v50  ;;  %510 = vadd.xlane.f32.xlu0 %v509_v51  ;;  %v4964_v50 = vcombine.high %v4840_v31, %v4837_v30  ;;  %v407_v30 = vld [vmem:[%s4770_s20 + $0x90] sm:$0xff]  ;;  %v408_v51 = vld [vmem:[%s4770_s20 + $0x98] sm:$0xff] }
  0x28   : > { %v457_v31 = vunpack.c.l.bf16 %v407_v30  ;;  %v458_v39 = vunpack.c.h.bf16 %v407_v30  ;;  %v459_v54 = vunpack.c.l.bf16 %v408_v51  ;;  %v460_v55 = vunpack.c.h.bf16 %v408_v51 }
  0x29   : > { %3714 = vmatpush3.bf16.msra.mxu0 %v4894_v60  ;;  %v5034_v15 = vcombine.low %v407_v30, %v408_v51 }
  0x2a   : > { %3715 = vmatprep.subr.bf16.mxu0 %v4905_v9  ;;  %v542_v59 = vadd.f32 %v460_v55, %v459_v54  ;;  %v419_v54 = vld [vmem:[%s4770_s20 + $0xf0] sm:$0xff]  ;;  %v5081_v55 = vld [vmem:[%s4770_s20 + $0xf8] sm:$0xff] }
  0x2b   : > { %519 = vadd.xlane.f32.xlu1 %v518_v63  ;;  %516 = vadd.xlane.f32.xlu0 %v515_v4  ;;  %v410_v63 = vld [vmem:[%s4770_s20 + $0xa8] sm:$0xff]  ;;  %v545_v4 = vadd.f32 %v462_v62, %v461_v61  ;;  %v467_v61 = vunpack.c.l.bf16 %v412_v24  ;;  %v468_v62 = vunpack.c.h.bf16 %v412_v24 }
  0x2c   : > { %v463_v5 = vunpack.c.l.bf16 %v410_v63  ;;  %v464_v6 = vunpack.c.h.bf16 %v410_v63  ;;  %v5044_v25 = vcombine.low %v409_v57, %v410_v63 }
  0x2d   : > { %3716 = vmatpush3.bf16.msra.mxu0 %v4912_v12 }
  0x2e   : > { %3717 = vmatprep.subr.bf16.mxu0 %v4916_v17 }
  0x2f   : > { %525 = vadd.xlane.f32.xlu1 %v524_v11  ;;  %522 = vadd.xlane.f32.xlu0 %v521_v16  ;;  %v548_v11 = vadd.f32 %v464_v6, %v463_v5  ;;  %v5036_v16 = vcombine.high %v409_v57, %v410_v63  ;;  %v554_v63 = vadd.f32 %v468_v62, %v467_v61 }
  0x30   : > { %v5091_v6 = vcombine.low %v419_v54, %v5081_v55 }
  0x31   : > { %3718 = vmatpush3.bf16.msra.mxu0 %v4926_v27 }
  0x32   : > { %6170 = vst [vmem:[#allocation6_spill] sm:$0xff] %v5091_v6 }
  0x33   : > { %531 = vadd.xlane.f32.xlu1 %v530_v32  ;;  %528 = vadd.xlane.f32.xlu0 %v527_v34  ;;  %v414_v32 = vld [vmem:[%s4770_s20 + $0xc8] sm:$0xff] }
  0x34   : > { %998 = vmatmul.mubr.bf16.vlgmr.msra.gmra.mrb[0].mxu0 %v4937_v37 }
  0x35   : > { %1005 = vmatprep.mubr.bf16.mxu0 %v4942_v40 }
  0x37   : > { %534 = vadd.xlane.f32.xlu1 %v533_v41 }
  0x3b   : > { %537 = vadd.xlane.f32.xlu1 %v536_v1  ;;  %v4571_v1 = vld [vmem:[%s6081_s2] sm:$0xff]  }
  0x3c   : > { %1006 = vmatmul.mubr.bf16.gmra.mrb[4].mxu0 %v4950_v14  ;;  %4416 = vmatprep.subr.bf16.mxu1 %v4571_v1 }
  0x3d   : > { %1013 = vmatprep.mubr.bf16.mxu0 %v4954_v45  ;;  %4417 = vmatpush3.bf16.msra.mxu1 %v4571_v1  ;;  %v473_v1 = vunpack.c.l.bf16 %v415_v35 }
  0x44   : > { %1014 = vmatmul.mubr.bf16.gmra.mrb[8].mxu0 %v4960_v46 }
  0x45   : > { %1021 = vmatprep.mubr.bf16.mxu0 %v4964_v50 }
  0x49   : > { %1174 = vrot.lane.b32.xlu0 %v4796_v8, %s4700_s24  ;;  %v4988_v8 = vcombine.high %v4872_v49, %v4869_v48 }
  0x4c   : > { %1176 = vrot.lane.b32.xlu1 %v4811_v18, %s4700_s24  ;;  %1022 = vmatmul.mubr.bf16.gmra.mrb[12].mxu0 %v4972_v0  ;;  %v4994_v18 = vcombine.low %v4872_v49, %v4869_v48  ;;  %v5009_v48 = vcombine.high %v4908_v10, %v4901_v7  ;;  %v539_v49 = vadd.f32 %v458_v39, %v457_v31  ;;  %v418_v31 = vld [vmem:[%s4770_s20 + $0xe8] sm:$0xff] }
  0x4d   : > { %1029 = vmatprep.mubr.bf16.mxu0 %v4976_v2  ;;  %v5028_v7 = vcombine.low %v4922_v26, %v4930_v29  ;;  %v5030_v10 = vcombine.high %v407_v30, %v408_v51  ;;  %v5046_v26 = vcombine.high %v411_v23, %v412_v24  ;;  %v413_v29 = vld [vmem:[%s4770_s20 + $0xc0] sm:$0xff]  ;;  %v479_v62 = vunpack.c.l.bf16 %v418_v31 }
  0x4e   : > { %v5056_v34 = vcombine.high %v413_v29, %v414_v32  ;;  %v5062_v41 = vcombine.low %v413_v29, %v414_v32  ;;  %v417_v30 = vld [vmem:[%s4770_s20 + $0xe0] sm:$0xff]  ;;  %v470_v5 = vunpack.c.h.bf16 %v413_v29 }
  0x4f   : > { %v5075_v51 = vcombine.high %v417_v30, %v418_v31  ;;  %v5083_v57 = vcombine.low %v417_v30, %v418_v31 }
  0x51   : > { %6167 = vst [vmem:[#allocation3_spill] sm:$0xff] %v5075_v51  ;;  %6168 = vst [vmem:[#allocation4_spill] sm:$0xff] %v5083_v57 }
  0x54   : > { %1030 = vmatmul.mubr.bf16.gmra.mrb[16].mxu0 %v4984_v21 }
  0x55   : > { %1037 = vmatprep.mubr.bf16.mxu0 %v4988_v8 }
  0x5c   : > { %1038 = vmatmul.mubr.bf16.gmra.mrb[20].mxu0 %v4994_v18 }
  0x5d   : > { %1045 = vmatprep.mubr.bf16.mxu0 %v4998_v22 }
  0x64   : > { %1046 = vmatmul.mubr.bf16.gmra.mrb[24].mxu0 %v5005_v42 }
  0x65   : > { %1053 = vmatprep.mubr.bf16.mxu0 %v5009_v48 }
  0x68   : > { %540 = vadd.xlane.f32.xlu0 %v539_v49  ;;  %v5073_v49 = vcombine.low %v415_v35, %v416_v36 }
  0x6a   : > { %6166 = vst [vmem:[#allocation2_spill] sm:$0xff] %v5073_v49 }
  0x6c   : > { %1054 = vmatmul.mubr.bf16.gmra.mrb[28].mxu0 %v5016_v56 }
  0x6d   : > { %1061 = vmatprep.mubr.bf16.mxu0 %v5021_v58 }
  0x70   : > { %543 = vadd.xlane.f32.xlu1 %v542_v59  ;;  %v5086_v59 = vcombine.high %v419_v54, %v5081_v55 }
  0x72   : > { %6169 = vst [vmem:[#allocation5_spill] sm:$0xff] %v5086_v59 }
  0x74   : > { %546 = vadd.xlane.f32.xlu1 %v545_v4  ;;  %1062 = vmatmul.mubr.bf16.gmra.mrb[32].mxu0 %v5028_v7  ;;  %v469_v4 = vunpack.c.l.bf16 %v413_v29  ;;  %v475_v29 = vunpack.c.l.bf16 %v416_v36 }
  0x75   : > { %1069 = vmatprep.mubr.bf16.mxu0 %v5030_v10 }
  0x78   : > { %549 = vadd.xlane.f32.xlu1 %v548_v11  ;;  %v557_v11 = vadd.f32 %v470_v5, %v469_v4 }
  0x7c   : > { %1070 = vmatmul.mubr.bf16.gmra.mrb[36].mxu0 %v5034_v15 }
  0x7d   : > { %1077 = vmatprep.mubr.bf16.mxu0 %v5036_v16 }
  0x7e   : > { %1178 = vrot.lane.b32.xlu0 %v4834_v28, %s4700_s24  ;;  %v5054_v28 = vcombine.low %v411_v23, %v412_v24 }
  0x84   : > { %1078 = vmatmul.mubr.bf16.gmra.mrb[40].mxu0 %v5044_v25 }
  0x85   : > { %1085 = vmatprep.mubr.bf16.mxu0 %v5046_v26 }
  0x89   : > { %1180 = vrot.lane.b32.xlu1 %v4851_v38, %s4700_s24  ;;  %v466_v38 = vunpack.c.h.bf16 %v411_v23  ;;  %v471_v23 = vunpack.c.l.bf16 %v414_v32 }
  0x8b   : > { %v551_v39 = vadd.f32 %v466_v38, %v465_v44  ;;  %v472_v44 = vunpack.c.h.bf16 %v414_v32  ;;  %v476_v32 = vunpack.c.h.bf16 %v416_v36 }
  0x8c   : > { %1086 = vmatmul.mubr.bf16.gmra.mrb[44].mxu0 %v5054_v28 }
  0x8d   : > { %1093 = vmatprep.mubr.bf16.mxu0 %v5056_v34  ;;  %v560_v38 = vadd.f32 %v472_v44, %v471_v23  ;;  %v566_v61 = vadd.f32 %v476_v32, %v475_v29  ;;  %v477_v23 = vunpack.c.l.bf16 %v417_v30  ;;  %v478_v44 = vunpack.c.h.bf16 %v417_v30 }
  0x94   : > { %1094 = vmatmul.mubr.bf16.gmra.mrb[48].mxu0 %v5062_v41 }
  0x95   : > { %1101 = vmatprep.mubr.bf16.mxu0 %v5064_v43 }
  0x9c   : > { %1102 = vmatmul.mubr.bf16.gmra.mrb[52].mxu0 %v5073_v49 }
  0x9d   : > { %552 = vadd.xlane.f32.xlu0 %v551_v39  ;;  %1109 = vmatprep.mubr.bf16.mxu0 %v5075_v51  ;;  %v474_v39 = vunpack.c.h.bf16 %v415_v35 }
  0x9f   : > { %v563_v24 = vadd.f32 %v474_v39, %v473_v1  ;;  %v569_v1 = vadd.f32 %v478_v44, %v477_v23  ;;  %v481_v39 = vunpack.c.l.bf16 %v419_v54 }
  0xa4   : > { %1110 = vmatmul.mubr.bf16.gmra.mrb[56].mxu0 %v5083_v57  ;;  %v493_v35 = vpop.xlane.xlu1 %492 }
  0xa5   : > { %1117 = vmatprep.mubr.bf16.mxu0 %v5086_v59  ;;  %v583_v23 = vmax.f32 %v493_v35, 1.0 }
  0xa8   : > { %v496_v5 = vpop.xlane.xlu1 %495 }
  0xa9   : > { %v584_v44 = vmax.f32 %v496_v5, 1.0 }
  0xac   : > { %1118 = vmatmul.mubr.bf16.gmra.mrb[60].mxu0 %v5091_v6 }
  0xad   : > { %555 = vadd.xlane.f32.xlu1 %v554_v63  ;;  %v480_v63 = vunpack.c.h.bf16 %v418_v31 }
  0xaf   : > { %v572_v4 = vadd.f32 %v480_v63, %v479_v62 }
  0xb1   : > { %558 = vadd.xlane.f32.xlu1 %v557_v11  ;;  %v502_v11 = vpop.xlane.xlu1 %501 }
  0xb3   : > { %1182 = vrot.lane.b32.xlu0 %v4876_v52, %s4700_s24  ;;  %v487_v52 = vpop.xlane.xlu0 %486 }
  0xb4   : > { %v581_v62 = vmax.f32 %v487_v52, 1.0  ;;  %v484_v52 = vunpack.c.h.bf16 %v5081_v55 }
  0xb5   : > { %561 = vadd.xlane.f32.xlu1 %v560_v38 }
  0xb6   : > { %4628 = vrcp.f32 %v581_v62 }
  0xb7   : > { %1184 = vrot.lane.b32.xlu0 %v4894_v60, %s4700_s24  ;;  %v490_v38 = vpop.xlane.xlu0 %489  ;;  %v5100_v60 = vpop.xlane.xlu1 %507 }
  0xb8   : > { %v582_v63 = vmax.f32 %v490_v38, 1.0 }
  0xb9   : > { %564 = vadd.xlane.f32.xlu1 %v563_v24 }
  0xba   : > { %4630 = vrcp.f32 %v582_v63 }
  0xbb   : > { %v499_v24 = vpop.xlane.xlu0 %498  ;;  %v5102_v29 = vpop.xlane.xlu1 %513  ;;  %4632 = vrcp.f32 %v583_v23 }
  0xbc   : > { %4634 = vrcp.f32 %v584_v44  ;;  %v585_v44 = vmax.f32 %v499_v24, 1.0 }
  0xbf   : > { %v5106_v31 = vpop.xlane.xlu0 %504  ;;  %v5108_v32 = vpop.xlane.xlu1 %519 }
  0xc0   : > { %v5132_v5 = vpop.eup %4628 }
  0xc1   : > { %6171 = vst [vmem:[#allocation7_spill] sm:$0xff] %v5132_v5 }
  0xc3   : > { %v5110_v30 = vpop.xlane.xlu0 %510 }
  0xca   : > { %1186 = vrot.lane.b32.xlu1 %v4912_v12, %s4700_s24  ;;  %v482_v12 = vunpack.c.h.bf16 %v419_v54  ;;  %v5114_v54 = vpop.xlane.xlu0 %516 }
  0xcc   : > { %v575_v36 = vadd.f32 %v482_v12, %v481_v39  ;;  %v483_v39 = vunpack.c.l.bf16 %v5081_v55  ;;  %v5134_v55 = vpop.eup %4630 }
  0xcd   : > { %6172 = vst [vmem:[#allocation8_spill] sm:$0xff] %v5134_v55 }
  0xce   : > { %v578_v35 = vadd.f32 %v484_v52, %v483_v39 }
  0xd6   : > { %567 = vadd.xlane.f32.xlu0 %v566_v61  ;;  %v5112_v61 = vpop.xlane.xlu1 %525 }
  0xda   : > { %573 = vadd.xlane.f32.xlu0 %v572_v4  ;;  %v5116_v4 = vpop.xlane.xlu1 %531 }
  0xee   : > { %570 = vadd.xlane.f32.xlu1 %v569_v1  ;;  %v5122_v1 = vpop.xlane.xlu1 %534 }
  0xf0   : > { %1188 = vrot.lane.b32.xlu0 %v4926_v27, %s4700_s24  ;;  %v5120_v27 = vpop.xlane.xlu0 %522 }
  0xf2   : > { %576 = vadd.xlane.f32.xlu1 %v575_v36  ;;  %v5136_v59 = vpop.xlane.xlu1 %537 }
 0x103   : > { %1190 = vrot.lane.b32.xlu1 %v4789_v3, %s4700_s24  ;;  %v5128_v3 = vpop.xlane.xlu0 %528 }
 0x107   : > { %1192 = vrot.lane.b32.xlu1 %v4802_v13, %s4700_s24  ;;  %v3719_v38 = vpop.f32.mrb[0].mxu0  ;;  %v586_v13 = vmax.f32 %v502_v11, 1.0  ;;  %v1175_v52 = vpop.permute.xlu0 %1174 }
 0x108   : > { %v3720_v12 = vpop.f32.mrb[1].mxu0 }
 0x109   : > { %v3721_v36 = vadd.f32 %v3720_v12, %v3719_v38  ;;  %v3722_v62 = vpop.f32.mrb[2].mxu0  ;;  %4636 = vrcp.f32 %v586_v13 }
 0x10a   : > { %v3723_v63 = vpop.f32.mrb[3].mxu0  ;;  %4638 = vrcp.f32 %v585_v44 }
 0x10b   : > { %1194 = vrot.lane.b32.xlu1 %v4819_v20, %s4700_s24  ;;  %v3724_v6 = vadd.f32 %v3723_v63, %v3722_v62  ;;  %v1126_v23 = vmul.f32 %v5132_v5, %v3721_v36  ;;  %v1177_v36 = vpop.permute.xlu1 %1176 }
 0x10d   : > { %v1127_v38 = vmul.f32 %v5134_v55, %v3724_v6  ;;  %v5146_v6 = vpop.eup %4632 }
 0x10e   : > { %6173 = vst [vmem:[#allocation9_spill] sm:$0xff] %v5146_v6  ;;  %v5148_v24 = vpop.eup %4634 }
 0x10f   : > { %579 = vadd.xlane.f32.xlu0 %v578_v35  ;;  %1196 = vrot.lane.b32.xlu1 %v4844_v33, %s4700_s24  ;;  %v1158_v39 = vpack.c.bf16 %v1127_v38, %v1126_v23  ;;  %v3725_v20 = vpop.f32.mrb[4].mxu0  ;;  %6174 = vst [vmem:[#allocation10_spill] sm:$0xff] %v5148_v24  ;;  %v588_v35 = vmax.f32 %v5100_v60, 1.0  ;;  %v587_v38 = vmax.f32 %v5106_v31, 1.0  ;;  %v5154_v44 = vpop.xlane.xlu1 %543 }
 0x110   : > { %v3726_v12 = vpop.f32.mrb[5].mxu0  ;;  %v5159_v60 = vpop.xlane.xlu0 %540 }
 0x111   : > { %v3727_v62 = vadd.f32 %v3726_v12, %v3725_v20  ;;  %v3728_v63 = vpop.f32.mrb[6].mxu0  ;;  %v1209_v11 = vsel %vm1206_vm0, %v1158_v39, %v1175_v52  ;;  %4640 = vrcp.f32 %v588_v35 }
 0x112   : > { %v3729_v5 = vpop.f32.mrb[7].mxu0  ;;  %4418 = vmatprep.mubr.msk.bf16.mxu1 %vm1270_vm1, %v1209_v11  ;;  %4642 = vrcp.f32 %v587_v38 }
 0x113   : > { %1200 = vrot.lane.b32.xlu1 %v4879_v53, %s4700_s24  ;;  %v3730_v33 = vadd.f32 %v3729_v5, %v3728_v63  ;;  %v1128_v13 = vmul.f32 %v5146_v6, %v3727_v62  ;;  %v5164_v31 = vpop.eup %4636  ;;  %v5168_v11 = vpop.xlane.xlu1 %546 }
 0x114   : > { %6175 = vst [vmem:[#allocation11_spill] sm:$0xff] %v5164_v31  ;;  %v5166_v63 = vpop.eup %4638 }
 0x115   : > { %v1129_v23 = vmul.f32 %v5148_v24, %v3730_v33  ;;  %6176 = vst [vmem:[#allocation12_spill] sm:$0xff] %v5166_v63  ;;  %v590_v33 = vmax.f32 %v5102_v29, 1.0 }
 0x117   : > { %1202 = vrot.lane.b32.xlu1 %v4905_v9, %s4700_s24  ;;  %v1159_v39 = vpack.c.bf16 %v1129_v23, %v1128_v13  ;;  %v3731_v53 = vpop.f32.mrb[8].mxu0  ;;  %v589_v13 = vmax.f32 %v5110_v30, 1.0  ;;  %4644 = vrcp.f32 %v590_v33  ;;  %v592_v30 = vmax.f32 %v5108_v32, 1.0 }
 0x118   : > { %v3732_v20 = vpop.f32.mrb[9].mxu0 }
 0x119   : > { %v3733_v5 = vadd.f32 %v3732_v20, %v3731_v53  ;;  %v3734_v52 = vpop.f32.mrb[10].mxu0  ;;  %v1212_v12 = vsel %vm1206_vm0, %v1159_v39, %v1177_v36  ;;  %v1179_v39 = vpop.permute.xlu0 %1178  ;;  %4646 = vrcp.f32 %v589_v13 }
 0x11a   : > { %v3735_v62 = vpop.f32.mrb[11].mxu0  ;;  %4419 = vmatmul.mubr.msk.bf16.vlgmr.msra.gmra.mrb[0].mxu1 %vm1270_vm1, %v1212_v12  ;;  %v5175_v12 = vpop.xlane.xlu1 %549  ;;  %4648 = vrcp.f32 %v592_v30 }
 0x11b   : > { %1204 = vrot.lane.b32.xlu1 %v4916_v17, %s4700_s24  ;;  %v3736_v9 = vadd.f32 %v3735_v62, %v3734_v52  ;;  %v1130_v36 = vmul.f32 %v5166_v63, %v3733_v5  ;;  %v5178_v29 = vpop.eup %4640 }
 0x11c   : > { %6177 = vst [vmem:[#allocation13_spill] sm:$0xff] %v5178_v29 }
 0x11d   : > { %v1131_v35 = vmul.f32 %v5164_v31, %v3736_v9  ;;  %v5180_v9 = vpop.eup %4642 }
 0x11e   : > { %6178 = vst [vmem:[#allocation14_spill] sm:$0xff] %v5180_v9 }
 0x11f   : > { %v1160_v23 = vpack.c.bf16 %v1131_v35, %v1130_v36  ;;  %v3737_v38 = vpop.f32.mrb[12].mxu0  ;;  %v591_v35 = vmax.f32 %v5114_v54, 1.0  ;;  %v594_v54 = vmax.f32 %v5112_v61, 1.0 }
 0x120   : > { %v3738_v53 = vpop.f32.mrb[13].mxu0 }
 0x121   : > { %v3739_v17 = vadd.f32 %v3738_v53, %v3737_v38  ;;  %v3740_v20 = vpop.f32.mrb[14].mxu0  ;;  %v1215_v52 = vsel %vm1206_vm0, %v1160_v23, %v1179_v39  ;;  %v1181_v38 = vpop.permute.xlu1 %1180  ;;  %4650 = vrcp.f32 %v591_v35 }
 0x122   : > { %v3741_v62 = vpop.f32.mrb[15].mxu0  ;;  %4422 = vmatprep.mubr.msk.bf16.mxu1 %vm1270_vm1, %v1215_v52  ;;  %v5192_v32 = vpop.eup %4644  ;;  %4652 = vrcp.f32 %v594_v54  ;;  %v595_v54 = vmax.f32 %v5128_v3, 1.0  ;;  %v597_v3 = vmax.f32 %v5122_v1, 1.0 }
 0x123   : > { %v3742_v5 = vadd.f32 %v3741_v62, %v3740_v20  ;;  %v1132_v33 = vmul.f32 %v5180_v9, %v3739_v17  ;;  %6179 = vst [vmem:[#allocation15_spill] sm:$0xff] %v5192_v32 }
 0x125   : > { %1198 = vrot.lane.b32.xlu0 %v4866_v47, %s4700_s24  ;;  %v1133_v36 = vmul.f32 %v5178_v29, %v3742_v5  ;;  %v5194_v5 = vpop.eup %4646 }
 0x126   : > { %6180 = vst [vmem:[#allocation16_spill] sm:$0xff] %v5194_v5  ;;  %v5202_v61 = vpop.eup %4648 }
 0x127   : > { %v1161_v13 = vpack.c.bf16 %v1133_v36, %v1132_v33  ;;  %v3743_v23 = vpop.f32.mrb[16].mxu0  ;;  %v593_v36 = vmax.f32 %v5120_v27, 1.0  ;;  %6181 = vst [vmem:[#allocation17_spill] sm:$0xff] %v5202_v61  ;;  %v596_v27 = vmax.f32 %v5116_v4, 1.0 }
 0x128   : > { %v3744_v39 = vpop.f32.mrb[17].mxu0 }
 0x129   : > { %v3745_v53 = vadd.f32 %v3744_v39, %v3743_v23  ;;  %v3746_v20 = vpop.f32.mrb[18].mxu0  ;;  %v1218_v52 = vsel %vm1206_vm0, %v1161_v13, %v1181_v38  ;;  %4654 = vrcp.f32 %v593_v36 }
 0x12a   : > { %v5189_v62 = vpop.xlane.xlu0 %552  ;;  %v3747_v47 = vpop.f32.mrb[19].mxu0  ;;  %4423 = vmatmul.mubr.msk.bf16.gmra.mrb[4].mxu1 %vm1270_vm1, %v1218_v52  ;;  %4656 = vrcp.f32 %v596_v27 }
 0x12b   : > { %v3748_v17 = vadd.f32 %v3747_v47, %v3746_v20  ;;  %v1134_v33 = vmul.f32 %v5194_v5, %v3745_v53  ;;  %v5204_v47 = vpop.eup %4650  ;;  %4658 = vrcp.f32 %v595_v54 }
 0x12c   : > { %6182 = vst [vmem:[#allocation18_spill] sm:$0xff] %v5204_v47  ;;  %v5214_v4 = vpop.eup %4652  ;;  %4660 = vrcp.f32 %v597_v3 }
 0x12d   : > { %v1135_v30 = vmul.f32 %v5192_v32, %v3748_v17  ;;  %6183 = vst [vmem:[#allocation19_spill] sm:$0xff] %v5214_v4 }
 0x12e   : > { %v1183_v23 = vpop.permute.xlu0 %1182 }
 0x12f   : > { %v1162_v13 = vpack.c.bf16 %v1135_v30, %v1134_v33  ;;  %v3749_v35 = vpop.f32.mrb[20].mxu0 }
 0x130   : > { %v3750_v38 = vpop.f32.mrb[21].mxu0 }
 0x131   : > { %v1221_v39 = vsel %vm1206_vm0, %v1162_v13, %v1183_v23  ;;  %v3751_v52 = vadd.f32 %v3750_v38, %v3749_v35  ;;  %v3752_v29 = vpop.f32.mrb[22].mxu0 }
 0x132   : > { %v3753_v20 = vpop.f32.mrb[23].mxu0  ;;  %4426 = vmatprep.mubr.msk.bf16.mxu1 %vm1270_vm1, %v1221_v39  ;;  %v1185_v35 = vpop.permute.xlu0 %1184 }
 0x133   : > { %v3754_v53 = vadd.f32 %v3753_v20, %v3752_v29  ;;  %v1136_v17 = vmul.f32 %v5204_v47, %v3751_v52 }
 0x135   : > { %v1137_v33 = vmul.f32 %v5202_v61, %v3754_v53  ;;  %v5216_v53 = vpop.eup %4654 }
 0x136   : > { %6184 = vst [vmem:[#allocation20_spill] sm:$0xff] %v5216_v53  ;;  %v5226_v61 = vpop.eup %4656 }
 0x137   : > { %v1163_v30 = vpack.c.bf16 %v1137_v33, %v1136_v17  ;;  %v3755_v13 = vpop.f32.mrb[24].mxu0  ;;  %6185 = vst [vmem:[#allocation21_spill] sm:$0xff] %v5226_v61 }
 0x138   : > { %v3756_v36 = vpop.f32.mrb[25].mxu0 }
 0x139   : > { %v3757_v38 = vadd.f32 %v3756_v36, %v3755_v13  ;;  %v3758_v39 = vpop.f32.mrb[26].mxu0  ;;  %v1224_v29 = vsel %vm1206_vm0, %v1163_v30, %v1185_v35  ;;  %v598_v13 = vmax.f32 %v5136_v59, 1.0 }
 0x13a   : > { %v5210_v23 = vpop.xlane.xlu1 %555  ;;  %v3759_v20 = vpop.f32.mrb[27].mxu0  ;;  %4427 = vmatmul.mubr.msk.bf16.gmra.mrb[8].mxu1 %vm1270_vm1, %v1224_v29 }
 0x13b   : > { %v3760_v52 = vadd.f32 %v3759_v20, %v3758_v39  ;;  %v1138_v17 = vmul.f32 %v5216_v53, %v3757_v38  ;;  %4662 = vrcp.f32 %v598_v13  ;;  %v5228_v38 = vpop.eup %4658 }
 0x13c   : > { %6186 = vst [vmem:[#allocation22_spill] sm:$0xff] %v5228_v38 }
 0x13d   : > { %v1139_v27 = vmul.f32 %v5214_v4, %v3760_v52  ;;  %v599_v52 = vmax.f32 %v5159_v60, 1.0 }
 0x13e   : > { %v5221_v33 = vpop.xlane.xlu1 %558 }
 0x13f   : > { %v1164_v30 = vpack.c.bf16 %v1139_v27, %v1138_v17  ;;  %v3761_v54 = vpop.f32.mrb[28].mxu0  ;;  %v600_v17 = vmax.f32 %v5154_v44, 1.0  ;;  %4664 = vrcp.f32 %v599_v52  ;;  %v601_v44 = vmax.f32 %v5168_v11, 1.0 }
 0x140   : > { %v3762_v35 = vpop.f32.mrb[29].mxu0 }
 0x141   : > { %v3763_v29 = vadd.f32 %v3762_v35, %v3761_v54  ;;  %v3764_v39 = vpop.f32.mrb[30].mxu0  ;;  %4666 = vrcp.f32 %v600_v17  ;;  %v602_v17 = vmax.f32 %v5175_v12, 1.0 }
 0x142   : > { %v5224_v36 = vpop.xlane.xlu1 %561  ;;  %v3765_v20 = vpop.f32.mrb[31].mxu0  ;;  %4668 = vrcp.f32 %v601_v44 }
 0x143   : > { %v3766_v1 = vadd.f32 %v3765_v20, %v3764_v39  ;;  %v5232_v4 = vmul.f32 %v5228_v38, %v3763_v29  ;;  %v5243_v38 = vpop.eup %4660  ;;  %4670 = vrcp.f32 %v602_v17  ;;  %v606_v44 = vmax.f32 %v5224_v36, 1.0 }
 0x144   : > { %6187 = vst [vmem:[#allocation23_spill] sm:$0xff] %v5243_v38 }
 0x145   : > { %v5235_v59 = vmul.f32 %v5226_v61, %v3766_v1  ;;  %v5246_v61 = vpop.eup %4662 }
 0x146   : > { %v5237_v3 = vpop.xlane.xlu1 %564  ;;  %6188 = vst [vmem:[#allocation24_spill] sm:$0xff] %v5246_v61 }
 0x147   : > { %v3767_v13 = vpop.f32.mrb[32].mxu0 }
 0x148   : > { %v3768_v54 = vpop.f32.mrb[33].mxu0 }
 0x149   : > { %v3769_v39 = vadd.f32 %v3768_v54, %v3767_v13  ;;  %v3770_v20 = vpop.f32.mrb[34].mxu0 }
 0x14a   : > { %v1187_v35 = vpop.permute.xlu1 %1186  ;;  %v3771_v29 = vpop.f32.mrb[35].mxu0 }
 0x14b   : > { %v1227_v60 = vsel %vm1206_vm0, %v1164_v30, %v1187_v35  ;;  %v3772_v1 = vadd.f32 %v3771_v29, %v3770_v20  ;;  %v5250_v27 = vmul.f32 %v5243_v38, %v3769_v39  ;;  %v5258_v29 = vpop.eup %4664  ;;  %v604_v30 = vmax.f32 %v5210_v23, 1.0 }
 0x14c   : > { %4430 = vmatprep.mubr.msk.bf16.mxu1 %vm1270_vm1, %v1227_v60  ;;  %6189 = vst [vmem:[#allocation25_spill] sm:$0xff] %v5258_v29  ;;  %v5260_v39 = vpop.eup %4666 }
 0x14d   : > { %v5253_v52 = vmul.f32 %v5246_v61, %v3772_v1  ;;  %6190 = vst [vmem:[#allocation26_spill] sm:$0xff] %v5260_v39  ;;  %v603_v1 = vmax.f32 %v5189_v62, 1.0  ;;  %v5272_v38 = vpop.eup %4668 }
 0x14e   : > { %6191 = vst [vmem:[#allocation27_spill] sm:$0xff] %v5272_v38 }
 0x14f   : > { %v3773_v13 = vpop.f32.mrb[36].mxu0  ;;  %4672 = vrcp.f32 %v603_v1 }
 0x150   : > { %v3774_v54 = vpop.f32.mrb[37].mxu0  ;;  %4674 = vrcp.f32 %v604_v30 }
 0x151   : > { %v3775_v35 = vadd.f32 %v3774_v54, %v3773_v13  ;;  %v3776_v20 = vpop.f32.mrb[38].mxu0 }
 0x152   : > { %v3777_v60 = vpop.f32.mrb[39].mxu0 }
 0x153   : > { %v3778_v11 = vadd.f32 %v3777_v60, %v3776_v20  ;;  %v5264_v61 = vmul.f32 %v5258_v29, %v3775_v35  ;;  %v5274_v35 = vpop.eup %4670 }
 0x154   : > { %6192 = vst [vmem:[#allocation28_spill] sm:$0xff] %v5274_v35 }
 0x155   : > { %v5267_v12 = vmul.f32 %v5260_v39, %v3778_v11  ;;  %v605_v11 = vmax.f32 %v5221_v33, 1.0 }
 0x157   : > { %v3779_v17 = vpop.f32.mrb[40].mxu0  ;;  %4676 = vrcp.f32 %v605_v11 }
 0x158   : > { %v3780_v13 = vpop.f32.mrb[41].mxu0  ;;  %4678 = vrcp.f32 %v606_v44 }
 0x159   : > { %v3781_v54 = vadd.f32 %v3780_v13, %v3779_v17  ;;  %v3782_v20 = vpop.f32.mrb[42].mxu0  ;;  %v5286_v33 = vpop.eup %4672 }
 0x15a   : > { %v3783_v60 = vpop.f32.mrb[43].mxu0  ;;  %6193 = vst [vmem:[#allocation29_spill] sm:$0xff] %v5286_v33 }
 0x15b   : > { %v3784_v62 = vadd.f32 %v3783_v60, %v3782_v20  ;;  %v5278_v39 = vmul.f32 %v5272_v38, %v3781_v54  ;;  %v5288_v38 = vpop.eup %4674 }
 0x15c   : > { %6194 = vst [vmem:[#allocation30_spill] sm:$0xff] %v5288_v38 }
 0x15d   : > { %v5281_v23 = vmul.f32 %v5274_v35, %v3784_v62  ;;  %v607_v62 = vmax.f32 %v5237_v3, 1.0 }
 0x15f   : > { %v3785_v30 = vpop.f32.mrb[44].mxu0  ;;  %4680 = vrcp.f32 %v607_v62 }
 0x160   : > { %v3786_v17 = vpop.f32.mrb[45].mxu0 }
 0x161   : > { %v3787_v13 = vadd.f32 %v3786_v17, %v3785_v30  ;;  %v3788_v20 = vpop.f32.mrb[46].mxu0  ;;  %v5299_v3 = vpop.eup %4676 }
 0x162   : > { %v3789_v29 = vpop.f32.mrb[47].mxu0  ;;  %6195 = vst [vmem:[#allocation31_spill] sm:$0xff] %v5299_v3 }
 0x163   : > { %v568_v60 = vpop.xlane.xlu0 %567  ;;  %v3790_v54 = vadd.f32 %v3789_v29, %v3788_v20  ;;  %v5292_v36 = vmul.f32 %v5286_v33, %v3787_v13  ;;  %v6196_v13 = vpack.c.bf16 %v5235_v59, %v5232_v4 }
 0x164   : > { %v608_v35 = vmax.f32 %v568_v60, 1.0 }
 0x165   : > { %v5295_v1 = vmul.f32 %v5288_v38, %v3790_v54  ;;  %v5305_v38 = vpop.eup %4678 }
 0x166   : > { %4682 = vrcp.f32 %v608_v35  ;;  %6197 = vst [vmem:[#allocation32_spill] sm:$0xff] %v5305_v38 }
 0x167   : > { %v574_v11 = vpop.xlane.xlu0 %573  ;;  %v1169_v44 = vpack.c.bf16 %v5295_v1, %v5292_v36  ;;  %v3791_v30 = vpop.f32.mrb[48].mxu0 }
 0x168   : > { %v3792_v17 = vpop.f32.mrb[49].mxu0 }
 0x169   : > { %v3793_v53 = vadd.f32 %v3792_v17, %v3791_v30  ;;  %v3794_v29 = vpop.f32.mrb[50].mxu0  ;;  %v5310_v5 = vpop.eup %4680 }
 0x16a   : > { %v3795_v47 = vpop.f32.mrb[51].mxu0  ;;  %6198 = vst [vmem:[#allocation33_spill] sm:$0xff] %v5310_v5 }
 0x16b   : > { %v1189_v20 = vpop.permute.xlu0 %1188  ;;  %v3796_v60 = vadd.f32 %v3795_v47, %v3794_v29  ;;  %v1150_v1 = vmul.f32 %v5299_v3, %v3793_v53  ;;  %v610_v53 = vmax.f32 %v574_v11, 1.0 }
 0x16c   : > { %v1230_v54 = vsel %vm1206_vm0, %v6196_v13, %v1189_v20 }
 0x16d   : > { %4431 = vmatmul.mubr.msk.bf16.gmra.mrb[12].mxu1 %vm1270_vm1, %v1230_v54  ;;  %v1151_v62 = vmul.f32 %v5305_v38, %v3796_v60  ;;  %4684 = vrcp.f32 %v610_v53  ;;  %v6203_v53 = vpack.c.bf16 %v5267_v12, %v5264_v61 }
 0x16f   : > { %v1170_v36 = vpack.c.bf16 %v1151_v62, %v1150_v1  ;;  %v3797_v35 = vpop.f32.mrb[52].mxu0 }
 0x170   : > { %v3798_v30 = vpop.f32.mrb[53].mxu0  ;;  %v5312_v59 = vpop.eup %4682 }
 0x171   : > { %v3799_v17 = vadd.f32 %v3798_v30, %v3797_v35  ;;  %v3800_v33 = vpop.f32.mrb[54].mxu0  ;;  %6199 = vst [vmem:[#allocation34_spill] sm:$0xff] %v5312_v59 }
 0x172   : > { %v3801_v32 = vpop.f32.mrb[55].mxu0 }
 0x173   : > { %v3802_v4 = vadd.f32 %v3801_v32, %v3800_v33  ;;  %v1152_v47 = vmul.f32 %v5310_v5, %v3799_v17 }
 0x175   : > { %v1153_v29 = vmul.f32 %v5312_v59, %v3802_v4  ;;  %v6200_v4 = vpack.c.bf16 %v5253_v52, %v5250_v27 }
 0x177   : > { %v1171_v20 = vpack.c.bf16 %v1153_v29, %v1152_v47  ;;  %v3803_v13 = vpop.f32.mrb[56].mxu0  ;;  %v5321_v29 = vpop.eup %4684 }
 0x178   : > { %v3804_v54 = vpop.f32.mrb[57].mxu0  ;;  %6201 = vst [vmem:[#allocation35_spill] sm:$0xff] %v5321_v29 }
 0x179   : > { %v3805_v60 = vadd.f32 %v3804_v54, %v3803_v13  ;;  %v3806_v1 = vpop.f32.mrb[58].mxu0 }
 0x17a   : > { %v3807_v38 = vpop.f32.mrb[59].mxu0 }
 0x17b   : > { %v571_v62 = vpop.xlane.xlu1 %570  ;;  %v3808_v30 = vadd.f32 %v3807_v38, %v3806_v1 }
 0x17c   : > { %v609_v35 = vmax.f32 %v571_v62, 1.0 }
 0x17d   : > { %v1155_v62 = vmul.f32 %v5321_v29, %v3808_v30 }
 0x17e   : > { %4686 = vrcp.f32 %v609_v35 }
 0x17f   : > { %v577_v3 = vpop.xlane.xlu1 %576  ;;  %v3809_v32 = vpop.f32.mrb[60].mxu0 }
 0x180   : > { %v3810_v33 = vpop.f32.mrb[61].mxu0  ;;  %v611_v12 = vmax.f32 %v577_v3, 1.0 }
 0x181   : > { %v3811_v9 = vadd.f32 %v3810_v33, %v3809_v32  ;;  %v3812_v31 = vpop.f32.mrb[62].mxu0 }
 0x182   : > { %v3813_v5 = vpop.f32.mrb[63].mxu0  ;;  %4688 = vrcp.f32 %v611_v12 }
 0x183   : > { %v1191_v17 = vpop.permute.xlu1 %1190  ;;  %v3814_v47 = vadd.f32 %v3813_v5, %v3812_v31  ;;  %v6204_v5 = vpack.c.bf16 %v5281_v23, %v5278_v39 }
 0x184   : > { %v1233_v11 = vsel %vm1206_vm0, %v6200_v4, %v1191_v17 }
 0x185   : > { %4434 = vmatprep.mubr.msk.bf16.mxu1 %vm1270_vm1, %v1233_v11 }
 0x187   : > { %v1193_v38 = vpop.permute.xlu1 %1192 }
 0x188   : > { %v5323_v13 = vpop.eup %4686  ;;  %v1236_v54 = vsel %vm1206_vm0, %v6203_v53, %v1193_v38 }
 0x189   : > { %6202 = vst [vmem:[#allocation36_spill] sm:$0xff] %v5323_v13  ;;  %v1154_v1 = vmul.f32 %v5323_v13, %v3805_v60  ;;  %4435 = vmatmul.mubr.msk.bf16.gmra.mrb[16].mxu1 %vm1270_vm1, %v1236_v54  ;;  %v5357_v54 = vld [vmem:[%s6082_s3] ss:$0 sm:$0xff] }
 0x18b   : > { %v1172_v27 = vpack.c.bf16 %v1155_v62, %v1154_v1  ;;  %v1195_v31 = vpop.permute.xlu1 %1194 }
 0x18c   : > { %v1239_v52 = vsel %vm1206_vm0, %v6204_v5, %v1195_v31 }
 0x18d   : > { %4438 = vmatprep.mubr.msk.bf16.mxu1 %vm1270_vm1, %v1239_v52 }
 0x18f   : > { %v1197_v35 = vpop.permute.xlu1 %1196 }
 0x190   : > { %v1242_v61 = vsel %vm1206_vm0, %v1169_v44, %v1197_v35  ;;  %v5345_v44 = vpop.eup %4688 }
 0x191   : > { %4439 = vmatmul.mubr.msk.bf16.gmra.mrb[20].mxu1 %vm1270_vm1, %v1242_v61  ;;  %6205 = vst [vmem:[#allocation37_spill] sm:$0xff] %v5345_v44  ;;  %v1156_v11 = vmul.f32 %v5345_v44, %v3811_v9 }
 0x193   : > { %v1201_v60 = vpop.permute.xlu1 %1200 }
 0x194   : > { %v1248_v39 = vsel %vm1206_vm0, %v1171_v20, %v1201_v60 }
 0x197   : > { %v1203_v33 = vpop.permute.xlu1 %1202 }
 0x198   : > { %v1251_v23 = vsel %vm1206_vm0, %v1172_v27, %v1203_v33 }
 0x19b   : > { %v1205_v53 = vpop.permute.xlu1 %1204 }
 0x19c   : > { %v580_v32 = vpop.xlane.xlu0 %579 }
 0x19d   : > { %v612_v30 = vmax.f32 %v580_v32, 1.0 }
 0x19f   : > { %4690 = vrcp.f32 %v612_v30 }
 0x1a0   : > { %v1199_v17 = vpop.permute.xlu0 %1198 }
 0x1a1   : > { %v1245_v4 = vsel %vm1206_vm0, %v1170_v36, %v1199_v17 }
 0x1a2   : > { %4442 = vmatprep.mubr.msk.bf16.mxu1 %vm1270_vm1, %v1245_v4 }
 0x1a3   : > { %4443 = vmatmul.mubr.msk.bf16.gmra.mrb[24].mxu1 %vm1270_vm1, %v1248_v39 }
 0x1a4   : > { %4446 = vmatprep.mubr.msk.bf16.mxu1 %vm1270_vm1, %v1251_v23 }
 0x1a9   : > { %v5347_v3 = vpop.eup %4690 }
 0x1aa   : > { %6206 = vst [vmem:[#allocation38_spill] sm:$0xff] %v5347_v3  ;;  %v1157_v38 = vmul.f32 %v5347_v3, %v3814_v47 }
 0x1ac   : > { %v1173_v36 = vpack.c.bf16 %v1157_v38, %v1156_v11 }
 0x1ae   : > { %v1254_v20 = vsel %vm1206_vm0, %v1173_v36, %v1205_v53 }
 0x1af   : > { %4447 = vmatmul.mubr.msk.bf16.gmra.mrb[28].mxu1 %vm1270_vm1, %v1254_v20 }
 0x1b0   : > { %1544 = vmatprep.mubr.bf16.mxu1 %v4815_v19 }
 0x1ed   : > { %v4420_v1 = vpop.f32.mrb[0].mxu1 }
 0x1ee   : > { %v1346_v62 = vadd.f32 %v4420_v1, %v5357_v54  ;;  %v1337_v27 = vpop.f32.mrb[1].mxu1 }
 0x1ef   : > { %v1338_v9 = vadd.f32 %v5357_v54, %v1337_v27  ;;  %v4421_v47 = vpop.f32.mrb[2].mxu1 }
 0x1f0   : > { %v1349_v31 = vadd.f32 %v4421_v47, %v5357_v54  ;;  %v1340_v5 = vpop.f32.mrb[3].mxu1  ;;  %v1466_v35 = vmax.f32 %v1346_v62, 0.0 }
 0x1f1   : > { %v1341_v52 = vadd.f32 %v5357_v54, %v1340_v5  ;;  %v1464_v12 = vmax.f32 %v1338_v9, 0.0 }
 0x1f2   : > { %v1467_v61 = vmax.f32 %v1349_v31, 0.0 }
 0x1f3   : > { %v1465_v60 = vmax.f32 %v1341_v52, 0.0 }
 0x1f4   : > { %v5363_v32 = vpack.c.bf16 %v1467_v61, %v1466_v35 }
 0x1f5   : > { %v5365_v30 = vpack.c.bf16 %v1465_v60, %v1464_v12 }
 0x1f7   : > { %6207 = vst [vmem:[#allocation39_spill] sm:$0xff] %v5365_v30  ;;  %1888 = vmatprep.mubr.bf16.mxu0 %v5365_v30 }
 0x1fd   : > { %v4424_v33 = vpop.f32.mrb[4].mxu1 }
 0x1fe   : > { %v1362_v17 = vadd.f32 %v4424_v33, %v5357_v54  ;;  %v1353_v4 = vpop.f32.mrb[5].mxu1 }
 0x1ff   : > { %v1354_v39 = vadd.f32 %v5357_v54, %v1353_v4  ;;  %v4425_v23 = vpop.f32.mrb[6].mxu1 }
 0x200   : > { %v1365_v11 = vadd.f32 %v4425_v23, %v5357_v54  ;;  %v1356_v38 = vpop.f32.mrb[7].mxu1  ;;  %v1470_v36 = vmax.f32 %v1362_v17, 0.0 }
 0x201   : > { %v1357_v53 = vadd.f32 %v5357_v54, %v1356_v38  ;;  %v1468_v1 = vmax.f32 %v1354_v39, 0.0 }
 0x202   : > { %v1471_v20 = vmax.f32 %v1365_v11, 0.0 }
 0x203   : > { %v1469_v62 = vmax.f32 %v1357_v53, 0.0 }
 0x204   : > { %v5372_v27 = vpack.c.bf16 %v1471_v20, %v1470_v36 }
 0x205   : > { %v5374_v9 = vpack.c.bf16 %v1469_v62, %v1468_v1 }
 0x20d   : > { %v4428_v47 = vpop.f32.mrb[8].mxu1 }
 0x20e   : > { %v1378_v31 = vadd.f32 %v4428_v47, %v5357_v54  ;;  %v1369_v5 = vpop.f32.mrb[9].mxu1 }
 0x20f   : > { %v1370_v52 = vadd.f32 %v5357_v54, %v1369_v5  ;;  %v4429_v35 = vpop.f32.mrb[10].mxu1 }
 0x210   : > { %v1381_v61 = vadd.f32 %v4429_v35, %v5357_v54  ;;  %v1372_v12 = vpop.f32.mrb[11].mxu1  ;;  %v1474_v33 = vmax.f32 %v1378_v31, 0.0 }
 0x211   : > { %v1373_v60 = vadd.f32 %v5357_v54, %v1372_v12  ;;  %v1472_v4 = vmax.f32 %v1370_v52, 0.0 }
 0x212   : > { %v1475_v17 = vmax.f32 %v1381_v61, 0.0 }
 0x213   : > { %v1473_v39 = vmax.f32 %v1373_v60, 0.0 }
 0x214   : > { %v5380_v23 = vpack.c.bf16 %v1475_v17, %v1474_v33 }
 0x215   : > { %v5382_v11 = vpack.c.bf16 %v1473_v39, %v1472_v4 }
 0x240   : > { %v4432_v38 = vpop.f32.mrb[12].mxu1 }
 0x241   : > { %v1394_v53 = vadd.f32 %v4432_v38, %v5357_v54  ;;  %v1385_v36 = vpop.f32.mrb[13].mxu1 }
 0x242   : > { %v1386_v20 = vadd.f32 %v5357_v54, %v1385_v36  ;;  %v4433_v1 = vpop.f32.mrb[14].mxu1 }
 0x243   : > { %v1397_v62 = vadd.f32 %v4433_v1, %v5357_v54  ;;  %v1388_v47 = vpop.f32.mrb[15].mxu1  ;;  %v1478_v31 = vmax.f32 %v1394_v53, 0.0 }
 0x244   : > { %v1389_v5 = vadd.f32 %v5357_v54, %v1388_v47  ;;  %v1476_v52 = vmax.f32 %v1386_v20, 0.0 }
 0x245   : > { %v1479_v35 = vmax.f32 %v1397_v62, 0.0 }
 0x246   : > { %v1477_v61 = vmax.f32 %v1389_v5, 0.0 }
 0x247   : > { %v5388_v12 = vpack.c.bf16 %v1479_v35, %v1478_v31 }
 0x248   : > { %v5390_v60 = vpack.c.bf16 %v1477_v61, %v1476_v52 }
 0x25c   : > { %v4436_v33 = vpop.f32.mrb[16].mxu1 }
 0x25d   : > { %v1410_v17 = vadd.f32 %v4436_v33, %v5357_v54  ;;  %v1401_v4 = vpop.f32.mrb[17].mxu1 }
 0x25e   : > { %v1402_v39 = vadd.f32 %v5357_v54, %v1401_v4  ;;  %v4437_v38 = vpop.f32.mrb[18].mxu1 }
 0x25f   : > { %v1413_v36 = vadd.f32 %v4437_v38, %v5357_v54  ;;  %v1404_v1 = vpop.f32.mrb[19].mxu1  ;;  %v1482_v53 = vmax.f32 %v1410_v17, 0.0 }
 0x260   : > { %v1405_v47 = vadd.f32 %v5357_v54, %v1404_v1  ;;  %v1480_v20 = vmax.f32 %v1402_v39, 0.0 }
 0x261   : > { %v1483_v62 = vmax.f32 %v1413_v36, 0.0 }
 0x262   : > { %v1481_v5 = vmax.f32 %v1405_v47, 0.0 }
 0x263   : > { %v5396_v31 = vpack.c.bf16 %v1483_v62, %v1482_v53 }
 0x264   : > { %v5398_v35 = vpack.c.bf16 %v1481_v5, %v1480_v20  ;;  %v4440_v52 = vpop.f32.mrb[20].mxu1 }
 0x265   : > { %v1426_v61 = vadd.f32 %v4440_v52, %v5357_v54  ;;  %v1417_v33 = vpop.f32.mrb[21].mxu1 }
 0x266   : > { %v1418_v4 = vadd.f32 %v5357_v54, %v1417_v33  ;;  %v4441_v3 = vpop.f32.mrb[22].mxu1  ;;  %3832 = vmatprep.subr.bf16.mxu1 %v5398_v35 }
 0x267   : > { %v1429_v38 = vadd.f32 %v4441_v3, %v5357_v54  ;;  %v1420_v1 = vpop.f32.mrb[23].mxu1  ;;  %3833 = vmatpush3.bf16.msra.mxu1 %v5365_v30  ;;  %v1486_v39 = vmax.f32 %v1426_v61, 0.0 }
 0x268   : > { %v1421_v17 = vadd.f32 %v5357_v54, %v1420_v1  ;;  %3834 = vmatprep.subr.bf16.mxu1 %v5396_v31  ;;  %v1484_v47 = vmax.f32 %v1418_v4, 0.0 }
 0x269   : > { %v1487_v36 = vmax.f32 %v1429_v38, 0.0 }
 0x26a   : > { %v1485_v53 = vmax.f32 %v1421_v17, 0.0 }
 0x26b   : > { %v5407_v62 = vpack.c.bf16 %v1487_v36, %v1486_v39  ;;  %3835 = vmatpush3.bf16.msra.mxu1 %v5363_v32 }
 0x26c   : > { %v5410_v20 = vpack.c.bf16 %v1485_v53, %v1484_v47 }
 0x26d   : > { %6208 = vst [vmem:[#allocation40_spill] sm:$0xff] %v5407_v62 }
 0x26e   : > { %6209 = vst [vmem:[#allocation41_spill] sm:$0xff] %v5410_v20  ;;  %3836 = vmatprep.subr.bf16.mxu1 %v5410_v20 }
 0x26f   : > { %3837 = vmatpush3.bf16.msra.mxu1 %v5374_v9 }
 0x270   : > { %3838 = vmatprep.subr.bf16.mxu1 %v5407_v62 }
 0x273   : > { %3839 = vmatpush3.bf16.msra.mxu1 %v5372_v27 }
 0x276   : > { %v4444_v3 = vpop.f32.mrb[24].mxu1 }
 0x277   : > { %v1442_v5 = vadd.f32 %v4444_v3, %v5357_v54  ;;  %v1433_v52 = vpop.f32.mrb[25].mxu1 }
 0x278   : > { %v1434_v61 = vadd.f32 %v5357_v54, %v1433_v52  ;;  %v4445_v33 = vpop.f32.mrb[26].mxu1 }
 0x279   : > { %v1445_v4 = vadd.f32 %v4445_v33, %v5357_v54  ;;  %v1436_v38 = vpop.f32.mrb[27].mxu1  ;;  %v1490_v17 = vmax.f32 %v1442_v5, 0.0 }
 0x27a   : > { %v1437_v1 = vadd.f32 %v5357_v54, %v1436_v38  ;;  %v1488_v36 = vmax.f32 %v1434_v61, 0.0 }
 0x27b   : > { %v1491_v39 = vmax.f32 %v1445_v4, 0.0 }
 0x27c   : > { %v1489_v47 = vmax.f32 %v1437_v1, 0.0 }
 0x27d   : > { %v5420_v53 = vpack.c.bf16 %v1491_v39, %v1490_v17 }
 0x27e   : > { %v5422_v30 = vpack.c.bf16 %v1489_v47, %v1488_v36 }
 0x27f   : > { %6210 = vst [vmem:[#allocation42_spill] sm:$0xff] %v5420_v53 }
 0x280   : > { %6211 = vst [vmem:[#allocation43_spill] sm:$0xff] %v5422_v30  ;;  %3840 = vmatprep.subr.bf16.mxu1 %v5422_v30 }
 0x281   : > { %3841 = vmatpush3.bf16.msra.mxu1 %v5382_v11 }
 0x282   : > { %v4448_v3 = vpop.f32.mrb[28].mxu1  ;;  %3842 = vmatprep.subr.bf16.mxu1 %v5420_v53 }
 0x283   : > { %v1458_v52 = vadd.f32 %v4448_v3, %v5357_v54  ;;  %v1449_v33 = vpop.f32.mrb[29].mxu1  ;;  %v4572_v3 = vld [vmem:[%s6083_s4 + $0x40] sm:$0xff]  }
 0x284   : > { %v1450_v38 = vadd.f32 %v5357_v54, %v1449_v33  ;;  %v4449_v5 = vpop.f32.mrb[30].mxu1  ;;  %v4573_v33 = vld [vmem:[%s6083_s4] sm:$0xff]   ;;  %3944 = vmatprep.subr.bf16.mxu0 %v4572_v3  ;;  %v4585_v3 = vld [vmem:[%s6083_s4 + $0x30] sm:$0xff]  }
 0x285   : > { %v1461_v61 = vadd.f32 %v4449_v5, %v5357_v54  ;;  %v1452_v4 = vpop.f32.mrb[31].mxu1  ;;  %3843 = vmatpush3.bf16.msra.mxu1 %v5380_v23  ;;  %v1494_v17 = vmax.f32 %v1458_v52, 0.0  ;;  %3945 = vmatpush3.bf16.msra.mxu0 %v4573_v33  ;;  %v4575_v52 = vld [vmem:[%s6083_s4 + $0x8] sm:$0xff]   ;;  %v4577_v5 = vld [vmem:[%s6083_s4 + $0x10] sm:$0xff]   ;;  %v4586_v33 = vld [vmem:[%s6083_s4 + $0x78] sm:$0xff]  }
 0x286   : > { %v1453_v1 = vadd.f32 %v5357_v54, %v1452_v4  ;;  %v1492_v36 = vmax.f32 %v1450_v38, 0.0  ;;  %v4574_v54 = vld [vmem:[%s6083_s4 + $0x48] sm:$0xff]   ;;  %v4576_v38 = vld [vmem:[%s6083_s4 + $0x50] sm:$0xff]   ;;  %v4579_v4 = vld [vmem:[%s6083_s4 + $0x18] sm:$0xff]  }
 0x287   : > { %v1495_v39 = vmax.f32 %v1461_v61, 0.0  ;;  %3946 = vmatprep.subr.bf16.mxu0 %v4574_v54  ;;  %v4578_v61 = vld [vmem:[%s6083_s4 + $0x58] sm:$0xff]  }
 0x288   : > { %v1493_v47 = vmax.f32 %v1453_v1, 0.0  ;;  %v4580_v1 = vld [vmem:[%s6083_s4 + $0x60] sm:$0xff]   ;;  %v4587_v54 = vld [vmem:[%s6083_s4 + $0x38] sm:$0xff]  }
 0x289   : > { %v5432_v44 = vpack.c.bf16 %v1495_v39, %v1494_v17  ;;  %3947 = vmatpush3.bf16.msra.mxu0 %v4575_v52  ;;  %v4581_v17 = vld [vmem:[%s6083_s4 + $0x20] sm:$0xff]   ;;  %v4582_v39 = vld [vmem:[%s6083_s4 + $0x68] sm:$0xff]   ;;  %v6214_v52 = vld [vmem:[#allocation5_spill] sm:$0xff] }
 0x28a   : > { %v5434_v29 = vpack.c.bf16 %v1493_v47, %v1492_v36  ;;  %3948 = vmatprep.subr.bf16.mxu0 %v4576_v38  ;;  %v4583_v36 = vld [vmem:[%s6083_s4 + $0x28] sm:$0xff]   ;;  %v4584_v47 = vld [vmem:[%s6083_s4 + $0x70] sm:$0xff]   ;;  %v6215_v38 = vld [vmem:[#allocation6_spill] sm:$0xff] }
 0x28b   : > { %6212 = vst [vmem:[#allocation44_spill] sm:$0xff] %v5432_v44 }
 0x28c   : > { %6213 = vst [vmem:[#allocation45_spill] sm:$0xff] %v5434_v29  ;;  %3844 = vmatprep.subr.bf16.mxu1 %v5434_v29 }
 0x28d   : > { %3845 = vmatpush3.bf16.msra.mxu1 %v5390_v60  ;;  %3949 = vmatpush3.bf16.msra.mxu0 %v4577_v5 }
 0x28e   : > { %3846 = vmatprep.subr.bf16.mxu1 %v5432_v44  ;;  %3950 = vmatprep.subr.bf16.mxu0 %v4578_v61 }
 0x291   : > { %3847 = vmatpush3.bf16.msra.mxu1 %v5388_v12  ;;  %3951 = vmatpush3.bf16.msra.mxu0 %v4579_v4 }
 0x292   : > { %3952 = vmatprep.subr.bf16.mxu0 %v4580_v1 }
 0x294   : > { %1545 = vmatmul.mubr.bf16.vlgmr.msra.gmra.mrb[32].mxu1 %v4937_v37 }
 0x295   : > { %1552 = vmatprep.mubr.bf16.mxu1 %v4942_v40  ;;  %3953 = vmatpush3.bf16.msra.mxu0 %v4581_v17 }
 0x296   : > { %3954 = vmatprep.subr.bf16.mxu0 %v4582_v39 }
 0x299   : > { %3955 = vmatpush3.bf16.msra.mxu0 %v4583_v36  ;;  %v6216_v36 = vld [vmem:[#allocation7_spill] sm:$0xff] }
 0x29a   : > { %3956 = vmatprep.subr.bf16.mxu0 %v4584_v47 }
 0x29c   : > { %1553 = vmatmul.mubr.bf16.gmra.mrb[36].mxu1 %v4950_v14 }
 0x29d   : > { %1560 = vmatprep.mubr.bf16.mxu1 %v4954_v45  ;;  %3957 = vmatpush3.bf16.msra.mxu0 %v4585_v3 }
 0x29e   : > { %3958 = vmatprep.subr.bf16.mxu0 %v4586_v33 }
 0x2a1   : > { %3959 = vmatpush3.bf16.msra.mxu0 %v4587_v54 }
 0x2a4   : > { %1561 = vmatmul.mubr.bf16.gmra.mrb[40].mxu1 %v4960_v46 }
 0x2a5   : > { %1568 = vmatprep.mubr.bf16.mxu1 %v4964_v50 }
 0x2ac   : > { %1569 = vmatmul.mubr.bf16.gmra.mrb[44].mxu1 %v4972_v0 }
 0x2ad   : > { %1576 = vmatprep.mubr.bf16.mxu1 %v4976_v2 }
 0x2b4   : > { %1577 = vmatmul.mubr.bf16.gmra.mrb[48].mxu1 %v4984_v21 }
 0x2b5   : > { %1584 = vmatprep.mubr.bf16.mxu1 %v4988_v8 }
 0x2bc   : > { %1585 = vmatmul.mubr.bf16.gmra.mrb[52].mxu1 %v4994_v18 }
 0x2bd   : > { %1592 = vmatprep.mubr.bf16.mxu1 %v4998_v22 }
 0x2c4   : > { %1593 = vmatmul.mubr.bf16.gmra.mrb[56].mxu1 %v5005_v42 }
 0x2c5   : > { %1600 = vmatprep.mubr.bf16.mxu1 %v5009_v48 }
 0x2cc   : > { %1601 = vmatmul.mubr.bf16.gmra.mrb[60].mxu1 %v5016_v56 }
 0x2cd   : > { %1608 = vmatprep.mubr.bf16.mxu1 %v5021_v58 }
 0x2d4   : > { %1609 = vmatmul.mubr.bf16.gmra.mrb[64].mxu1 %v5028_v7 }
 0x2d5   : > { %1616 = vmatprep.mubr.bf16.mxu1 %v5030_v10 }
 0x2dc   : > { %1617 = vmatmul.mubr.bf16.gmra.mrb[68].mxu1 %v5034_v15 }
 0x2dd   : > { %1624 = vmatprep.mubr.bf16.mxu1 %v5036_v16 }
 0x2e4   : > { %1625 = vmatmul.mubr.bf16.gmra.mrb[72].mxu1 %v5044_v25 }
 0x2e5   : > { %1632 = vmatprep.mubr.bf16.mxu1 %v5046_v26 }
 0x2ec   : > { %1633 = vmatmul.mubr.bf16.gmra.mrb[76].mxu1 %v5054_v28 }
 0x2ed   : > { %1640 = vmatprep.mubr.bf16.mxu1 %v5056_v34 }
 0x2f4   : > { %1641 = vmatmul.mubr.bf16.gmra.mrb[80].mxu1 %v5062_v41 }
 0x2f5   : > { %1648 = vmatprep.mubr.bf16.mxu1 %v5064_v43 }
 0x2fc   : > { %1649 = vmatmul.mubr.bf16.gmra.mrb[84].mxu1 %v5073_v49 }
 0x2fd   : > { %1656 = vmatprep.mubr.bf16.mxu1 %v5075_v51 }
 0x304   : > { %1657 = vmatmul.mubr.bf16.gmra.mrb[88].mxu1 %v5083_v57 }
 0x305   : > { %1664 = vmatprep.mubr.bf16.mxu1 %v6214_v52 }
 0x30c   : > { %1665 = vmatmul.mubr.bf16.gmra.mrb[92].mxu1 %v6215_v38 }
 0x30d   : > { %2097 = vmatprep.mubr.bf16.mxu1 %v4815_v19 }
 0x367   : > { %v3848_v5 = vpop.f32.mrb[32].mxu1 }
 0x368   : > { %v3849_v61 = vpop.f32.mrb[33].mxu1 }
 0x369   : > { %v3850_v4 = vadd.f32 %v3849_v61, %v3848_v5  ;;  %v3851_v1 = vpop.f32.mrb[34].mxu1 }
 0x36a   : > { %v3852_v17 = vpop.f32.mrb[35].mxu1 }
 0x36b   : > { %v3853_v39 = vadd.f32 %v3852_v17, %v3851_v1  ;;  %v1673_v47 = vmul.f32 %v6216_v36, %v3850_v4 }
 0x36d   : > { %v1674_v3 = vmul.f32 %v5134_v55, %v3853_v39 }
 0x36f   : > { %v1705_v33 = vpack.c.bf16 %v1674_v3, %v1673_v47  ;;  %v3854_v54 = vpop.f32.mrb[36].mxu1  ;;  %v6217_v3 = vld [vmem:[#allocation11_spill] sm:$0xff] }
 0x370   : > { %v3855_v51 = vpop.f32.mrb[37].mxu1 }
 0x371   : > { %v3856_v57 = vadd.f32 %v3855_v51, %v3854_v54  ;;  %v3857_v49 = vpop.f32.mrb[38].mxu1  ;;  %1889 = vmatmul.mubr.bf16.vlgmr.msra.gmra.mrb[64].mxu0 %v1705_v33 }
 0x372   : > { %v3858_v52 = vpop.f32.mrb[39].mxu1  ;;  %1896 = vmatprep.mubr.bf16.mxu0 %v5363_v32 }
 0x373   : > { %v3859_v19 = vadd.f32 %v3858_v52, %v3857_v49  ;;  %v1675_v38 = vmul.f32 %v5146_v6, %v3856_v57 }
 0x375   : > { %v1676_v5 = vmul.f32 %v5148_v24, %v3859_v19 }
 0x377   : > { %v3860_v61 = vpop.f32.mrb[40].mxu1  ;;  %v1706_v1 = vpack.c.bf16 %v1676_v5, %v1675_v38  ;;  %v6218_v5 = vld [vmem:[#allocation14_spill] sm:$0xff] }
 0x378   : > { %v3861_v17 = vpop.f32.mrb[41].mxu1 }
 0x379   : > { %v3862_v4 = vadd.f32 %v3861_v17, %v3860_v61  ;;  %v3863_v36 = vpop.f32.mrb[42].mxu1  ;;  %1897 = vmatmul.mubr.bf16.gmra.mrb[68].mxu0 %v1706_v1  ;;  %v6219_v1 = vld [vmem:[#allocation13_spill] sm:$0xff] }
 0x37a   : > { %v3864_v39 = vpop.f32.mrb[43].mxu1  ;;  %1904 = vmatprep.mubr.bf16.mxu0 %v5374_v9 }
 0x37b   : > { %v3865_v51 = vadd.f32 %v3864_v39, %v3863_v36  ;;  %v1677_v47 = vmul.f32 %v5166_v63, %v3862_v4 }
 0x37d   : > { %v1678_v33 = vmul.f32 %v6217_v3, %v3865_v51 }
 0x37f   : > { %v3866_v54 = vpop.f32.mrb[44].mxu1  ;;  %v1707_v49 = vpack.c.bf16 %v1678_v33, %v1677_v47  ;;  %v6220_v33 = vld [vmem:[#allocation16_spill] sm:$0xff] }
 0x380   : > { %v3867_v52 = vpop.f32.mrb[45].mxu1 }
 0x381   : > { %v3868_v57 = vadd.f32 %v3867_v52, %v3866_v54  ;;  %v3869_v6 = vpop.f32.mrb[46].mxu1  ;;  %1905 = vmatmul.mubr.bf16.gmra.mrb[72].mxu0 %v1707_v49  ;;  %v6221_v49 = vld [vmem:[#allocation15_spill] sm:$0xff] }
 0x382   : > { %v3870_v19 = vpop.f32.mrb[47].mxu1  ;;  %1912 = vmatprep.mubr.bf16.mxu0 %v5372_v27 }
 0x383   : > { %v3871_v38 = vadd.f32 %v3870_v19, %v3869_v6  ;;  %v1679_v61 = vmul.f32 %v6218_v5, %v3868_v57 }
 0x385   : > { %v1680_v17 = vmul.f32 %v6219_v1, %v3871_v38 }
 0x387   : > { %v3872_v24 = vpop.f32.mrb[48].mxu1  ;;  %v1708_v36 = vpack.c.bf16 %v1680_v17, %v1679_v61  ;;  %v6222_v61 = vld [vmem:[#allocation18_spill] sm:$0xff] }
 0x388   : > { %v3873_v39 = vpop.f32.mrb[49].mxu1 }
 0x389   : > { %v3874_v4 = vadd.f32 %v3873_v39, %v3872_v24  ;;  %v3875_v63 = vpop.f32.mrb[50].mxu1  ;;  %1913 = vmatmul.mubr.bf16.gmra.mrb[76].mxu0 %v1708_v36  ;;  %v6223_v36 = vld [vmem:[#allocation17_spill] sm:$0xff] }
 0x38a   : > { %v3876_v51 = vpop.f32.mrb[51].mxu1  ;;  %1920 = vmatprep.mubr.bf16.mxu0 %v5382_v11 }
 0x38b   : > { %v3877_v47 = vadd.f32 %v3876_v51, %v3875_v63  ;;  %v1681_v54 = vmul.f32 %v6220_v33, %v3874_v4 }
 0x38d   : > { %v1682_v52 = vmul.f32 %v6221_v49, %v3877_v47 }
 0x38f   : > { %v3878_v3 = vpop.f32.mrb[52].mxu1  ;;  %v1709_v6 = vpack.c.bf16 %v1682_v52, %v1681_v54  ;;  %v6224_v54 = vld [vmem:[#allocation20_spill] sm:$0xff] }
 0x390   : > { %v3879_v19 = vpop.f32.mrb[53].mxu1 }
 0x391   : > { %v3880_v57 = vadd.f32 %v3879_v19, %v3878_v3  ;;  %v3881_v5 = vpop.f32.mrb[54].mxu1  ;;  %1921 = vmatmul.mubr.bf16.gmra.mrb[80].mxu0 %v1709_v6  ;;  %v6225_v6 = vld [vmem:[#allocation19_spill] sm:$0xff] }
 0x392   : > { %v3882_v38 = vpop.f32.mrb[55].mxu1  ;;  %1928 = vmatprep.mubr.bf16.mxu0 %v5380_v23 }
 0x393   : > { %v3883_v24 = vadd.f32 %v3882_v38, %v3881_v5  ;;  %v1683_v17 = vmul.f32 %v6222_v61, %v3880_v57 }
 0x395   : > { %v1684_v39 = vmul.f32 %v6223_v36, %v3883_v24 }
 0x397   : > { %v3884_v1 = vpop.f32.mrb[56].mxu1  ;;  %v1710_v63 = vpack.c.bf16 %v1684_v39, %v1683_v17  ;;  %v6226_v17 = vld [vmem:[#allocation22_spill] sm:$0xff] }
 0x398   : > { %v3885_v51 = vpop.f32.mrb[57].mxu1 }
 0x399   : > { %v3886_v4 = vadd.f32 %v3885_v51, %v3884_v1  ;;  %v3887_v33 = vpop.f32.mrb[58].mxu1  ;;  %1929 = vmatmul.mubr.bf16.gmra.mrb[84].mxu0 %v1710_v63  ;;  %v6227_v63 = vld [vmem:[#allocation21_spill] sm:$0xff] }
 0x39a   : > { %v3888_v47 = vpop.f32.mrb[59].mxu1  ;;  %1936 = vmatprep.mubr.bf16.mxu0 %v5390_v60 }
 0x39b   : > { %v3889_v3 = vadd.f32 %v3888_v47, %v3887_v33  ;;  %v1685_v52 = vmul.f32 %v6224_v54, %v3886_v4 }
 0x39d   : > { %v1686_v19 = vmul.f32 %v6225_v6, %v3889_v3 }
 0x39f   : > { %v3890_v49 = vpop.f32.mrb[60].mxu1  ;;  %v1711_v5 = vpack.c.bf16 %v1686_v19, %v1685_v52  ;;  %v6228_v52 = vld [vmem:[#allocation23_spill] sm:$0xff] }
 0x3a0   : > { %v3891_v38 = vpop.f32.mrb[61].mxu1 }
 0x3a1   : > { %v3892_v57 = vadd.f32 %v3891_v38, %v3890_v49  ;;  %v3893_v61 = vpop.f32.mrb[62].mxu1  ;;  %1937 = vmatmul.mubr.bf16.gmra.mrb[88].mxu0 %v1711_v5  ;;  %v6229_v5 = vld [vmem:[#allocation24_spill] sm:$0xff] }
 0x3a2   : > { %v3894_v24 = vpop.f32.mrb[63].mxu1  ;;  %1944 = vmatprep.mubr.bf16.mxu0 %v5388_v12 }
 0x3a3   : > { %v3895_v1 = vadd.f32 %v3894_v24, %v3893_v61  ;;  %v1687_v39 = vmul.f32 %v6226_v17, %v3892_v57 }
 0x3a5   : > { %v1688_v51 = vmul.f32 %v6227_v63, %v3895_v1 }
 0x3a7   : > { %v3896_v36 = vpop.f32.mrb[64].mxu1  ;;  %v1712_v33 = vpack.c.bf16 %v1688_v51, %v1687_v39  ;;  %v6230_v39 = vld [vmem:[#allocation25_spill] sm:$0xff] }
 0x3a8   : > { %v3897_v47 = vpop.f32.mrb[65].mxu1 }
 0x3a9   : > { %v3898_v4 = vadd.f32 %v3897_v47, %v3896_v36  ;;  %v3899_v54 = vpop.f32.mrb[66].mxu1  ;;  %1945 = vmatmul.mubr.bf16.gmra.mrb[92].mxu0 %v1712_v33  ;;  %v6231_v33 = vld [vmem:[#allocation26_spill] sm:$0xff] }
 0x3aa   : > { %v3900_v3 = vpop.f32.mrb[67].mxu1  ;;  %1952 = vmatprep.mubr.bf16.mxu0 %v5398_v35 }
 0x3ab   : > { %v3901_v49 = vadd.f32 %v3900_v3, %v3899_v54  ;;  %v1689_v19 = vmul.f32 %v6228_v52, %v3898_v4 }
 0x3ad   : > { %v1690_v38 = vmul.f32 %v6229_v5, %v3901_v49 }
 0x3af   : > { %v3902_v6 = vpop.f32.mrb[68].mxu1  ;;  %v1713_v61 = vpack.c.bf16 %v1690_v38, %v1689_v19  ;;  %v6232_v19 = vld [vmem:[#allocation27_spill] sm:$0xff] }
 0x3b0   : > { %v3903_v24 = vpop.f32.mrb[69].mxu1 }
 0x3b1   : > { %v3904_v57 = vadd.f32 %v3903_v24, %v3902_v6  ;;  %v3905_v17 = vpop.f32.mrb[70].mxu1  ;;  %1953 = vmatmul.mubr.bf16.gmra.mrb[96].mxu0 %v1713_v61  ;;  %v6233_v61 = vld [vmem:[#allocation28_spill] sm:$0xff] }
 0x3b2   : > { %v3906_v1 = vpop.f32.mrb[71].mxu1  ;;  %1960 = vmatprep.mubr.bf16.mxu0 %v5396_v31 }
 0x3b3   : > { %v3907_v36 = vadd.f32 %v3906_v1, %v3905_v17  ;;  %v1691_v51 = vmul.f32 %v6230_v39, %v3904_v57 }
 0x3b5   : > { %v1692_v47 = vmul.f32 %v6231_v33, %v3907_v36 }
 0x3b7   : > { %v3908_v63 = vpop.f32.mrb[72].mxu1  ;;  %v1714_v54 = vpack.c.bf16 %v1692_v47, %v1691_v51  ;;  %v6234_v51 = vld [vmem:[#allocation29_spill] sm:$0xff] }
 0x3b8   : > { %v3909_v3 = vpop.f32.mrb[73].mxu1 }
 0x3b9   : > { %v3910_v4 = vadd.f32 %v3909_v3, %v3908_v63  ;;  %v3911_v52 = vpop.f32.mrb[74].mxu1  ;;  %1961 = vmatmul.mubr.bf16.gmra.mrb[100].mxu0 %v1714_v54  ;;  %v6235_v54 = vld [vmem:[#allocation30_spill] sm:$0xff] }
 0x3ba   : > { %v3912_v49 = vpop.f32.mrb[75].mxu1  ;;  %1968 = vmatprep.mubr.bf16.mxu0 %v5410_v20 }
 0x3bb   : > { %v3913_v6 = vadd.f32 %v3912_v49, %v3911_v52  ;;  %v1693_v38 = vmul.f32 %v6232_v19, %v3910_v4 }
 0x3bd   : > { %v1694_v24 = vmul.f32 %v6233_v61, %v3913_v6 }
 0x3bf   : > { %v3914_v5 = vpop.f32.mrb[76].mxu1  ;;  %v1715_v17 = vpack.c.bf16 %v1694_v24, %v1693_v38  ;;  %v6236_v38 = vld [vmem:[#allocation31_spill] sm:$0xff] }
 0x3c0   : > { %v3915_v1 = vpop.f32.mrb[77].mxu1 }
 0x3c1   : > { %v3916_v57 = vadd.f32 %v3915_v1, %v3914_v5  ;;  %v3917_v39 = vpop.f32.mrb[78].mxu1  ;;  %1969 = vmatmul.mubr.bf16.gmra.mrb[104].mxu0 %v1715_v17  ;;  %v6237_v17 = vld [vmem:[#allocation32_spill] sm:$0xff] }
 0x3c2   : > { %v3918_v36 = vpop.f32.mrb[79].mxu1  ;;  %1976 = vmatprep.mubr.bf16.mxu0 %v5407_v62 }
 0x3c3   : > { %v3919_v63 = vadd.f32 %v3918_v36, %v3917_v39  ;;  %v1695_v47 = vmul.f32 %v6234_v51, %v3916_v57 }
 0x3c5   : > { %v1696_v3 = vmul.f32 %v6235_v54, %v3919_v63 }
 0x3c7   : > { %v3920_v33 = vpop.f32.mrb[80].mxu1  ;;  %v1716_v52 = vpack.c.bf16 %v1696_v3, %v1695_v47  ;;  %v6238_v47 = vld [vmem:[#allocation33_spill] sm:$0xff] }
 0x3c8   : > { %v3921_v49 = vpop.f32.mrb[81].mxu1 }
 0x3c9   : > { %v3922_v4 = vadd.f32 %v3921_v49, %v3920_v33  ;;  %v3923_v19 = vpop.f32.mrb[82].mxu1  ;;  %1977 = vmatmul.mubr.bf16.gmra.mrb[108].mxu0 %v1716_v52 }
 0x3ca   : > { %v3924_v6 = vpop.f32.mrb[83].mxu1  ;;  %1984 = vmatprep.mubr.bf16.mxu0 %v5422_v30 }
 0x3cb   : > { %v3925_v5 = vadd.f32 %v3924_v6, %v3923_v19  ;;  %v1697_v24 = vmul.f32 %v6236_v38, %v3922_v4 }
 0x3cd   : > { %v1698_v1 = vmul.f32 %v6237_v17, %v3925_v5 }
 0x3cf   : > { %v3926_v61 = vpop.f32.mrb[84].mxu1  ;;  %v1717_v39 = vpack.c.bf16 %v1698_v1, %v1697_v24  ;;  %v6239_v1 = vld [vmem:[#allocation35_spill] sm:$0xff] }
 0x3d0   : > { %v3927_v36 = vpop.f32.mrb[85].mxu1 }
 0x3d1   : > { %v3928_v57 = vadd.f32 %v3927_v36, %v3926_v61  ;;  %v3929_v51 = vpop.f32.mrb[86].mxu1  ;;  %1985 = vmatmul.mubr.bf16.gmra.mrb[112].mxu0 %v1717_v39 }
 0x3d2   : > { %v3930_v63 = vpop.f32.mrb[87].mxu1  ;;  %1992 = vmatprep.mubr.bf16.mxu0 %v5420_v53 }
 0x3d3   : > { %v3931_v33 = vadd.f32 %v3930_v63, %v3929_v51  ;;  %v1699_v3 = vmul.f32 %v6238_v47, %v3928_v57 }
 0x3d5   : > { %v1700_v52 = vmul.f32 %v5312_v59, %v3931_v33 }
 0x3d7   : > { %v3932_v49 = vpop.f32.mrb[88].mxu1  ;;  %v1718_v19 = vpack.c.bf16 %v1700_v52, %v1699_v3  ;;  %v6240_v52 = vld [vmem:[#allocation37_spill] sm:$0xff] }
 0x3d8   : > { %v3933_v6 = vpop.f32.mrb[89].mxu1 }
 0x3d9   : > { %v3934_v4 = vadd.f32 %v3933_v6, %v3932_v49  ;;  %v3935_v38 = vpop.f32.mrb[90].mxu1  ;;  %1993 = vmatmul.mubr.bf16.gmra.mrb[116].mxu0 %v1718_v19  ;;  %v6241_v19 = vld [vmem:[#allocation38_spill] sm:$0xff] }
 0x3da   : > { %v3936_v5 = vpop.f32.mrb[91].mxu1  ;;  %2000 = vmatprep.mubr.bf16.mxu0 %v5434_v29 }
 0x3db   : > { %v3937_v61 = vadd.f32 %v3936_v5, %v3935_v38  ;;  %v1701_v24 = vmul.f32 %v5323_v13, %v3934_v4  ;;  %v5570_v4 = vld [vmem:[%s6084_s5] ss:$0 sm:$0xff] }
 0x3dd   : > { %v1702_v39 = vmul.f32 %v6239_v1, %v3937_v61 }
 0x3df   : > { %v3938_v36 = vpop.f32.mrb[92].mxu1  ;;  %v1719_v51 = vpack.c.bf16 %v1702_v39, %v1701_v24 }
 0x3e0   : > { %v3939_v63 = vpop.f32.mrb[93].mxu1 }
 0x3e1   : > { %v3940_v57 = vadd.f32 %v3939_v63, %v3938_v36  ;;  %v3941_v47 = vpop.f32.mrb[94].mxu1  ;;  %2001 = vmatmul.mubr.bf16.gmra.mrb[120].mxu0 %v1719_v51 }
 0x3e2   : > { %v3942_v33 = vpop.f32.mrb[95].mxu1  ;;  %2008 = vmatprep.mubr.bf16.mxu0 %v5432_v44 }
 0x3e3   : > { %v3943_v3 = vadd.f32 %v3942_v33, %v3941_v47  ;;  %v1703_v49 = vmul.f32 %v6240_v52, %v3940_v57 }
 0x3e5   : > { %v1704_v6 = vmul.f32 %v6241_v19, %v3943_v3 }
 0x3e7   : > { %v1720_v59 = vpack.c.bf16 %v1704_v6, %v1703_v49 }
 0x3e9   : > { %2009 = vmatmul.mubr.bf16.gmra.mrb[124].mxu0 %v1720_v59 }
 0x444   : > { %v3960_v38 = vpop.f32.mrb[64].mxu0 }
 0x445   : > { %v3961_v5 = vpop.f32.mrb[65].mxu0 }
 0x446   : > { %v3962_v61 = vadd.f32 %v3961_v5, %v3960_v38  ;;  %v3963_v24 = vpop.f32.mrb[66].mxu0 }
 0x447   : > { %v3964_v39 = vpop.f32.mrb[67].mxu0 }
 0x448   : > { %v1891_v36 = vadd.f32 %v3962_v61, %v5570_v4  ;;  %v3965_v51 = vadd.f32 %v3964_v39, %v3963_v24 }
 0x44a   : > { %v1894_v47 = vadd.f32 %v3965_v51, %v5570_v4  ;;  %v2017_v63 = vmax.f32 %v1891_v36, 0.0 }
 0x44c   : > { %v2018_v57 = vmax.f32 %v1894_v47, 0.0  ;;  %v3966_v33 = vpop.f32.mrb[68].mxu0 }
 0x44d   : > { %v3967_v3 = vpop.f32.mrb[69].mxu0 }
 0x44e   : > { %v3968_v59 = vadd.f32 %v3967_v3, %v3966_v33  ;;  %v3969_v49 = vpop.f32.mrb[70].mxu0  ;;  %v5574_v6 = vpack.c.bf16 %v2018_v57, %v2017_v63 }
 0x44f   : > { %v3970_v19 = vpop.f32.mrb[71].mxu0 }
 0x450   : > { %v1899_v52 = vadd.f32 %v3968_v59, %v5570_v4  ;;  %v3971_v1 = vadd.f32 %v3970_v19, %v3969_v49  ;;  %2441 = vmatprep.mubr.bf16.mxu0 %v5574_v6 }
 0x452   : > { %v1902_v38 = vadd.f32 %v3971_v1, %v5570_v4  ;;  %v2019_v5 = vmax.f32 %v1899_v52, 0.0 }
 0x454   : > { %v2020_v61 = vmax.f32 %v1902_v38, 0.0  ;;  %v3972_v24 = vpop.f32.mrb[72].mxu0 }
 0x455   : > { %v3973_v39 = vpop.f32.mrb[73].mxu0 }
 0x456   : > { %v5579_v36 = vpack.c.bf16 %v2020_v61, %v2019_v5  ;;  %v3974_v51 = vadd.f32 %v3973_v39, %v3972_v24  ;;  %v3975_v47 = vpop.f32.mrb[74].mxu0 }
 0x457   : > { %v3976_v33 = vpop.f32.mrb[75].mxu0 }
 0x458   : > { %v1907_v63 = vadd.f32 %v3974_v51, %v5570_v4  ;;  %v3977_v57 = vadd.f32 %v3976_v33, %v3975_v47 }
 0x45a   : > { %v1910_v3 = vadd.f32 %v3977_v57, %v5570_v4  ;;  %v2021_v59 = vmax.f32 %v1907_v63, 0.0 }
 0x45c   : > { %v2022_v19 = vmax.f32 %v1910_v3, 0.0  ;;  %v3978_v49 = vpop.f32.mrb[76].mxu0 }
 0x45d   : > { %v3979_v13 = vpop.f32.mrb[77].mxu0 }
 0x45e   : > { %v5583_v17 = vpack.c.bf16 %v2022_v19, %v2021_v59  ;;  %v3980_v1 = vadd.f32 %v3979_v13, %v3978_v49  ;;  %v3981_v52 = vpop.f32.mrb[78].mxu0 }
 0x45f   : > { %v3982_v38 = vpop.f32.mrb[79].mxu0 }
 0x460   : > { %v1915_v5 = vadd.f32 %v3980_v1, %v5570_v4  ;;  %v3983_v61 = vadd.f32 %v3982_v38, %v3981_v52 }
 0x462   : > { %v1918_v24 = vadd.f32 %v3983_v61, %v5570_v4  ;;  %v2023_v39 = vmax.f32 %v1915_v5, 0.0 }
 0x464   : > { %v2024_v54 = vmax.f32 %v1918_v24, 0.0  ;;  %v3984_v51 = vpop.f32.mrb[80].mxu0 }
 0x465   : > { %v3985_v47 = vpop.f32.mrb[81].mxu0 }
 0x466   : > { %v5587_v33 = vpack.c.bf16 %v2024_v54, %v2023_v39  ;;  %v3986_v63 = vadd.f32 %v3985_v47, %v3984_v51  ;;  %v3987_v57 = vpop.f32.mrb[82].mxu0 }
 0x467   : > { %v3988_v3 = vpop.f32.mrb[83].mxu0 }
 0x468   : > { %v1923_v59 = vadd.f32 %v3986_v63, %v5570_v4  ;;  %v3989_v19 = vadd.f32 %v3988_v3, %v3987_v57 }
 0x46a   : > { %v1926_v13 = vadd.f32 %v3989_v19, %v5570_v4  ;;  %v2025_v49 = vmax.f32 %v1923_v59, 0.0 }
 0x46c   : > { %v2026_v44 = vmax.f32 %v1926_v13, 0.0  ;;  %v3990_v1 = vpop.f32.mrb[84].mxu0 }
 0x46d   : > { %v3991_v52 = vpop.f32.mrb[85].mxu0 }
 0x46e   : > { %v5591_v38 = vpack.c.bf16 %v2026_v44, %v2025_v49  ;;  %v3992_v5 = vadd.f32 %v3991_v52, %v3990_v1  ;;  %v3993_v61 = vpop.f32.mrb[86].mxu0 }
 0x46f   : > { %v3994_v24 = vpop.f32.mrb[87].mxu0 }
 0x470   : > { %v1931_v54 = vadd.f32 %v3992_v5, %v5570_v4  ;;  %v3995_v39 = vadd.f32 %v3994_v24, %v3993_v61 }
 0x472   : > { %v1934_v51 = vadd.f32 %v3995_v39, %v5570_v4  ;;  %v2027_v47 = vmax.f32 %v1931_v54, 0.0 }
 0x474   : > { %v2028_v29 = vmax.f32 %v1934_v51, 0.0  ;;  %v3996_v63 = vpop.f32.mrb[88].mxu0 }
 0x475   : > { %v3997_v57 = vpop.f32.mrb[89].mxu0 }
 0x476   : > { %v5595_v3 = vpack.c.bf16 %v2028_v29, %v2027_v47  ;;  %v3998_v59 = vadd.f32 %v3997_v57, %v3996_v63  ;;  %v3999_v19 = vpop.f32.mrb[90].mxu0 }
 0x477   : > { %v4000_v13 = vpop.f32.mrb[91].mxu0 }
 0x478   : > { %v1939_v44 = vadd.f32 %v3998_v59, %v5570_v4  ;;  %v4001_v49 = vadd.f32 %v4000_v13, %v3999_v19 }
 0x47a   : > { %v1942_v1 = vadd.f32 %v4001_v49, %v5570_v4  ;;  %v2029_v52 = vmax.f32 %v1939_v44, 0.0 }
 0x47c   : > { %v2030_v53 = vmax.f32 %v1942_v1, 0.0  ;;  %v4002_v5 = vpop.f32.mrb[92].mxu0 }
 0x47d   : > { %v4003_v61 = vpop.f32.mrb[93].mxu0 }
 0x47e   : > { %v5599_v24 = vpack.c.bf16 %v2030_v53, %v2029_v52  ;;  %v4004_v54 = vadd.f32 %v4003_v61, %v4002_v5  ;;  %v4005_v39 = vpop.f32.mrb[94].mxu0 }
 0x47f   : > { %v4006_v51 = vpop.f32.mrb[95].mxu0 }
 0x480   : > { %v1947_v29 = vadd.f32 %v4004_v54, %v5570_v4  ;;  %v4007_v47 = vadd.f32 %v4006_v51, %v4005_v39 }
 0x482   : > { %v1950_v63 = vadd.f32 %v4007_v47, %v5570_v4  ;;  %v2031_v57 = vmax.f32 %v1947_v29, 0.0 }
 0x484   : > { %v2032_v30 = vmax.f32 %v1950_v63, 0.0  ;;  %v4008_v59 = vpop.f32.mrb[96].mxu0 }
 0x485   : > { %v4009_v19 = vpop.f32.mrb[97].mxu0 }
 0x486   : > { %v5603_v13 = vpack.c.bf16 %v2032_v30, %v2031_v57  ;;  %v4010_v44 = vadd.f32 %v4009_v19, %v4008_v59  ;;  %v4011_v49 = vpop.f32.mrb[98].mxu0 }
 0x487   : > { %v4012_v1 = vpop.f32.mrb[99].mxu0 }
 0x488   : > { %v1955_v53 = vadd.f32 %v4010_v44, %v5570_v4  ;;  %v4013_v52 = vadd.f32 %v4012_v1, %v4011_v49 }
 0x48a   : > { %v1958_v5 = vadd.f32 %v4013_v52, %v5570_v4  ;;  %v2033_v61 = vmax.f32 %v1955_v53, 0.0 }
 0x48c   : > { %v2034_v55 = vmax.f32 %v1958_v5, 0.0  ;;  %v4014_v54 = vpop.f32.mrb[100].mxu0 }
 0x48d   : > { %v4015_v39 = vpop.f32.mrb[101].mxu0 }
 0x48e   : > { %v4016_v51 = vadd.f32 %v4015_v39, %v4014_v54  ;;  %v4017_v47 = vpop.f32.mrb[102].mxu0  ;;  %v5607_v29 = vpack.c.bf16 %v2034_v55, %v2033_v61 }
 0x48f   : > { %v4018_v63 = vpop.f32.mrb[103].mxu0 }
 0x490   : > { %v1963_v30 = vadd.f32 %v4016_v51, %v5570_v4  ;;  %v4019_v57 = vadd.f32 %v4018_v63, %v4017_v47  ;;  %4056 = vmatprep.subr.bf16.mxu1 %v5607_v29 }
 0x491   : > { %4057 = vmatpush3.bf16.msra.mxu1 %v5574_v6 }
 0x492   : > { %v1966_v59 = vadd.f32 %v4019_v57, %v5570_v4  ;;  %v2035_v19 = vmax.f32 %v1963_v30, 0.0 }
 0x494   : > { %v2036_v44 = vmax.f32 %v1966_v59, 0.0  ;;  %v4020_v49 = vpop.f32.mrb[104].mxu0 }
 0x495   : > { %v4021_v1 = vpop.f32.mrb[105].mxu0 }
 0x496   : > { %v4022_v53 = vadd.f32 %v4021_v1, %v4020_v49  ;;  %v4023_v52 = vpop.f32.mrb[106].mxu0  ;;  %v5613_v5 = vpack.c.bf16 %v2036_v44, %v2035_v19 }
 0x497   : > { %v4024_v55 = vpop.f32.mrb[107].mxu0 }
 0x498   : > { %v1971_v61 = vadd.f32 %v4022_v53, %v5570_v4  ;;  %v4025_v54 = vadd.f32 %v4024_v55, %v4023_v52  ;;  %4058 = vmatprep.subr.bf16.mxu1 %v5613_v5 }
 0x499   : > { %4059 = vmatpush3.bf16.msra.mxu1 %v5579_v36 }
 0x49a   : > { %v1974_v39 = vadd.f32 %v4025_v54, %v5570_v4  ;;  %v2037_v51 = vmax.f32 %v1971_v61, 0.0 }
 0x49c   : > { %v2038_v47 = vmax.f32 %v1974_v39, 0.0  ;;  %v4026_v63 = vpop.f32.mrb[108].mxu0 }
 0x49d   : > { %v4027_v30 = vpop.f32.mrb[109].mxu0 }
 0x49e   : > { %v4028_v57 = vadd.f32 %v4027_v30, %v4026_v63  ;;  %v4029_v59 = vpop.f32.mrb[110].mxu0  ;;  %v5619_v49 = vpack.c.bf16 %v2038_v47, %v2037_v51 }
 0x49f   : > { %v4030_v19 = vpop.f32.mrb[111].mxu0 }
 0x4a0   : > { %v1979_v44 = vadd.f32 %v4028_v57, %v5570_v4  ;;  %v4031_v1 = vadd.f32 %v4030_v19, %v4029_v59  ;;  %4060 = vmatprep.subr.bf16.mxu1 %v5619_v49 }
 0x4a1   : > { %4061 = vmatpush3.bf16.msra.mxu1 %v5583_v17 }
 0x4a2   : > { %v1982_v53 = vadd.f32 %v4031_v1, %v5570_v4  ;;  %v2039_v52 = vmax.f32 %v1979_v44, 0.0 }
 0x4a4   : > { %v2040_v55 = vmax.f32 %v1982_v53, 0.0  ;;  %v4032_v61 = vpop.f32.mrb[112].mxu0 }
 0x4a5   : > { %v4033_v54 = vpop.f32.mrb[113].mxu0 }
 0x4a6   : > { %v4034_v39 = vadd.f32 %v4033_v54, %v4032_v61  ;;  %v4035_v62 = vpop.f32.mrb[114].mxu0  ;;  %v5625_v63 = vpack.c.bf16 %v2040_v55, %v2039_v52 }
 0x4a7   : > { %v4036_v51 = vpop.f32.mrb[115].mxu0 }
 0x4a8   : > { %6242 = vst [vmem:[#allocation46_spill] sm:$0xff] %v5625_v63  ;;  %v1987_v47 = vadd.f32 %v4034_v39, %v5570_v4  ;;  %v4037_v30 = vadd.f32 %v4036_v51, %v4035_v62  ;;  %4062 = vmatprep.subr.bf16.mxu1 %v5625_v63 }
 0x4a9   : > { %4063 = vmatpush3.bf16.msra.mxu1 %v5587_v33 }
 0x4aa   : > { %v1990_v57 = vadd.f32 %v4037_v30, %v5570_v4  ;;  %v2041_v59 = vmax.f32 %v1987_v47, 0.0 }
 0x4ac   : > { %v2042_v19 = vmax.f32 %v1990_v57, 0.0  ;;  %v4038_v44 = vpop.f32.mrb[116].mxu0 }
 0x4ad   : > { %v4039_v1 = vpop.f32.mrb[117].mxu0 }
 0x4ae   : > { %v4040_v53 = vadd.f32 %v4039_v1, %v4038_v44  ;;  %v4041_v20 = vpop.f32.mrb[118].mxu0  ;;  %v5631_v61 = vpack.c.bf16 %v2042_v19, %v2041_v59 }
 0x4af   : > { %v4042_v52 = vpop.f32.mrb[119].mxu0 }
 0x4b0   : > { %6243 = vst [vmem:[#allocation47_spill] sm:$0xff] %v5631_v61  ;;  %v1995_v55 = vadd.f32 %v4040_v53, %v5570_v4  ;;  %v4043_v54 = vadd.f32 %v4042_v52, %v4041_v20  ;;  %4064 = vmatprep.subr.bf16.mxu1 %v5631_v61 }
 0x4b1   : > { %4065 = vmatpush3.bf16.msra.mxu1 %v5591_v38 }
 0x4b2   : > { %v1998_v62 = vadd.f32 %v4043_v54, %v5570_v4  ;;  %v2043_v39 = vmax.f32 %v1995_v55, 0.0 }
 0x4b4   : > { %v2044_v51 = vmax.f32 %v1998_v62, 0.0  ;;  %v4044_v47 = vpop.f32.mrb[120].mxu0 }
 0x4b5   : > { %v4045_v30 = vpop.f32.mrb[121].mxu0 }
 0x4b6   : > { %v4046_v57 = vadd.f32 %v4045_v30, %v4044_v47  ;;  %v4047_v63 = vpop.f32.mrb[122].mxu0  ;;  %v5637_v44 = vpack.c.bf16 %v2044_v51, %v2043_v39 }
 0x4b7   : > { %v4048_v59 = vpop.f32.mrb[123].mxu0 }
 0x4b8   : > { %v2003_v19 = vadd.f32 %v4046_v57, %v5570_v4  ;;  %v4049_v1 = vadd.f32 %v4048_v59, %v4047_v63  ;;  %4066 = vmatprep.subr.bf16.mxu1 %v5637_v44 }
 0x4b9   : > { %4067 = vmatpush3.bf16.msra.mxu1 %v5595_v3 }
 0x4ba   : > { %v2006_v20 = vadd.f32 %v4049_v1, %v5570_v4  ;;  %v2045_v53 = vmax.f32 %v2003_v19, 0.0  ;;  %v4588_v1 = vld [vmem:[%s6087_s8 + $0x40] sm:$0xff]  }
 0x4bc   : > { %v2046_v52 = vmax.f32 %v2006_v20, 0.0  ;;  %v4050_v55 = vpop.f32.mrb[124].mxu0  ;;  %v4591_v20 = vld [vmem:[%s6087_s8 + $0x8] sm:$0xff]  }
 0x4bd   : > { %v4051_v54 = vpop.f32.mrb[125].mxu0 }
 0x4be   : > { %v4052_v62 = vadd.f32 %v4051_v54, %v4050_v55  ;;  %v4053_v61 = vpop.f32.mrb[126].mxu0  ;;  %v5643_v47 = vpack.c.bf16 %v2046_v52, %v2045_v53  ;;  %v4592_v53 = vld [vmem:[%s6087_s8 + $0x50] sm:$0xff]   ;;  %v4596_v55 = vld [vmem:[%s6087_s8 + $0x60] sm:$0xff]  }
 0x4bf   : > { %v4054_v39 = vpop.f32.mrb[127].mxu0  ;;  %v4593_v52 = vld [vmem:[%s6087_s8 + $0x10] sm:$0xff]   ;;  %v4597_v54 = vld [vmem:[%s6087_s8 + $0x20] sm:$0xff]  }
 0x4c0   : > { %v2011_v51 = vadd.f32 %v4052_v62, %v5570_v4  ;;  %v4055_v30 = vadd.f32 %v4054_v39, %v4053_v61  ;;  %4068 = vmatprep.subr.bf16.mxu1 %v5643_v47  ;;  %v4589_v61 = vld [vmem:[%s6087_s8] sm:$0xff]   ;;  %v4600_v62 = vld [vmem:[%s6087_s8 + $0x70] sm:$0xff]  }
 0x4c1   : > { %4069 = vmatpush3.bf16.msra.mxu1 %v5599_v24  ;;  %v4601_v39 = vld [vmem:[%s6087_s8 + $0x30] sm:$0xff]  }
 0x4c2   : > { %v2014_v63 = vadd.f32 %v4055_v30, %v5570_v4  ;;  %v2047_v57 = vmax.f32 %v2011_v51, 0.0  ;;  %v4590_v4 = vld [vmem:[%s6087_s8 + $0x48] sm:$0xff]   ;;  %v4604_v51 = vld [vmem:[%s6085_s6 + $0x40] sm:$0xff]  }
 0x4c3   : > { %4168 = vmatprep.subr.bf16.mxu0 %v4604_v51  ;;  %v6245_v30 = vld [vmem:[#allocation3_spill] sm:$0xff] }
 0x4c4   : > { %v2048_v59 = vmax.f32 %v2014_v63, 0.0  ;;  %v6247_v63 = vld [vmem:[#allocation5_spill] sm:$0xff] }
 0x4c6   : > { %v5649_v19 = vpack.c.bf16 %v2048_v59, %v2047_v57  ;;  %v6248_v57 = vld [vmem:[#allocation6_spill] sm:$0xff]  ;;  %v6254_v59 = vld [vmem:[#allocation8_spill] sm:$0xff] }
 0x4c8   : > { %4070 = vmatprep.subr.bf16.mxu1 %v5649_v19 }
 0x4c9   : > { %4071 = vmatpush3.bf16.msra.mxu1 %v5603_v13 }
 0x4ca   : > { %4280 = vmatprep.subr.bf16.mxu1 %v4588_v1 }
 0x4cc   : > { %2098 = vmatmul.mubr.bf16.vlgmr.msra.gmra.mrb[96].mxu1 %v4937_v37  ;;  %v4594_v37 = vld [vmem:[%s6087_s8 + $0x58] sm:$0xff]  }
 0x4cd   : > { %2105 = vmatprep.mubr.bf16.mxu1 %v4942_v40  ;;  %4281 = vmatpush3.bf16.msra.mxu1 %v4589_v61  ;;  %v4595_v40 = vld [vmem:[%s6087_s8 + $0x18] sm:$0xff]   ;;  %v6255_v61 = vld [vmem:[#allocation47_spill] sm:$0xff] }
 0x4ce   : > { %4282 = vmatprep.subr.bf16.mxu1 %v4590_v4 }
 0x4d1   : > { %4283 = vmatpush3.bf16.msra.mxu1 %v4591_v20 }
 0x4d2   : > { %4284 = vmatprep.subr.bf16.mxu1 %v4592_v53 }
 0x4d4   : > { %2106 = vmatmul.mubr.bf16.gmra.mrb[100].mxu1 %v4950_v14  ;;  %v4598_v14 = vld [vmem:[%s6087_s8 + $0x68] sm:$0xff]  }
 0x4d5   : > { %2113 = vmatprep.mubr.bf16.mxu1 %v4954_v45  ;;  %4285 = vmatpush3.bf16.msra.mxu1 %v4593_v52  ;;  %v4599_v45 = vld [vmem:[%s6087_s8 + $0x28] sm:$0xff]  }
 0x4d6   : > { %4286 = vmatprep.subr.bf16.mxu1 %v4594_v37 }
 0x4d9   : > { %4287 = vmatpush3.bf16.msra.mxu1 %v4595_v40 }
 0x4da   : > { %4288 = vmatprep.subr.bf16.mxu1 %v4596_v55  ;;  %v6256_v55 = vld [vmem:[#allocation43_spill] sm:$0xff] }
 0x4dc   : > { %2114 = vmatmul.mubr.bf16.gmra.mrb[104].mxu1 %v4960_v46  ;;  %v4602_v46 = vld [vmem:[%s6087_s8 + $0x78] sm:$0xff]  }
 0x4dd   : > { %2121 = vmatprep.mubr.bf16.mxu1 %v4964_v50  ;;  %4289 = vmatpush3.bf16.msra.mxu1 %v4597_v54  ;;  %v4603_v50 = vld [vmem:[%s6087_s8 + $0x38] sm:$0xff]  }
 0x4de   : > { %4290 = vmatprep.subr.bf16.mxu1 %v4598_v14  ;;  %v6257_v54 = vld [vmem:[#allocation9_spill] sm:$0xff] }
 0x4e1   : > { %4291 = vmatpush3.bf16.msra.mxu1 %v4599_v45  ;;  %v6258_v45 = vld [vmem:[#allocation10_spill] sm:$0xff] }
 0x4e2   : > { %4292 = vmatprep.subr.bf16.mxu1 %v4600_v62 }
 0x4e4   : > { %2122 = vmatmul.mubr.bf16.gmra.mrb[108].mxu1 %v4972_v0  ;;  %v4605_v0 = vld [vmem:[%s6085_s6] sm:$0xff]  }
 0x4e5   : > { %2129 = vmatprep.mubr.bf16.mxu1 %v4976_v2  ;;  %4293 = vmatpush3.bf16.msra.mxu1 %v4601_v39  ;;  %v4606_v2 = vld [vmem:[%s6085_s6 + $0x48] sm:$0xff]  }
 0x4e6   : > { %4294 = vmatprep.subr.bf16.mxu1 %v4602_v46  ;;  %4169 = vmatpush3.bf16.msra.mxu0 %v4605_v0 }
 0x4e7   : > { %4170 = vmatprep.subr.bf16.mxu0 %v4606_v2 }
 0x4e9   : > { %4295 = vmatpush3.bf16.msra.mxu1 %v4603_v50 }
 0x4ec   : > { %2130 = vmatmul.mubr.bf16.gmra.mrb[112].mxu1 %v4984_v21  ;;  %v4607_v21 = vld [vmem:[%s6085_s6 + $0x8] sm:$0xff]  }
 0x4ed   : > { %2137 = vmatprep.mubr.bf16.mxu1 %v4988_v8  ;;  %4171 = vmatpush3.bf16.msra.mxu0 %v4607_v21  ;;  %v4608_v8 = vld [vmem:[%s6085_s6 + $0x50] sm:$0xff]  }
 0x4ee   : > { %4172 = vmatprep.subr.bf16.mxu0 %v4608_v8  ;;  %v6260_v8 = vld [vmem:[#allocation12_spill] sm:$0xff] }
 0x4f4   : > { %2138 = vmatmul.mubr.bf16.gmra.mrb[116].mxu1 %v4994_v18  ;;  %v4609_v18 = vld [vmem:[%s6085_s6 + $0x10] sm:$0xff]  }
 0x4f5   : > { %2145 = vmatprep.mubr.bf16.mxu1 %v4998_v22  ;;  %4173 = vmatpush3.bf16.msra.mxu0 %v4609_v18  ;;  %v4610_v22 = vld [vmem:[%s6085_s6 + $0x58] sm:$0xff]  }
 0x4f6   : > { %4174 = vmatprep.subr.bf16.mxu0 %v4610_v22  ;;  %v6261_v22 = vld [vmem:[#allocation11_spill] sm:$0xff] }
 0x4fc   : > { %2146 = vmatmul.mubr.bf16.gmra.mrb[120].mxu1 %v5005_v42  ;;  %v4611_v42 = vld [vmem:[%s6085_s6 + $0x18] sm:$0xff]  }
 0x4fd   : > { %2153 = vmatprep.mubr.bf16.mxu1 %v5009_v48  ;;  %v4612_v48 = vld [vmem:[%s6085_s6 + $0x60] sm:$0xff]   ;;  %4175 = vmatpush3.bf16.msra.mxu0 %v4611_v42 }
 0x4fe   : > { %4176 = vmatprep.subr.bf16.mxu0 %v4612_v48 }
 0x504   : > { %2154 = vmatmul.mubr.bf16.gmra.mrb[124].mxu1 %v5016_v56  ;;  %v4613_v56 = vld [vmem:[%s6085_s6 + $0x20] sm:$0xff]  }
 0x505   : > { %2161 = vmatprep.mubr.bf16.mxu1 %v5021_v58  ;;  %4177 = vmatpush3.bf16.msra.mxu0 %v4613_v56  ;;  %v4614_v58 = vld [vmem:[%s6085_s6 + $0x68] sm:$0xff]  }
 0x506   : > { %4178 = vmatprep.subr.bf16.mxu0 %v4614_v58 }
 0x50c   : > { %2162 = vmatmul.mubr.bf16.gmra.mrb[128].mxu1 %v5028_v7  ;;  %v4615_v7 = vld [vmem:[%s6085_s6 + $0x28] sm:$0xff]  }
 0x50d   : > { %2169 = vmatprep.mubr.bf16.mxu1 %v5030_v10  ;;  %4179 = vmatpush3.bf16.msra.mxu0 %v4615_v7  ;;  %v4616_v10 = vld [vmem:[%s6085_s6 + $0x70] sm:$0xff]  }
 0x50e   : > { %4180 = vmatprep.subr.bf16.mxu0 %v4616_v10 }
 0x514   : > { %2170 = vmatmul.mubr.bf16.gmra.mrb[132].mxu1 %v5034_v15  ;;  %v4617_v15 = vld [vmem:[%s6085_s6 + $0x30] sm:$0xff]  }
 0x515   : > { %2177 = vmatprep.mubr.bf16.mxu1 %v5036_v16  ;;  %4181 = vmatpush3.bf16.msra.mxu0 %v4617_v15  ;;  %v4618_v16 = vld [vmem:[%s6085_s6 + $0x78] sm:$0xff]  }
 0x516   : > { %4182 = vmatprep.subr.bf16.mxu0 %v4618_v16 }
 0x51c   : > { %2178 = vmatmul.mubr.bf16.gmra.mrb[136].mxu1 %v5044_v25  ;;  %v4619_v25 = vld [vmem:[%s6085_s6 + $0x38] sm:$0xff]  }
 0x51d   : > { %2185 = vmatprep.mubr.bf16.mxu1 %v5046_v26  ;;  %4183 = vmatpush3.bf16.msra.mxu0 %v4619_v25  ;;  %v6244_v26 = vld [vmem:[#allocation2_spill] sm:$0xff] }
 0x51e   : > { %v6263_v25 = vld [vmem:[#allocation14_spill] sm:$0xff] }
 0x524   : > { %2186 = vmatmul.mubr.bf16.gmra.mrb[140].mxu1 %v5054_v28  ;;  %v6246_v28 = vld [vmem:[#allocation4_spill] sm:$0xff] }
 0x525   : > { %2193 = vmatprep.mubr.bf16.mxu1 %v5056_v34  ;;  %v6249_v34 = vld [vmem:[#allocation39_spill] sm:$0xff] }
 0x52c   : > { %2194 = vmatmul.mubr.bf16.gmra.mrb[144].mxu1 %v5062_v41  ;;  %v6250_v41 = vld [vmem:[#allocation41_spill] sm:$0xff] }
 0x52d   : > { %2201 = vmatprep.mubr.bf16.mxu1 %v5064_v43  ;;  %v6251_v43 = vld [vmem:[#allocation46_spill] sm:$0xff] }
 0x534   : > { %2202 = vmatmul.mubr.bf16.gmra.mrb[148].mxu1 %v6244_v26 }
 0x535   : > { %2209 = vmatprep.mubr.bf16.mxu1 %v6245_v30  ;;  %v6264_v30 = vld [vmem:[#allocation13_spill] sm:$0xff] }
 0x53c   : > { %2210 = vmatmul.mubr.bf16.gmra.mrb[152].mxu1 %v6246_v28 }
 0x53d   : > { %2217 = vmatprep.mubr.bf16.mxu1 %v6247_v63 }
 0x544   : > { %2218 = vmatmul.mubr.bf16.gmra.mrb[156].mxu1 %v6248_v57 }
 0x545   : > { %2849 = vmatprep.mubr.bf16.mxu1 %v5574_v6  ;;  %v6253_v6 = vld [vmem:[#allocation7_spill] sm:$0xff] }
 0x54c   : > { %2850 = vmatmul.mubr.bf16.vlgmr.msra.gmra.mrb[160].mxu1 %v6249_v34 }
 0x54d   : > { %2857 = vmatprep.mubr.bf16.mxu1 %v5579_v36 }
 0x554   : > { %2858 = vmatmul.mubr.bf16.gmra.mrb[164].mxu1 %v5363_v32 }
 0x555   : > { %2865 = vmatprep.mubr.bf16.mxu1 %v5583_v17 }
 0x55c   : > { %2866 = vmatmul.mubr.bf16.gmra.mrb[168].mxu1 %v5374_v9 }
 0x55d   : > { %2873 = vmatprep.mubr.bf16.mxu1 %v5587_v33 }
 0x564   : > { %2874 = vmatmul.mubr.bf16.gmra.mrb[172].mxu1 %v5372_v27 }
 0x565   : > { %2881 = vmatprep.mubr.bf16.mxu1 %v5591_v38 }
 0x56c   : > { %2882 = vmatmul.mubr.bf16.gmra.mrb[176].mxu1 %v5382_v11 }
 0x56d   : > { %2889 = vmatprep.mubr.bf16.mxu1 %v5595_v3 }
 0x574   : > { %2890 = vmatmul.mubr.bf16.gmra.mrb[180].mxu1 %v5380_v23 }
 0x575   : > { %2897 = vmatprep.mubr.bf16.mxu1 %v5599_v24 }
 0x57c   : > { %2898 = vmatmul.mubr.bf16.gmra.mrb[184].mxu1 %v5390_v60  ;;  %v6252_v60 = vld [vmem:[#allocation40_spill] sm:$0xff] }
 0x57d   : > { %2905 = vmatprep.mubr.bf16.mxu1 %v5603_v13 }
 0x584   : > { %2906 = vmatmul.mubr.bf16.gmra.mrb[188].mxu1 %v5388_v12 }
 0x585   : > { %2913 = vmatprep.mubr.bf16.mxu1 %v5607_v29 }
 0x58c   : > { %2914 = vmatmul.mubr.bf16.gmra.mrb[192].mxu1 %v5398_v35 }
 0x58d   : > { %2921 = vmatprep.mubr.bf16.mxu1 %v5613_v5 }
 0x594   : > { %2922 = vmatmul.mubr.bf16.gmra.mrb[196].mxu1 %v5396_v31 }
 0x595   : > { %2929 = vmatprep.mubr.bf16.mxu1 %v5619_v49 }
 0x59c   : > { %2930 = vmatmul.mubr.bf16.gmra.mrb[200].mxu1 %v6250_v41 }
 0x59d   : > { %2937 = vmatprep.mubr.bf16.mxu1 %v6251_v43 }
 0x59f   : > { %v4072_v32 = vpop.f32.mrb[96].mxu1 }
 0x5a0   : > { %v4073_v27 = vpop.f32.mrb[97].mxu1 }
 0x5a1   : > { %v4074_v9 = vadd.f32 %v4073_v27, %v4072_v32  ;;  %v4075_v23 = vpop.f32.mrb[98].mxu1 }
 0x5a2   : > { %v4076_v11 = vpop.f32.mrb[99].mxu1 }
 0x5a3   : > { %v4077_v12 = vadd.f32 %v4076_v11, %v4075_v23  ;;  %v2226_v35 = vmul.f32 %v6253_v6, %v4074_v9  ;;  %v6266_v23 = vld [vmem:[#allocation16_spill] sm:$0xff] }
 0x5a4   : > { %2938 = vmatmul.mubr.bf16.gmra.mrb[204].mxu1 %v6252_v60 }
 0x5a5   : > { %v2227_v1 = vmul.f32 %v6254_v59, %v4077_v12  ;;  %2945 = vmatprep.mubr.bf16.mxu1 %v6255_v61  ;;  %v6267_v12 = vld [vmem:[#allocation15_spill] sm:$0xff] }
 0x5a7   : > { %v2258_v31 = vpack.c.bf16 %v2227_v1, %v2226_v35  ;;  %v4078_v4 = vpop.f32.mrb[100].mxu1 }
 0x5a8   : > { %v4079_v20 = vpop.f32.mrb[101].mxu1 }
 0x5a9   : > { %v4080_v53 = vadd.f32 %v4079_v20, %v4078_v4  ;;  %v4081_v52 = vpop.f32.mrb[102].mxu1  ;;  %2442 = vmatmul.mubr.bf16.vlgmr.msra.gmra.mrb[128].mxu0 %v2258_v31 }
 0x5aa   : > { %v4082_v37 = vpop.f32.mrb[103].mxu1  ;;  %2449 = vmatprep.mubr.bf16.mxu0 %v5579_v36  ;;  %v6259_v36 = vld [vmem:[#allocation42_spill] sm:$0xff] }
 0x5ab   : > { %v4083_v40 = vadd.f32 %v4082_v37, %v4081_v52  ;;  %v2228_v14 = vmul.f32 %v6257_v54, %v4080_v53  ;;  %v6268_v53 = vld [vmem:[#allocation18_spill] sm:$0xff] }
 0x5ac   : > { %2946 = vmatmul.mubr.bf16.gmra.mrb[208].mxu1 %v6256_v55 }
 0x5ad   : > { %v2229_v62 = vmul.f32 %v6258_v45, %v4083_v40  ;;  %2953 = vmatprep.mubr.bf16.mxu1 %v5637_v44 }
 0x5af   : > { %v4084_v39 = vpop.f32.mrb[104].mxu1  ;;  %v2259_v46 = vpack.c.bf16 %v2229_v62, %v2228_v14 }
 0x5b0   : > { %v4085_v50 = vpop.f32.mrb[105].mxu1 }
 0x5b1   : > { %v4086_v51 = vadd.f32 %v4085_v50, %v4084_v39  ;;  %v4087_v0 = vpop.f32.mrb[106].mxu1  ;;  %2450 = vmatmul.mubr.bf16.gmra.mrb[132].mxu0 %v2259_v46  ;;  %v6270_v46 = vld [vmem:[#allocation20_spill] sm:$0xff] }
 0x5b2   : > { %v4088_v2 = vpop.f32.mrb[107].mxu1  ;;  %2457 = vmatprep.mubr.bf16.mxu0 %v5583_v17  ;;  %v6262_v17 = vld [vmem:[#allocation45_spill] sm:$0xff] }
 0x5b3   : > { %v4089_v21 = vadd.f32 %v4088_v2, %v4087_v0  ;;  %v2230_v18 = vmul.f32 %v6260_v8, %v4086_v51  ;;  %v6271_v51 = vld [vmem:[#allocation19_spill] sm:$0xff] }
 0x5b4   : > { %2954 = vmatmul.mubr.bf16.gmra.mrb[212].mxu1 %v6259_v36 }
 0x5b5   : > { %v2231_v42 = vmul.f32 %v6261_v22, %v4089_v21  ;;  %2961 = vmatprep.mubr.bf16.mxu1 %v5643_v47 }
 0x5b7   : > { %v4090_v48 = vpop.f32.mrb[108].mxu1  ;;  %v2260_v56 = vpack.c.bf16 %v2231_v42, %v2230_v18  ;;  %v6272_v42 = vld [vmem:[#allocation22_spill] sm:$0xff] }
 0x5b8   : > { %v4091_v58 = vpop.f32.mrb[109].mxu1 }
 0x5b9   : > { %v4092_v7 = vadd.f32 %v4091_v58, %v4090_v48  ;;  %v4093_v10 = vpop.f32.mrb[110].mxu1  ;;  %2458 = vmatmul.mubr.bf16.gmra.mrb[136].mxu0 %v2260_v56  ;;  %v6273_v56 = vld [vmem:[#allocation21_spill] sm:$0xff] }
 0x5ba   : > { %v4094_v15 = vpop.f32.mrb[111].mxu1  ;;  %2465 = vmatprep.mubr.bf16.mxu0 %v5587_v33  ;;  %v6265_v33 = vld [vmem:[#allocation44_spill] sm:$0xff] }
 0x5bb   : > { %v4095_v16 = vadd.f32 %v4094_v15, %v4093_v10  ;;  %v2232_v26 = vmul.f32 %v6263_v25, %v4092_v7 }
 0x5bc   : > { %2962 = vmatmul.mubr.bf16.gmra.mrb[216].mxu1 %v6262_v17 }
 0x5bd   : > { %v2233_v28 = vmul.f32 %v6264_v30, %v4095_v16  ;;  %2969 = vmatprep.mubr.bf16.mxu1 %v5649_v19 }
 0x5bf   : > { %v4096_v63 = vpop.f32.mrb[112].mxu1  ;;  %v2261_v57 = vpack.c.bf16 %v2233_v28, %v2232_v26  ;;  %v6274_v26 = vld [vmem:[#allocation23_spill] sm:$0xff]  ;;  %v6275_v28 = vld [vmem:[#allocation24_spill] sm:$0xff] }
 0x5c0   : > { %v4097_v34 = vpop.f32.mrb[113].mxu1 }
 0x5c1   : > { %v4098_v41 = vadd.f32 %v4097_v34, %v4096_v63  ;;  %v4099_v32 = vpop.f32.mrb[114].mxu1  ;;  %2466 = vmatmul.mubr.bf16.gmra.mrb[140].mxu0 %v2261_v57 }
 0x5c2   : > { %v4100_v27 = vpop.f32.mrb[115].mxu1  ;;  %2473 = vmatprep.mubr.bf16.mxu0 %v5591_v38  ;;  %v6269_v38 = vld [vmem:[#allocation17_spill] sm:$0xff] }
 0x5c3   : > { %v4101_v9 = vadd.f32 %v4100_v27, %v4099_v32  ;;  %v2234_v11 = vmul.f32 %v6266_v23, %v4098_v41 }
 0x5c4   : > { %2970 = vmatmul.mubr.bf16.gmra.mrb[220].mxu1 %v6265_v33  ;;  %v6276_v33 = vld [vmem:[#allocation25_spill] sm:$0xff] }
 0x5c5   : > { %v2235_v60 = vmul.f32 %v6267_v12, %v4101_v9 }
 0x5c7   : > { %v4102_v6 = vpop.f32.mrb[116].mxu1  ;;  %v2262_v35 = vpack.c.bf16 %v2235_v60, %v2234_v11  ;;  %v6277_v11 = vld [vmem:[#allocation26_spill] sm:$0xff] }
 0x5c8   : > { %v4103_v59 = vpop.f32.mrb[117].mxu1 }
 0x5c9   : > { %v4104_v1 = vadd.f32 %v4103_v59, %v4102_v6  ;;  %v4105_v31 = vpop.f32.mrb[118].mxu1  ;;  %2474 = vmatmul.mubr.bf16.gmra.mrb[144].mxu0 %v2262_v35  ;;  %v4620_v6 = vld [vmem:[%s6087_s8 + $0x80] sm:$0xff]  }
 0x5ca   : > { %v4106_v4 = vpop.f32.mrb[119].mxu1  ;;  %2481 = vmatprep.mubr.bf16.mxu0 %v5595_v3  ;;  %4450 = vmatprep.subr.bf16.mxu0 %v4620_v6 }
 0x5cb   : > { %v4107_v20 = vadd.f32 %v4106_v4, %v4105_v31  ;;  %v2236_v52 = vmul.f32 %v6268_v53, %v4104_v1  ;;  %4451 = vmatpush3.bf16.msra.mxu0 %v4620_v6  ;;  %v4621_v4 = vld [vmem:[%s6087_s8 + $0x88] sm:$0xff]   ;;  %4498 = vmatprep.subr.bf16.mxu1 %v4620_v6 }
 0x5cc   : > { %4506 = vmatpush3.bf16.msra.mxu1 %v4620_v6  ;;  %4452 = vmatprep.subr.bf16.mxu0 %v4621_v4 }
 0x5cd   : > { %v2237_v37 = vmul.f32 %v6269_v38, %v4107_v20  ;;  %v6278_v20 = vld [vmem:[#allocation27_spill] sm:$0xff]  ;;  %4499 = vmatprep.subr.bf16.mxu1 %v4621_v4 }
 0x5cf   : > { %v4108_v40 = vpop.f32.mrb[120].mxu1  ;;  %v2263_v55 = vpack.c.bf16 %v2237_v37, %v2236_v52  ;;  %v6279_v52 = vld [vmem:[#allocation28_spill] sm:$0xff]  ;;  %4453 = vmatpush3.bf16.msra.mxu0 %v4621_v4 }
 0x5d0   : > { %v4109_v54 = vpop.f32.mrb[121].mxu1  ;;  %4507 = vmatpush3.bf16.msra.mxu1 %v4621_v4  ;;  %v6288_v4 = vld [vmem:[#allocation37_spill] sm:$0xff] }
 0x5d1   : > { %v4110_v14 = vadd.f32 %v4109_v54, %v4108_v40  ;;  %v4111_v45 = vpop.f32.mrb[122].mxu1  ;;  %2482 = vmatmul.mubr.bf16.gmra.mrb[148].mxu0 %v2263_v55 }
 0x5d2   : > { %v4112_v62 = vpop.f32.mrb[123].mxu1  ;;  %2489 = vmatprep.mubr.bf16.mxu0 %v5599_v24 }
 0x5d3   : > { %v4113_v39 = vadd.f32 %v4112_v62, %v4111_v45  ;;  %v2238_v50 = vmul.f32 %v6270_v46, %v4110_v14  ;;  %v6280_v46 = vld [vmem:[#allocation29_spill] sm:$0xff] }
 0x5d5   : > { %v2239_v0 = vmul.f32 %v6271_v51, %v4113_v39  ;;  %v4623_v39 = vld [vmem:[%s6087_s8 + $0x98] sm:$0xff]   ;;  %v6281_v51 = vld [vmem:[#allocation30_spill] sm:$0xff] }
 0x5d7   : > { %v4114_v3 = vpop.f32.mrb[124].mxu1  ;;  %v2264_v2 = vpack.c.bf16 %v2239_v0, %v2238_v50 }
 0x5d8   : > { %v4115_v21 = vpop.f32.mrb[125].mxu1 }
 0x5d9   : > { %v4116_v36 = vadd.f32 %v4115_v21, %v4114_v3  ;;  %v4117_v8 = vpop.f32.mrb[126].mxu1  ;;  %2490 = vmatmul.mubr.bf16.gmra.mrb[152].mxu0 %v2264_v2 }
 0x5da   : > { %v4118_v18 = vpop.f32.mrb[127].mxu1  ;;  %2497 = vmatprep.mubr.bf16.mxu0 %v5603_v13 }
 0x5db   : > { %v4119_v22 = vadd.f32 %v4118_v18, %v4117_v8  ;;  %v2240_v48 = vmul.f32 %v6272_v42, %v4116_v36  ;;  %v4625_v42 = vld [vmem:[%s6087_s8 + $0xa8] sm:$0xff]  }
 0x5dd   : > { %v2241_v58 = vmul.f32 %v6273_v56, %v4119_v22 }
 0x5df   : > { %v4120_v24 = vpop.f32.mrb[128].mxu1  ;;  %v2265_v7 = vpack.c.bf16 %v2241_v58, %v2240_v48  ;;  %v6282_v48 = vld [vmem:[#allocation31_spill] sm:$0xff]  ;;  %v6283_v58 = vld [vmem:[#allocation32_spill] sm:$0xff] }
 0x5e0   : > { %v4121_v10 = vpop.f32.mrb[129].mxu1 }
 0x5e1   : > { %v4122_v15 = vadd.f32 %v4121_v10, %v4120_v24  ;;  %v4123_v16 = vpop.f32.mrb[130].mxu1  ;;  %2498 = vmatmul.mubr.bf16.gmra.mrb[156].mxu0 %v2265_v7 }
 0x5e2   : > { %v4124_v17 = vpop.f32.mrb[131].mxu1  ;;  %2505 = vmatprep.mubr.bf16.mxu0 %v5607_v29 }
 0x5e3   : > { %v4125_v25 = vadd.f32 %v4124_v17, %v4123_v16  ;;  %v2242_v30 = vmul.f32 %v6274_v26, %v4122_v15 }
 0x5e5   : > { %v2243_v63 = vmul.f32 %v6275_v28, %v4125_v25  ;;  %v6284_v28 = vld [vmem:[#allocation33_spill] sm:$0xff] }
 0x5e7   : > { %v4126_v13 = vpop.f32.mrb[132].mxu1  ;;  %v2266_v57 = vpack.c.bf16 %v2243_v63, %v2242_v30  ;;  %v4627_v30 = vld [vmem:[%s6087_s8 + $0xb8] sm:$0xff]  }
 0x5e8   : > { %v4127_v34 = vpop.f32.mrb[133].mxu1 }
 0x5e9   : > { %v4128_v41 = vadd.f32 %v4127_v34, %v4126_v13  ;;  %v4129_v32 = vpop.f32.mrb[134].mxu1  ;;  %2506 = vmatmul.mubr.bf16.gmra.mrb[160].mxu0 %v2266_v57  ;;  %v6285_v13 = vld [vmem:[#allocation34_spill] sm:$0xff] }
 0x5ea   : > { %v4130_v27 = vpop.f32.mrb[135].mxu1  ;;  %2513 = vmatprep.mubr.bf16.mxu0 %v5613_v5 }
 0x5eb   : > { %v4131_v9 = vadd.f32 %v4130_v27, %v4129_v32  ;;  %v2244_v23 = vmul.f32 %v6276_v33, %v4128_v41 }
 0x5ed   : > { %v2245_v12 = vmul.f32 %v6277_v11, %v4131_v9 }
 0x5ef   : > { %v4132_v29 = vpop.f32.mrb[136].mxu1  ;;  %v2267_v60 = vpack.c.bf16 %v2245_v12, %v2244_v23  ;;  %v6286_v23 = vld [vmem:[#allocation36_spill] sm:$0xff]  ;;  %v6287_v12 = vld [vmem:[#allocation35_spill] sm:$0xff] }
 0x5f0   : > { %v4133_v35 = vpop.f32.mrb[137].mxu1 }
 0x5f1   : > { %v4134_v59 = vadd.f32 %v4133_v35, %v4132_v29  ;;  %v4135_v1 = vpop.f32.mrb[138].mxu1  ;;  %2514 = vmatmul.mubr.bf16.gmra.mrb[164].mxu0 %v2267_v60 }
 0x5f2   : > { %v4136_v31 = vpop.f32.mrb[139].mxu1  ;;  %2521 = vmatprep.mubr.bf16.mxu0 %v5619_v49  ;;  %v4622_v49 = vld [vmem:[%s6087_s8 + $0x90] sm:$0xff]  }
 0x5f3   : > { %v4137_v5 = vadd.f32 %v4136_v31, %v4135_v1  ;;  %v2246_v53 = vmul.f32 %v6278_v20, %v4134_v59  ;;  %4454 = vmatprep.subr.bf16.mxu0 %v4622_v49  ;;  %4500 = vmatprep.subr.bf16.mxu1 %v4622_v49 }
 0x5f4   : > { %4455 = vmatpush3.bf16.msra.mxu0 %v4622_v49  ;;  %4508 = vmatpush3.bf16.msra.mxu1 %v4622_v49 }
 0x5f5   : > { %v2247_v38 = vmul.f32 %v6279_v52, %v4137_v5  ;;  %4456 = vmatprep.subr.bf16.mxu0 %v4623_v39  ;;  %4501 = vmatprep.subr.bf16.mxu1 %v4623_v39 }
 0x5f7   : > { %v4138_v37 = vpop.f32.mrb[140].mxu1  ;;  %v2268_v40 = vpack.c.bf16 %v2247_v38, %v2246_v53  ;;  %v6289_v53 = vld [vmem:[#allocation38_spill] sm:$0xff] }
 0x5f8   : > { %v4139_v55 = vpop.f32.mrb[141].mxu1  ;;  %4457 = vmatpush3.bf16.msra.mxu0 %v4623_v39  ;;  %4509 = vmatpush3.bf16.msra.mxu1 %v4623_v39 }
 0x5f9   : > { %v4140_v54 = vadd.f32 %v4139_v55, %v4138_v37  ;;  %v4141_v14 = vpop.f32.mrb[142].mxu1  ;;  %2522 = vmatmul.mubr.bf16.gmra.mrb[168].mxu0 %v2268_v40 }
 0x5fa   : > { %v4142_v45 = vpop.f32.mrb[143].mxu1  ;;  %2529 = vmatprep.mubr.bf16.mxu0 %v6251_v43  ;;  %v4624_v43 = vld [vmem:[%s6087_s8 + $0xa0] sm:$0xff]  }
 0x5fb   : > { %v4143_v62 = vadd.f32 %v4142_v45, %v4141_v14  ;;  %v2248_v50 = vmul.f32 %v6280_v46, %v4140_v54  ;;  %4458 = vmatprep.subr.bf16.mxu0 %v4624_v43  ;;  %4502 = vmatprep.subr.bf16.mxu1 %v4624_v43 }
 0x5fc   : > { %4459 = vmatpush3.bf16.msra.mxu0 %v4624_v43  ;;  %4510 = vmatpush3.bf16.msra.mxu1 %v4624_v43 }
 0x5fd   : > { %v2249_v0 = vmul.f32 %v6281_v51, %v4143_v62  ;;  %4460 = vmatprep.subr.bf16.mxu0 %v4625_v42  ;;  %4503 = vmatprep.subr.bf16.mxu1 %v4625_v42 }
 0x5ff   : > { %v4144_v3 = vpop.f32.mrb[144].mxu1  ;;  %v2269_v2 = vpack.c.bf16 %v2249_v0, %v2248_v50 }
 0x600   : > { %v4145_v21 = vpop.f32.mrb[145].mxu1  ;;  %4461 = vmatpush3.bf16.msra.mxu0 %v4625_v42  ;;  %4511 = vmatpush3.bf16.msra.mxu1 %v4625_v42 }
 0x601   : > { %v4146_v36 = vadd.f32 %v4145_v21, %v4144_v3  ;;  %v4147_v8 = vpop.f32.mrb[146].mxu1  ;;  %2530 = vmatmul.mubr.bf16.gmra.mrb[172].mxu0 %v2269_v2 }
 0x602   : > { %v4148_v18 = vpop.f32.mrb[147].mxu1  ;;  %2537 = vmatprep.mubr.bf16.mxu0 %v6255_v61  ;;  %v4626_v61 = vld [vmem:[%s6087_s8 + $0xb0] sm:$0xff]  }
 0x603   : > { %v4149_v22 = vadd.f32 %v4148_v18, %v4147_v8  ;;  %v2250_v56 = vmul.f32 %v6282_v48, %v4146_v36  ;;  %4462 = vmatprep.subr.bf16.mxu0 %v4626_v61  ;;  %4504 = vmatprep.subr.bf16.mxu1 %v4626_v61 }
 0x604   : > { %4463 = vmatpush3.bf16.msra.mxu0 %v4626_v61  ;;  %4512 = vmatpush3.bf16.msra.mxu1 %v4626_v61 }
 0x605   : > { %v2251_v24 = vmul.f32 %v6283_v58, %v4149_v22  ;;  %4464 = vmatprep.subr.bf16.mxu0 %v4627_v30  ;;  %4505 = vmatprep.subr.bf16.mxu1 %v4627_v30 }
 0x607   : > { %v4150_v7 = vpop.f32.mrb[148].mxu1  ;;  %v2270_v10 = vpack.c.bf16 %v2251_v24, %v2250_v56 }
 0x608   : > { %v4151_v15 = vpop.f32.mrb[149].mxu1  ;;  %4465 = vmatpush3.bf16.msra.mxu0 %v4627_v30  ;;  %4513 = vmatpush3.bf16.msra.mxu1 %v4627_v30 }
 0x609   : > { %v4152_v16 = vadd.f32 %v4151_v15, %v4150_v7  ;;  %v4153_v17 = vpop.f32.mrb[150].mxu1  ;;  %2538 = vmatmul.mubr.bf16.gmra.mrb[176].mxu0 %v2270_v10 }
 0x60a   : > { %v4154_v25 = vpop.f32.mrb[151].mxu1  ;;  %2545 = vmatprep.mubr.bf16.mxu0 %v5637_v44 }
 0x60b   : > { %v4155_v26 = vadd.f32 %v4154_v25, %v4153_v17  ;;  %v2252_v63 = vmul.f32 %v6284_v28, %v4152_v16 }
 0x60d   : > { %v2253_v57 = vmul.f32 %v6285_v13, %v4155_v26 }
 0x60f   : > { %v4156_v34 = vpop.f32.mrb[152].mxu1  ;;  %v2271_v41 = vpack.c.bf16 %v2253_v57, %v2252_v63 }
 0x610   : > { %v4157_v32 = vpop.f32.mrb[153].mxu1 }
 0x611   : > { %v4158_v44 = vadd.f32 %v4157_v32, %v4156_v34  ;;  %v4159_v27 = vpop.f32.mrb[154].mxu1  ;;  %2546 = vmatmul.mubr.bf16.gmra.mrb[180].mxu0 %v2271_v41 }
 0x612   : > { %v4160_v9 = vpop.f32.mrb[155].mxu1  ;;  %2553 = vmatprep.mubr.bf16.mxu0 %v5643_v47 }
 0x613   : > { %v4161_v33 = vadd.f32 %v4160_v9, %v4159_v27  ;;  %v2254_v11 = vmul.f32 %v6286_v23, %v4158_v44 }
 0x615   : > { %v2255_v29 = vmul.f32 %v6287_v12, %v4161_v33 }
 0x617   : > { %v4162_v60 = vpop.f32.mrb[156].mxu1  ;;  %v2272_v6 = vpack.c.bf16 %v2255_v29, %v2254_v11 }
 0x618   : > { %v4163_v35 = vpop.f32.mrb[157].mxu1 }
 0x619   : > { %v4164_v59 = vadd.f32 %v4163_v35, %v4162_v60  ;;  %v4165_v1 = vpop.f32.mrb[158].mxu1  ;;  %2554 = vmatmul.mubr.bf16.gmra.mrb[184].mxu0 %v2272_v6 }
 0x61a   : > { %v4166_v31 = vpop.f32.mrb[159].mxu1  ;;  %2561 = vmatprep.mubr.bf16.mxu0 %v5649_v19 }
 0x61b   : > { %v4167_v5 = vadd.f32 %v4166_v31, %v4165_v1  ;;  %v2256_v20 = vmul.f32 %v6288_v4, %v4164_v59 }
 0x61d   : > { %v2257_v52 = vmul.f32 %v6289_v53, %v4167_v5 }
 0x61f   : > { %v4296_v47 = vpop.f32.mrb[160].mxu1  ;;  %v2273_v38 = vpack.c.bf16 %v2257_v52, %v2256_v20 }
 0x620   : > { %v4297_v37 = vpop.f32.mrb[161].mxu1 }
 0x621   : > { %v5883_v40 = vadd.f32 %v4297_v37, %v4296_v47  ;;  %2562 = vmatmul.mubr.bf16.gmra.mrb[188].mxu0 %v2273_v38  ;;  %v4299_v49 = vpop.f32.mrb[162].mxu1 }
 0x622   : > { %v4300_v55 = vpop.f32.mrb[163].mxu1 }
 0x623   : > { %v5885_v54 = vadd.f32 %v4300_v55, %v4299_v49 }
 0x627   : > { %v4302_v14 = vpop.f32.mrb[164].mxu1 }
 0x628   : > { %v4303_v45 = vpop.f32.mrb[165].mxu1 }
 0x629   : > { %v5887_v62 = vadd.f32 %v4303_v45, %v4302_v14  ;;  %v4305_v19 = vpop.f32.mrb[166].mxu1 }
 0x62a   : > { %v4306_v39 = vpop.f32.mrb[167].mxu1 }
 0x62b   : > { %v5889_v46 = vadd.f32 %v4306_v39, %v4305_v19 }
 0x62f   : > { %v4308_v50 = vpop.f32.mrb[168].mxu1 }
 0x630   : > { %v4309_v51 = vpop.f32.mrb[169].mxu1 }
 0x631   : > { %v5891_v0 = vadd.f32 %v4309_v51, %v4308_v50  ;;  %v4311_v3 = vpop.f32.mrb[170].mxu1  ;;  %v5934_v51 = vld [vmem:[%s6086_s7] ss:$0 sm:$0xff] }
 0x632   : > { %v4312_v2 = vpop.f32.mrb[171].mxu1 }
 0x633   : > { %v5893_v43 = vadd.f32 %v4312_v2, %v4311_v3 }
 0x637   : > { %v4314_v21 = vpop.f32.mrb[172].mxu1 }
 0x638   : > { %v4315_v36 = vpop.f32.mrb[173].mxu1 }
 0x639   : > { %v5895_v8 = vadd.f32 %v4315_v36, %v4314_v21  ;;  %v4317_v18 = vpop.f32.mrb[174].mxu1 }
 0x63a   : > { %v4318_v22 = vpop.f32.mrb[175].mxu1 }
 0x63b   : > { %v5897_v42 = vadd.f32 %v4318_v22, %v4317_v18 }
 0x63f   : > { %v4320_v48 = vpop.f32.mrb[176].mxu1 }
 0x640   : > { %v4321_v56 = vpop.f32.mrb[177].mxu1 }
 0x641   : > { %v5899_v58 = vadd.f32 %v4321_v56, %v4320_v48  ;;  %v4323_v24 = vpop.f32.mrb[178].mxu1 }
 0x642   : > { %v4324_v7 = vpop.f32.mrb[179].mxu1 }
 0x643   : > { %v5901_v10 = vadd.f32 %v4324_v7, %v4323_v24 }
 0x647   : > { %v4326_v61 = vpop.f32.mrb[180].mxu1 }
 0x648   : > { %v4327_v15 = vpop.f32.mrb[181].mxu1 }
 0x649   : > { %v5903_v16 = vadd.f32 %v4327_v15, %v4326_v61  ;;  %v4329_v17 = vpop.f32.mrb[182].mxu1 }
 0x64a   : > { %v4330_v25 = vpop.f32.mrb[183].mxu1 }
 0x64b   : > { %v5905_v26 = vadd.f32 %v4330_v25, %v4329_v17 }
 0x64f   : > { %v4332_v30 = vpop.f32.mrb[184].mxu1 }
 0x650   : > { %v4333_v28 = vpop.f32.mrb[185].mxu1 }
 0x651   : > { %v5907_v63 = vadd.f32 %v4333_v28, %v4332_v30  ;;  %v4335_v13 = vpop.f32.mrb[186].mxu1 }
 0x652   : > { %v4336_v57 = vpop.f32.mrb[187].mxu1 }
 0x653   : > { %v5909_v34 = vadd.f32 %v4336_v57, %v4335_v13 }
 0x657   : > { %v4338_v41 = vpop.f32.mrb[188].mxu1 }
 0x658   : > { %v4339_v32 = vpop.f32.mrb[189].mxu1 }
 0x659   : > { %v5911_v44 = vadd.f32 %v4339_v32, %v4338_v41  ;;  %v4341_v27 = vpop.f32.mrb[190].mxu1 }
 0x65a   : > { %v4342_v9 = vpop.f32.mrb[191].mxu1 }
 0x65b   : > { %v5913_v33 = vadd.f32 %v4342_v9, %v4341_v27 }
 0x65f   : > { %v4344_v23 = vpop.f32.mrb[192].mxu1 }
 0x660   : > { %v4345_v11 = vpop.f32.mrb[193].mxu1 }
 0x661   : > { %v5915_v12 = vadd.f32 %v4345_v11, %v4344_v23  ;;  %v4347_v29 = vpop.f32.mrb[194].mxu1 }
 0x662   : > { %v4348_v60 = vpop.f32.mrb[195].mxu1 }
 0x663   : > { %v5917_v6 = vadd.f32 %v4348_v60, %v4347_v29 }
 0x667   : > { %v4350_v35 = vpop.f32.mrb[196].mxu1 }
 0x668   : > { %v4351_v59 = vpop.f32.mrb[197].mxu1 }
 0x669   : > { %v5919_v1 = vadd.f32 %v4351_v59, %v4350_v35  ;;  %v4353_v31 = vpop.f32.mrb[198].mxu1 }
 0x66a   : > { %v4354_v5 = vpop.f32.mrb[199].mxu1 }
 0x66b   : > { %v5921_v4 = vadd.f32 %v4354_v5, %v4353_v31 }
 0x66f   : > { %v4356_v20 = vpop.f32.mrb[200].mxu1 }
 0x670   : > { %v4357_v53 = vpop.f32.mrb[201].mxu1 }
 0x671   : > { %v5923_v52 = vadd.f32 %v4357_v53, %v4356_v20  ;;  %v4359_v47 = vpop.f32.mrb[202].mxu1 }
 0x672   : > { %v4360_v38 = vpop.f32.mrb[203].mxu1 }
 0x673   : > { %v5925_v37 = vadd.f32 %v4360_v38, %v4359_v47 }
 0x677   : > { %v4362_v49 = vpop.f32.mrb[204].mxu1 }
 0x678   : > { %v4363_v55 = vpop.f32.mrb[205].mxu1 }
 0x679   : > { %v5927_v14 = vadd.f32 %v4363_v55, %v4362_v49  ;;  %v4365_v45 = vpop.f32.mrb[206].mxu1 }
 0x67a   : > { %v4366_v19 = vpop.f32.mrb[207].mxu1 }
 0x67b   : > { %v5929_v39 = vadd.f32 %v4366_v19, %v4365_v45 }
 0x67c   : > { %v4184_v50 = vpop.f32.mrb[128].mxu0 }
 0x67d   : > { %v4185_v3 = vpop.f32.mrb[129].mxu0 }
 0x67e   : > { %v4186_v2 = vadd.f32 %v4185_v3, %v4184_v50  ;;  %v4187_v21 = vpop.f32.mrb[130].mxu0 }
 0x67f   : > { %v4188_v36 = vpop.f32.mrb[131].mxu0  ;;  %v4368_v18 = vpop.f32.mrb[208].mxu1 }
 0x680   : > { %v2444_v22 = vadd.f32 %v4186_v2, %v5934_v51  ;;  %v4189_v48 = vadd.f32 %v4188_v36, %v4187_v21  ;;  %v4369_v56 = vpop.f32.mrb[209].mxu1 }
 0x681   : > { %v5937_v24 = vadd.f32 %v4369_v56, %v4368_v18  ;;  %v4371_v7 = vpop.f32.mrb[210].mxu1 }
 0x682   : > { %v2447_v61 = vadd.f32 %v4189_v48, %v5934_v51  ;;  %v4372_v15 = vpop.f32.mrb[211].mxu1  ;;  %v2570_v25 = vmax.f32 %v2444_v22, 0.0 }
 0x683   : > { %v5940_v17 = vadd.f32 %v4372_v15, %v4371_v7 }
 0x684   : > { %v2571_v30 = vmax.f32 %v2447_v61, 0.0  ;;  %v4190_v28 = vpop.f32.mrb[132].mxu0 }
 0x685   : > { %v4191_v13 = vpop.f32.mrb[133].mxu0 }
 0x686   : > { %v4192_v57 = vadd.f32 %v4191_v13, %v4190_v28  ;;  %v4193_v41 = vpop.f32.mrb[134].mxu0  ;;  %v2602_v32 = vpack.c.bf16 %v2571_v30, %v2570_v25 }
 0x687   : > { %v4194_v27 = vpop.f32.mrb[135].mxu0  ;;  %v4374_v9 = vpop.f32.mrb[212].mxu1 }
 0x688   : > { %v2452_v23 = vadd.f32 %v4192_v57, %v5934_v51  ;;  %v4195_v11 = vadd.f32 %v4194_v27, %v4193_v41  ;;  %v4375_v29 = vpop.f32.mrb[213].mxu1  ;;  %4466 = vmatprep.mubr.bf16.mxu0 %v2602_v32 }
 0x689   : > { %v5943_v60 = vadd.f32 %v4375_v29, %v4374_v9  ;;  %v4377_v35 = vpop.f32.mrb[214].mxu1 }
 0x68a   : > { %v2455_v59 = vadd.f32 %v4195_v11, %v5934_v51  ;;  %v4378_v31 = vpop.f32.mrb[215].mxu1  ;;  %v2572_v20 = vmax.f32 %v2452_v23, 0.0 }
 0x68b   : > { %v5946_v5 = vadd.f32 %v4378_v31, %v4377_v35 }
 0x68c   : > { %v2573_v53 = vmax.f32 %v2455_v59, 0.0  ;;  %v4196_v47 = vpop.f32.mrb[136].mxu0 }
 0x68d   : > { %v4197_v38 = vpop.f32.mrb[137].mxu0 }
 0x68e   : > { %v2603_v49 = vpack.c.bf16 %v2573_v53, %v2572_v20  ;;  %v4198_v55 = vadd.f32 %v4197_v38, %v4196_v47  ;;  %v4199_v45 = vpop.f32.mrb[138].mxu0 }
 0x68f   : > { %v4200_v19 = vpop.f32.mrb[139].mxu0  ;;  %v4380_v50 = vpop.f32.mrb[216].mxu1 }
 0x690   : > { %v2460_v3 = vadd.f32 %v4198_v55, %v5934_v51  ;;  %v4201_v2 = vadd.f32 %v4200_v19, %v4199_v45  ;;  %v4381_v21 = vpop.f32.mrb[217].mxu1  ;;  %4467 = vmatmul.mubr.bf16.vlgmr.msra.gmra.mrb[192].mxu0 %v2603_v49 }
 0x691   : > { %v5949_v36 = vadd.f32 %v4381_v21, %v4380_v50  ;;  %v4383_v18 = vpop.f32.mrb[218].mxu1 }
 0x692   : > { %v2463_v22 = vadd.f32 %v4201_v2, %v5934_v51  ;;  %v4384_v48 = vpop.f32.mrb[219].mxu1  ;;  %v2574_v7 = vmax.f32 %v2460_v3, 0.0 }
 0x693   : > { %v5952_v56 = vadd.f32 %v4384_v48, %v4383_v18 }
 0x694   : > { %v2575_v61 = vmax.f32 %v2463_v22, 0.0  ;;  %v4202_v15 = vpop.f32.mrb[140].mxu0 }
 0x695   : > { %v4203_v25 = vpop.f32.mrb[141].mxu0 }
 0x696   : > { %v4204_v30 = vadd.f32 %v4203_v25, %v4202_v15  ;;  %v4205_v28 = vpop.f32.mrb[142].mxu0  ;;  %v2604_v13 = vpack.c.bf16 %v2575_v61, %v2574_v7 }
 0x697   : > { %v4206_v57 = vpop.f32.mrb[143].mxu0  ;;  %v4386_v41 = vpop.f32.mrb[220].mxu1 }
 0x698   : > { %v2468_v32 = vadd.f32 %v4204_v30, %v5934_v51  ;;  %v4207_v27 = vadd.f32 %v4206_v57, %v4205_v28  ;;  %v4387_v9 = vpop.f32.mrb[221].mxu1  ;;  %4470 = vmatprep.mubr.bf16.mxu0 %v2604_v13 }
 0x699   : > { %v5955_v23 = vadd.f32 %v4387_v9, %v4386_v41  ;;  %v4389_v11 = vpop.f32.mrb[222].mxu1 }
 0x69a   : > { %v2471_v29 = vadd.f32 %v4207_v27, %v5934_v51  ;;  %v4390_v35 = vpop.f32.mrb[223].mxu1  ;;  %v2576_v31 = vmax.f32 %v2468_v32, 0.0 }
 0x69b   : > { %v5958_v59 = vadd.f32 %v4390_v35, %v4389_v11 }
 0x69c   : > { %v2577_v20 = vmax.f32 %v2471_v29, 0.0  ;;  %v4208_v53 = vpop.f32.mrb[144].mxu0 }
 0x69d   : > { %v4209_v47 = vpop.f32.mrb[145].mxu0 }
 0x69e   : > { %v4210_v38 = vadd.f32 %v4209_v47, %v4208_v53  ;;  %v4211_v49 = vpop.f32.mrb[146].mxu0  ;;  %v2605_v55 = vpack.c.bf16 %v2577_v20, %v2576_v31 }
 0x69f   : > { %v4212_v45 = vpop.f32.mrb[147].mxu0 }
 0x6a0   : > { %v2476_v19 = vadd.f32 %v4210_v38, %v5934_v51  ;;  %v4213_v50 = vadd.f32 %v4212_v45, %v4211_v49  ;;  %4471 = vmatmul.mubr.bf16.gmra.mrb[196].mxu0 %v2605_v55 }
 0x6a2   : > { %v2479_v3 = vadd.f32 %v4213_v50, %v5934_v51  ;;  %v2578_v2 = vmax.f32 %v2476_v19, 0.0 }
 0x6a4   : > { %v2579_v21 = vmax.f32 %v2479_v3, 0.0  ;;  %v4214_v18 = vpop.f32.mrb[148].mxu0 }
 0x6a5   : > { %v4215_v22 = vpop.f32.mrb[149].mxu0 }
 0x6a6   : > { %v4216_v48 = vadd.f32 %v4215_v22, %v4214_v18  ;;  %v4217_v7 = vpop.f32.mrb[150].mxu0  ;;  %v2606_v61 = vpack.c.bf16 %v2579_v21, %v2578_v2 }
 0x6a7   : > { %v4218_v15 = vpop.f32.mrb[151].mxu0 }
 0x6a8   : > { %v2484_v25 = vadd.f32 %v4216_v48, %v5934_v51  ;;  %v4219_v30 = vadd.f32 %v4218_v15, %v4217_v7  ;;  %4474 = vmatprep.mubr.bf16.mxu0 %v2606_v61 }
 0x6aa   : > { %v2487_v28 = vadd.f32 %v4219_v30, %v5934_v51  ;;  %v2580_v13 = vmax.f32 %v2484_v25, 0.0 }
 0x6ac   : > { %v2581_v57 = vmax.f32 %v2487_v28, 0.0  ;;  %v4220_v41 = vpop.f32.mrb[152].mxu0 }
 0x6ad   : > { %v4221_v32 = vpop.f32.mrb[153].mxu0 }
 0x6ae   : > { %v4222_v27 = vadd.f32 %v4221_v32, %v4220_v41  ;;  %v4223_v9 = vpop.f32.mrb[154].mxu0  ;;  %v2607_v11 = vpack.c.bf16 %v2581_v57, %v2580_v13 }
 0x6af   : > { %v4224_v29 = vpop.f32.mrb[155].mxu0 }
 0x6b0   : > { %v2492_v35 = vadd.f32 %v4222_v27, %v5934_v51  ;;  %v4225_v31 = vadd.f32 %v4224_v29, %v4223_v9  ;;  %4475 = vmatmul.mubr.bf16.gmra.mrb[200].mxu0 %v2607_v11 }
 0x6b2   : > { %v2495_v20 = vadd.f32 %v4225_v31, %v5934_v51  ;;  %v2582_v53 = vmax.f32 %v2492_v35, 0.0 }
 0x6b4   : > { %v2583_v47 = vmax.f32 %v2495_v20, 0.0  ;;  %v4226_v38 = vpop.f32.mrb[156].mxu0 }
 0x6b5   : > { %v4227_v49 = vpop.f32.mrb[157].mxu0 }
 0x6b6   : > { %v4228_v55 = vadd.f32 %v4227_v49, %v4226_v38  ;;  %v4229_v45 = vpop.f32.mrb[158].mxu0  ;;  %v2608_v19 = vpack.c.bf16 %v2583_v47, %v2582_v53 }
 0x6b7   : > { %v4230_v50 = vpop.f32.mrb[159].mxu0 }
 0x6b8   : > { %v2500_v3 = vadd.f32 %v4228_v55, %v5934_v51  ;;  %v4231_v2 = vadd.f32 %v4230_v50, %v4229_v45  ;;  %4478 = vmatprep.mubr.bf16.mxu0 %v2608_v19 }
 0x6ba   : > { %v2503_v21 = vadd.f32 %v4231_v2, %v5934_v51  ;;  %v2584_v18 = vmax.f32 %v2500_v3, 0.0 }
 0x6bc   : > { %v2585_v22 = vmax.f32 %v2503_v21, 0.0  ;;  %v4232_v48 = vpop.f32.mrb[160].mxu0 }
 0x6bd   : > { %v4233_v7 = vpop.f32.mrb[161].mxu0 }
 0x6be   : > { %v4234_v61 = vadd.f32 %v4233_v7, %v4232_v48  ;;  %v4235_v15 = vpop.f32.mrb[162].mxu0  ;;  %v2609_v25 = vpack.c.bf16 %v2585_v22, %v2584_v18 }
 0x6bf   : > { %v4236_v30 = vpop.f32.mrb[163].mxu0 }
 0x6c0   : > { %v2508_v28 = vadd.f32 %v4234_v61, %v5934_v51  ;;  %v4237_v13 = vadd.f32 %v4236_v30, %v4235_v15  ;;  %4479 = vmatmul.mubr.bf16.gmra.mrb[204].mxu0 %v2609_v25 }
 0x6c2   : > { %v2511_v57 = vadd.f32 %v4237_v13, %v5934_v51  ;;  %v2586_v41 = vmax.f32 %v2508_v28, 0.0 }
 0x6c4   : > { %v2587_v32 = vmax.f32 %v2511_v57, 0.0  ;;  %v4238_v27 = vpop.f32.mrb[164].mxu0 }
 0x6c5   : > { %v4239_v9 = vpop.f32.mrb[165].mxu0 }
 0x6c6   : > { %v4240_v11 = vadd.f32 %v4239_v9, %v4238_v27  ;;  %v4241_v29 = vpop.f32.mrb[166].mxu0  ;;  %v2610_v35 = vpack.c.bf16 %v2587_v32, %v2586_v41 }
 0x6c7   : > { %v4242_v31 = vpop.f32.mrb[167].mxu0 }
 0x6c8   : > { %v2516_v20 = vadd.f32 %v4240_v11, %v5934_v51  ;;  %v4243_v53 = vadd.f32 %v4242_v31, %v4241_v29  ;;  %4482 = vmatprep.mubr.bf16.mxu0 %v2610_v35 }
 0x6ca   : > { %v2519_v47 = vadd.f32 %v4243_v53, %v5934_v51  ;;  %v2588_v38 = vmax.f32 %v2516_v20, 0.0 }
 0x6cc   : > { %v2589_v49 = vmax.f32 %v2519_v47, 0.0  ;;  %v4244_v55 = vpop.f32.mrb[168].mxu0 }
 0x6cd   : > { %v4245_v45 = vpop.f32.mrb[169].mxu0 }
 0x6ce   : > { %v4246_v19 = vadd.f32 %v4245_v45, %v4244_v55  ;;  %v4247_v50 = vpop.f32.mrb[170].mxu0  ;;  %v2611_v3 = vpack.c.bf16 %v2589_v49, %v2588_v38 }
 0x6cf   : > { %v4248_v2 = vpop.f32.mrb[171].mxu0 }
 0x6d0   : > { %v2524_v21 = vadd.f32 %v4246_v19, %v5934_v51  ;;  %v4249_v18 = vadd.f32 %v4248_v2, %v4247_v50  ;;  %4483 = vmatmul.mubr.bf16.gmra.mrb[208].mxu0 %v2611_v3 }
 0x6d2   : > { %v2527_v22 = vadd.f32 %v4249_v18, %v5934_v51  ;;  %v2590_v48 = vmax.f32 %v2524_v21, 0.0 }
 0x6d4   : > { %v2591_v7 = vmax.f32 %v2527_v22, 0.0  ;;  %v4250_v61 = vpop.f32.mrb[172].mxu0 }
 0x6d5   : > { %v4251_v15 = vpop.f32.mrb[173].mxu0 }
 0x6d6   : > { %v4252_v25 = vadd.f32 %v4251_v15, %v4250_v61  ;;  %v4253_v30 = vpop.f32.mrb[174].mxu0  ;;  %v2612_v28 = vpack.c.bf16 %v2591_v7, %v2590_v48 }
 0x6d7   : > { %v4254_v13 = vpop.f32.mrb[175].mxu0 }
 0x6d8   : > { %v2532_v57 = vadd.f32 %v4252_v25, %v5934_v51  ;;  %v4255_v41 = vadd.f32 %v4254_v13, %v4253_v30  ;;  %4486 = vmatprep.mubr.bf16.mxu0 %v2612_v28 }
 0x6da   : > { %v2535_v32 = vadd.f32 %v4255_v41, %v5934_v51  ;;  %v2592_v27 = vmax.f32 %v2532_v57, 0.0 }
 0x6dc   : > { %v2593_v9 = vmax.f32 %v2535_v32, 0.0  ;;  %v4256_v11 = vpop.f32.mrb[176].mxu0 }
 0x6dd   : > { %v4257_v29 = vpop.f32.mrb[177].mxu0 }
 0x6de   : > { %v4258_v35 = vadd.f32 %v4257_v29, %v4256_v11  ;;  %v4259_v31 = vpop.f32.mrb[178].mxu0  ;;  %v2613_v20 = vpack.c.bf16 %v2593_v9, %v2592_v27 }
 0x6df   : > { %v4260_v53 = vpop.f32.mrb[179].mxu0 }
 0x6e0   : > { %v2540_v47 = vadd.f32 %v4258_v35, %v5934_v51  ;;  %v4261_v38 = vadd.f32 %v4260_v53, %v4259_v31  ;;  %4487 = vmatmul.mubr.bf16.gmra.mrb[212].mxu0 %v2613_v20 }
 0x6e2   : > { %v2543_v49 = vadd.f32 %v4261_v38, %v5934_v51  ;;  %v2594_v55 = vmax.f32 %v2540_v47, 0.0 }
 0x6e4   : > { %v2595_v45 = vmax.f32 %v2543_v49, 0.0  ;;  %v4262_v19 = vpop.f32.mrb[180].mxu0 }
 0x6e5   : > { %v4263_v50 = vpop.f32.mrb[181].mxu0 }
 0x6e6   : > { %v4264_v3 = vadd.f32 %v4263_v50, %v4262_v19  ;;  %v4265_v2 = vpop.f32.mrb[182].mxu0  ;;  %v2614_v21 = vpack.c.bf16 %v2595_v45, %v2594_v55 }
 0x6e7   : > { %v4266_v18 = vpop.f32.mrb[183].mxu0 }
 0x6e8   : > { %v2548_v22 = vadd.f32 %v4264_v3, %v5934_v51  ;;  %v4267_v48 = vadd.f32 %v4266_v18, %v4265_v2  ;;  %4490 = vmatprep.mubr.bf16.mxu0 %v2614_v21  ;;  %v5987_v2 = vld [vmem:[%s6088_s9] ss:$0 sm:$0xff] }
 0x6e9   : > { %v2860_v21 = vadd.f32 %v5887_v62, %v5987_v2 }
 0x6ea   : > { %v2551_v7 = vadd.f32 %v4267_v48, %v5934_v51  ;;  %v2596_v61 = vmax.f32 %v2548_v22, 0.0  ;;  %v2852_v22 = vadd.f32 %v5883_v40, %v5987_v2 }
 0x6ec   : > { %v2597_v15 = vmax.f32 %v2551_v7, 0.0  ;;  %v4268_v25 = vpop.f32.mrb[184].mxu0 }
 0x6ed   : > { %v4269_v30 = vpop.f32.mrb[185].mxu0 }
 0x6ee   : > { %v4270_v28 = vadd.f32 %v4269_v30, %v4268_v25  ;;  %v4271_v13 = vpop.f32.mrb[186].mxu0  ;;  %v2615_v57 = vpack.c.bf16 %v2597_v15, %v2596_v61  ;;  %v2855_v25 = vadd.f32 %v5885_v54, %v5987_v2  ;;  %v2876_v54 = vadd.f32 %v5895_v8, %v5987_v2 }
 0x6ef   : > { %v4272_v41 = vpop.f32.mrb[187].mxu0 }
 0x6f0   : > { %v2556_v32 = vadd.f32 %v4270_v28, %v5934_v51  ;;  %v4273_v27 = vadd.f32 %v4272_v41, %v4271_v13  ;;  %4491 = vmatmul.mubr.bf16.gmra.mrb[216].mxu0 %v2615_v57 }
 0x6f2   : > { %v2559_v9 = vadd.f32 %v4273_v27, %v5934_v51  ;;  %v2598_v11 = vmax.f32 %v2556_v32, 0.0 }
 0x6f4   : > { %v2599_v29 = vmax.f32 %v2559_v9, 0.0  ;;  %v4274_v35 = vpop.f32.mrb[188].mxu0  ;;  %v2868_v9 = vadd.f32 %v5891_v0, %v5987_v2 }
 0x6f5   : > { %v4275_v31 = vpop.f32.mrb[189].mxu0 }
 0x6f6   : > { %v4276_v20 = vadd.f32 %v4275_v31, %v4274_v35  ;;  %v4277_v53 = vpop.f32.mrb[190].mxu0  ;;  %v2616_v47 = vpack.c.bf16 %v2599_v29, %v2598_v11  ;;  %v2879_v35 = vadd.f32 %v5897_v42, %v5987_v2 }
 0x6f7   : > { %v4278_v38 = vpop.f32.mrb[191].mxu0 }
 0x6f8   : > { %v2564_v49 = vadd.f32 %v4276_v20, %v5934_v51  ;;  %v4279_v55 = vadd.f32 %v4278_v38, %v4277_v53  ;;  %4494 = vmatprep.mubr.bf16.mxu1 %v2616_v47  ;;  %v2871_v53 = vadd.f32 %v5893_v43, %v5987_v2 }
 0x6fa   : > { %v2567_v45 = vadd.f32 %v4279_v55, %v5934_v51  ;;  %v2600_v19 = vmax.f32 %v2564_v49, 0.0  ;;  %v2863_v51 = vadd.f32 %v5889_v46, %v5987_v2 }
 0x6fc   : > { %v2601_v50 = vmax.f32 %v2567_v45, 0.0 }
 0x6fe   : > { %v2617_v3 = vpack.c.bf16 %v2601_v50, %v2600_v19 }
 0x700   : > { %4495 = vmatmul.mubr.bf16.vlgmr.msra.gmra.mrb[224].mxu1 %v2617_v3  ;;  %v2892_v3 = vadd.f32 %v5903_v16, %v5987_v2 }
 0x763   : > { %v4468_v18 = vpop.f32.mrb[192].mxu0 }
 0x764   : > { %v3021_v48 = vadd.f32 %v4468_v18, %v2860_v21  ;;  %v3012_v7 = vpop.f32.mrb[193].mxu0  ;;  %v2884_v21 = vadd.f32 %v5899_v58, %v5987_v2 }
 0x765   : > { %v3013_v61 = vadd.f32 %v3012_v7, %v2852_v22  ;;  %v4469_v15 = vpop.f32.mrb[194].mxu0  ;;  %v2895_v22 = vadd.f32 %v5905_v26, %v5987_v2 }
 0x766   : > { %v3024_v30 = vadd.f32 %v4469_v15, %v2863_v51  ;;  %v3015_v28 = vpop.f32.mrb[195].mxu0  ;;  %v3141_v57 = vmax.f32 %v3021_v48, 0.0  ;;  %v2887_v51 = vadd.f32 %v5901_v10, %v5987_v2 }
 0x767   : > { %v3016_v13 = vadd.f32 %v3015_v28, %v2855_v25  ;;  %v3139_v62 = vmax.f32 %v3013_v61, 0.0 }
 0x768   : > { %v3142_v41 = vmax.f32 %v3024_v30, 0.0 }
 0x769   : > { %v3140_v40 = vmax.f32 %v3016_v13, 0.0 }
 0x76a   : > { %v3616_v46 = vpack.c.bf16 %v3142_v41, %v3141_v57  ;;  %v2908_v41 = vadd.f32 %v5911_v44, %v5987_v2 }
 0x76b   : > { %v3611_v32 = vpack.c.bf16 %v3140_v40, %v3139_v62  ;;  %v2900_v62 = vadd.f32 %v5907_v63, %v5987_v2 }
 0x76c   : > { %3688 = vst [vmem:[%s6002_s30 + $0x8] sm:$0xff] %v3616_v46   ;;  %v2911_v46 = vadd.f32 %v5913_v33, %v5987_v2 }
 0x76d   : > { %3612 = vst [vmem:[%s6002_s30] sm:$0xff] %v3611_v32  }
 0x773   : > { %v4472_v27 = vpop.f32.mrb[196].mxu0 }
 0x774   : > { %v3037_v11 = vadd.f32 %v4472_v27, %v2876_v54  ;;  %v3028_v29 = vpop.f32.mrb[197].mxu0  ;;  %v2903_v27 = vadd.f32 %v5909_v34, %v5987_v2 }
 0x775   : > { %v3029_v31 = vadd.f32 %v3028_v29, %v2868_v9  ;;  %v4473_v20 = vpop.f32.mrb[198].mxu0 }
 0x776   : > { %v3040_v47 = vadd.f32 %v4473_v20, %v2879_v35  ;;  %v3031_v38 = vpop.f32.mrb[199].mxu0  ;;  %v3145_v8 = vmax.f32 %v3037_v11, 0.0 }
 0x777   : > { %v3032_v49 = vadd.f32 %v3031_v38, %v2871_v53  ;;  %v3143_v45 = vmax.f32 %v3029_v31, 0.0  ;;  %v2916_v38 = vadd.f32 %v5915_v12, %v5987_v2 }
 0x778   : > { %v3146_v55 = vmax.f32 %v3040_v47, 0.0  ;;  %v2924_v47 = vadd.f32 %v5919_v1, %v5987_v2 }
 0x779   : > { %v3144_v19 = vmax.f32 %v3032_v49, 0.0 }
 0x77a   : > { %v3626_v0 = vpack.c.bf16 %v3146_v55, %v3145_v8  ;;  %v2927_v8 = vadd.f32 %v5921_v4, %v5987_v2 }
 0x77b   : > { %v3621_v50 = vpack.c.bf16 %v3144_v19, %v3143_v45  ;;  %v2919_v19 = vadd.f32 %v5917_v6, %v5987_v2 }
 0x77c   : > { %3690 = vst [vmem:[%s6002_s30 + $0x18] sm:$0xff] %v3626_v0  }
 0x77d   : > { %3689 = vst [vmem:[%s6002_s30 + $0x10] sm:$0xff] %v3621_v50  }
 0x783   : > { %v4476_v42 = vpop.f32.mrb[200].mxu0 }
 0x784   : > { %v3053_v43 = vadd.f32 %v4476_v42, %v2892_v3  ;;  %v3044_v18 = vpop.f32.mrb[201].mxu0 }
 0x785   : > { %v3045_v48 = vadd.f32 %v3044_v18, %v2884_v21  ;;  %v4477_v7 = vpop.f32.mrb[202].mxu0 }
 0x786   : > { %v3056_v61 = vadd.f32 %v4477_v7, %v2895_v22  ;;  %v3047_v15 = vpop.f32.mrb[203].mxu0  ;;  %v3149_v16 = vmax.f32 %v3053_v43, 0.0  ;;  %v2940_v22 = vadd.f32 %v5927_v14, %v5987_v2 }
 0x787   : > { %v3048_v25 = vadd.f32 %v3047_v15, %v2887_v51  ;;  %v3147_v28 = vmax.f32 %v3045_v48, 0.0  ;;  %v2932_v48 = vadd.f32 %v5923_v52, %v5987_v2  ;;  %v2943_v51 = vadd.f32 %v5929_v39, %v5987_v2 }
 0x788   : > { %v3150_v30 = vmax.f32 %v3056_v61, 0.0 }
 0x789   : > { %v3148_v13 = vmax.f32 %v3048_v25, 0.0  ;;  %v2935_v25 = vadd.f32 %v5925_v37, %v5987_v2 }
 0x78a   : > { %v3636_v58 = vpack.c.bf16 %v3150_v30, %v3149_v16 }
 0x78b   : > { %v3631_v57 = vpack.c.bf16 %v3148_v13, %v3147_v28 }
 0x78c   : > { %3692 = vst [vmem:[%s6002_s30 + $0x28] sm:$0xff] %v3636_v58  }
 0x78d   : > { %3691 = vst [vmem:[%s6002_s30 + $0x20] sm:$0xff] %v3631_v57  }
 0x793   : > { %v4480_v26 = vpop.f32.mrb[204].mxu0 }
 0x794   : > { %v3069_v10 = vadd.f32 %v4480_v26, %v2908_v41  ;;  %v3060_v40 = vpop.f32.mrb[205].mxu0  ;;  %v2956_v26 = vadd.f32 %v5943_v60, %v5987_v2 }
 0x795   : > { %v3061_v32 = vadd.f32 %v3060_v40, %v2900_v62  ;;  %v4481_v54 = vpop.f32.mrb[206].mxu0  ;;  %v2948_v62 = vadd.f32 %v5937_v24, %v5987_v2  ;;  %v2959_v40 = vadd.f32 %v5946_v5, %v5987_v2 }
 0x796   : > { %v3072_v9 = vadd.f32 %v4481_v54, %v2911_v46  ;;  %v3063_v11 = vpop.f32.mrb[207].mxu0  ;;  %v3153_v44 = vmax.f32 %v3069_v10, 0.0  ;;  %v2951_v54 = vadd.f32 %v5940_v17, %v5987_v2 }
 0x797   : > { %v3064_v29 = vadd.f32 %v3063_v11, %v2903_v27  ;;  %v3151_v31 = vmax.f32 %v3061_v32, 0.0 }
 0x798   : > { %v3154_v35 = vmax.f32 %v3072_v9, 0.0 }
 0x799   : > { %v3152_v20 = vmax.f32 %v3064_v29, 0.0 }
 0x79a   : > { %v3646_v63 = vpack.c.bf16 %v3154_v35, %v3153_v44 }
 0x79b   : > { %v3641_v53 = vpack.c.bf16 %v3152_v20, %v3151_v31  ;;  %v2972_v20 = vadd.f32 %v5955_v23, %v5987_v2 }
 0x79c   : > { %3694 = vst [vmem:[%s6002_s30 + $0x38] sm:$0xff] %v3646_v63   ;;  %v2964_v63 = vadd.f32 %v5949_v36, %v5987_v2 }
 0x79d   : > { %3693 = vst [vmem:[%s6002_s30 + $0x30] sm:$0xff] %v3641_v53  }
 0x7a3   : > { %v4484_v33 = vpop.f32.mrb[208].mxu0 }
 0x7a4   : > { %v3085_v34 = vadd.f32 %v4484_v33, %v2924_v47  ;;  %v3076_v49 = vpop.f32.mrb[209].mxu0  ;;  %v2975_v47 = vadd.f32 %v5958_v59, %v5987_v2 }
 0x7a5   : > { %v3077_v55 = vadd.f32 %v3076_v49, %v2916_v38  ;;  %v4485_v45 = vpop.f32.mrb[210].mxu0 }
 0x7a6   : > { %v3088_v0 = vadd.f32 %v4485_v45, %v2927_v8  ;;  %v3079_v50 = vpop.f32.mrb[211].mxu0  ;;  %v3157_v1 = vmax.f32 %v3085_v34, 0.0  ;;  %v2967_v34 = vadd.f32 %v5952_v56, %v5987_v2 }
 0x7a7   : > { %v3080_v3 = vadd.f32 %v3079_v50, %v2919_v19  ;;  %v3155_v21 = vmax.f32 %v3077_v55, 0.0 }
 0x7a8   : > { %v3158_v42 = vmax.f32 %v3088_v0, 0.0 }
 0x7a9   : > { %v3156_v43 = vmax.f32 %v3080_v3, 0.0 }
 0x7aa   : > { %v3656_v12 = vpack.c.bf16 %v3158_v42, %v3157_v1 }
 0x7ab   : > { %v3651_v18 = vpack.c.bf16 %v3156_v43, %v3155_v21 }
 0x7ac   : > { %3696 = vst [vmem:[%s6002_s30 + $0x48] sm:$0xff] %v3656_v12  }
 0x7ad   : > { %3695 = vst [vmem:[%s6002_s30 + $0x40] sm:$0xff] %v3651_v18  }
 0x7b3   : > { %v4488_v4 = vpop.f32.mrb[212].mxu0 }
 0x7b4   : > { %v3101_v6 = vadd.f32 %v4488_v4, %v2940_v22  ;;  %v3092_v7 = vpop.f32.mrb[213].mxu0 }
 0x7b5   : > { %v3093_v61 = vadd.f32 %v3092_v7, %v2932_v48  ;;  %v4489_v15 = vpop.f32.mrb[214].mxu0 }
 0x7b6   : > { %v3104_v16 = vadd.f32 %v4489_v15, %v2943_v51  ;;  %v3095_v30 = vpop.f32.mrb[215].mxu0  ;;  %v3161_v14 = vmax.f32 %v3101_v6, 0.0 }
 0x7b7   : > { %v3096_v28 = vadd.f32 %v3095_v30, %v2935_v25  ;;  %v3159_v58 = vmax.f32 %v3093_v61, 0.0 }
 0x7b8   : > { %v3162_v13 = vmax.f32 %v3104_v16, 0.0 }
 0x7b9   : > { %v3160_v57 = vmax.f32 %v3096_v28, 0.0 }
 0x7ba   : > { %v3666_v52 = vpack.c.bf16 %v3162_v13, %v3161_v14 }
 0x7bb   : > { %v3661_v41 = vpack.c.bf16 %v3160_v57, %v3159_v58 }
 0x7bc   : > { %3698 = vst [vmem:[%s6002_s30 + $0x58] sm:$0xff] %v3666_v52  }
 0x7bd   : > { %3697 = vst [vmem:[%s6002_s30 + $0x50] sm:$0xff] %v3661_v41  }
 0x7c3   : > { %v4492_v39 = vpop.f32.mrb[216].mxu0 }
 0x7c4   : > { %v3117_v37 = vadd.f32 %v4492_v39, %v2956_v26  ;;  %v3108_v10 = vpop.f32.mrb[217].mxu0 }
 0x7c5   : > { %v3109_v46 = vadd.f32 %v3108_v10, %v2948_v62  ;;  %v4493_v32 = vpop.f32.mrb[218].mxu0 }
 0x7c6   : > { %v3120_v27 = vadd.f32 %v4493_v32, %v2959_v40  ;;  %v3111_v9 = vpop.f32.mrb[219].mxu0  ;;  %v3165_v60 = vmax.f32 %v3117_v37, 0.0 }
 0x7c7   : > { %v3112_v11 = vadd.f32 %v3111_v9, %v2951_v54  ;;  %v3163_v44 = vmax.f32 %v3109_v46, 0.0 }
 0x7c8   : > { %v3166_v29 = vmax.f32 %v3120_v27, 0.0 }
 0x7c9   : > { %v3164_v35 = vmax.f32 %v3112_v11, 0.0 }
 0x7ca   : > { %v3676_v24 = vpack.c.bf16 %v3166_v29, %v3165_v60 }
 0x7cb   : > { %v3671_v31 = vpack.c.bf16 %v3164_v35, %v3163_v44 }
 0x7cc   : > { %3700 = vst [vmem:[%s6002_s30 + $0x68] sm:$0xff] %v3676_v24  }
 0x7cd   : > { %3699 = vst [vmem:[%s6002_s30 + $0x60] sm:$0xff] %v3671_v31  }
 0x7d3   : > { %v4496_v5 = vpop.f32.mrb[224].mxu1 }
 0x7d4   : > { %v3133_v17 = vadd.f32 %v4496_v5, %v2972_v20  ;;  %v3124_v53 = vpop.f32.mrb[225].mxu1 }
 0x7d5   : > { %v3125_v33 = vadd.f32 %v3124_v53, %v2964_v63  ;;  %v4497_v38 = vpop.f32.mrb[226].mxu1 }
 0x7d6   : > { %v3136_v49 = vadd.f32 %v4497_v38, %v2975_v47  ;;  %v3127_v8 = vpop.f32.mrb[227].mxu1  ;;  %v3169_v23 = vmax.f32 %v3133_v17, 0.0 }
 0x7d7   : > { %v3128_v55 = vadd.f32 %v3127_v8, %v2967_v34  ;;  %v3167_v19 = vmax.f32 %v3125_v33, 0.0 }
 0x7d8   : > { %v3170_v45 = vmax.f32 %v3136_v49, 0.0 }
 0x7d9   : > { %v3168_v0 = vmax.f32 %v3128_v55, 0.0 }
 0x7da   : > { %v3686_v36 = vpack.c.bf16 %v3170_v45, %v3169_v23 }
 0x7db   : > { %v3681_v50 = vpack.c.bf16 %v3168_v0, %v3167_v19 }
 0x7dc   : > { %3702 = vst [vmem:[%s6002_s30 + $0x78] sm:$0xff] %v3686_v36  }
 0x7dd   : > { %3701 = vst [vmem:[%s6002_s30 + $0x70] sm:$0xff] %v3681_v50  }
 0x7de PF: > { %s20_s13 = sadd.s32 1, %s4698_s13  }
 0x7df   : > { %p17_p5 = scmp.ge.s32.totalorder %s20_s13, 4  }
 0x7e1   :  { %19 = sbr.rel (!%p17_p5) target bundleno = 1 (0x1), region = 93 }

</bundles_post_ra>
